<compile_context>
chip_gen: v7x
topology: tpu7x:2x2x1
jax: 0.10.0
libtpu: 0.0.40
codegen_flags: <defaults>
</compile_context>

<pallas_src>
import functools

import numpy as np
import jax
import jax.numpy as jnp
from jax import lax
from jax.experimental import pallas as pl
from jax.experimental.pallas import tpu as pltpu

_LANES = 128


def _round_up(x: int, m: int) -> int:
    return ((x + m - 1) // m) * m


def _split_bf16_exact(s):
    """Split f32 `s` into three bf16-exact f32 pieces, s == s0 + s1 + s2."""
    s0 = s.astype(jnp.bfloat16).astype(jnp.float32)
    r = s - s0
    s1 = r.astype(jnp.bfloat16).astype(jnp.float32)
    return s0, s1, r - s1


def _temporal_embedding_kernel(s_ref, oh_ref, w_ref, b_ref, out_ref, *,
                               contract_dim: int):
    """One row block of the lane-dense output slab.

    s_ref   : (G, TM) stamps, sublane-packed   (contract_dim=0, primary)
              (TM, G) stamps, row-major        (contract_dim=1, fallback)
    oh_ref  : (G, 128) one-hot expansion matrix  (VMEM resident)
    w_ref   : (1, 128) weight tiled G times      (VMEM resident)
    b_ref   : (1, 128) bias   tiled G times      (VMEM resident)
    out_ref : (TM, 128) slab block; lane c = (timestep c // E, channel c % E)
    """
    dn = (((contract_dim,), (0,)), ((), ()))
    oh = oh_ref[...]
    # [review #1] timestep->lane expansion on the MXU instead of a VPU select
    # chain.  bf16-exact pieces keep the one-hot matmul exact no matter how
    # many bf16 passes the f32 MXU path uses.
    s0, s1, s2 = _split_bf16_exact(s_ref[...])
    s_exp = (lax.dot_general(s0, oh, dn, preferred_element_type=jnp.float32)
             + lax.dot_general(s1, oh, dn, preferred_element_type=jnp.float32)
             + lax.dot_general(s2, oh, dn, preferred_element_type=jnp.float32))
    span = s_exp * w_ref[...] + b_ref[...]
    out_ref[...] = jnp.cos(span).astype(out_ref.dtype)


def temporal_embedding(stamps: jax.Array,
                       weight: jax.Array,
                       bias: jax.Array,
                       *,
                       block_rows: int = 2048,
                       out_dtype=jnp.float32) -> jax.Array:
    """stamps: (B, L); weight, bias: (E,) -> cos(stamps[..., None] * w + b)."""
    B, L = stamps.shape
    E = int(weight.shape[0])
    C = _LANES
    if C % E != 0:
        # TODO(synk): pad the channel dim up to a divisor of 128 for general E.
        raise ValueError("embedding_dim must divide 128")
    G = C // E                                  # timesteps per 128-lane row

    # [review #3] pad L (not B*L) to a multiple of G.
    Lp = _round_up(L, G)
    Rb = Lp // G
    R = B * Rb                                  # logical slab rows

    # [review #4] blocks are multiples of 128 rows; >=2 grid steps as soon as
    # there are >=256 slab rows so both v7x TensorCores get work.
    block_rows = max(_LANES, (int(block_rows) // _LANES) * _LANES)
    Rp = _round_up(R, _LANES)
    nb = pl.cdiv(Rp, block_rows)
    if nb == 1 and Rp >= 2 * _LANES:
        nb = 2
    tm = _round_up(pl.cdiv(Rp, nb), _LANES)
    nb = pl.cdiv(Rp, tm)
    Rpad = nb * tm

    # ---- operand prep (dense; no 16x lane-padded intermediates) ------------
    sp = stamps.astype(jnp.float32)
    if Lp != L:
        sp = jnp.pad(sp, ((0, 0), (0, Lp - L)))
    # [review #2] stamps handed to the kernel as (G, Rpad): 8 f32 sublanes x
    # lane-dense rows.
    s_gr = jnp.transpose(sp.reshape(B, Rb, G), (2, 0, 1)).reshape(G, R)
    if Rpad != R:
        s_gr = jnp.pad(s_gr, ((0, 0), (0, Rpad - R)))

    w_row = jnp.tile(weight.astype(jnp.float32), G).reshape(1, C)
    b_row = jnp.tile(bias.astype(jnp.float32), G).reshape(1, C)
    onehot = jnp.asarray(
        (np.arange(C)[None, :] // E == np.arange(G)[:, None]).astype(np.float32))

    out_itemsize = np.dtype(out_dtype).itemsize
    # [review #8] advisory cost estimate for XLA's scheduler.
    cost = pl.CostEstimate(
        flops=int(6 * G * Rpad * C + 4 * Rpad * C),
        transcendentals=int(Rpad * C),
        bytes_accessed=int(G * Rpad * 4 + Rpad * C * out_itemsize + (G + 2) * C * 4),
    )
    # [review #5] keep scoped VMEM in line with the (sweepable) block size.
    vmem_need = 2 * (tm * C * out_itemsize + G * tm * 4) + (G + 2) * C * 4 + (1 << 16)
    vmem_limit = int(min(max(3 * vmem_need, 24 << 20), 56 << 20))
    cparams = pltpu.CompilerParams(
        dimension_semantics=("parallel",),
        vmem_limit_bytes=vmem_limit,
    )

    def run(kernel, s_in, s_spec):
        return pl.pallas_call(
            kernel,
            out_shape=jax.ShapeDtypeStruct((Rpad, C), out_dtype),
            grid=(nb,),
            in_specs=[
                s_spec,
                pl.BlockSpec((G, C), lambda i: (0, 0)),   # one-hot (resident)
                pl.BlockSpec((1, C), lambda i: (0, 0)),   # weight  (resident)
                pl.BlockSpec((1, C), lambda i: (0, 0)),   # bias    (resident)
            ],
            out_specs=pl.BlockSpec((tm, C), lambda i: (i, 0)),
            compiler_params=cparams,
            cost_estimate=cost,
        )(s_in, onehot, w_row, b_row)

    try:
        # Primary: sublane-packed stamps + transposed-lhs (TN) one-hot matmul.
        slab = run(
            functools.partial(_temporal_embedding_kernel, contract_dim=0),
            s_gr,
            pl.BlockSpec((G, tm), lambda i: (0, i)),
        )
    except Exception:
        # Fallback for Mosaic builds without transposed-lhs matmul support:
        # row-major stamps (lane-padded input) + standard NN one-hot matmul.
        s_rg = sp.reshape(R, G)
        if Rpad != R:
            s_rg = jnp.pad(s_rg, ((0, Rpad - R), (0, 0)))
        slab = run(
            functools.partial(_temporal_embedding_kernel, contract_dim=1),
            s_rg,
            pl.BlockSpec((tm, G), lambda i: (i, 0)),
        )

    out = slab[:R] if Rpad != R else slab
    out = out.reshape(B, Lp, E)
    if Lp != L:
        out = out[:, :L]
    # NOTE [review #3]: (B, L, 16) lane-pads 16 -> 128 in the TPU tiled layout,
    # so XLA may insert one relayout copy here; fused consumers should take the
    # (Rpad, 128) slab instead.
    return out


def make_params(embedding_dim: int = 16):
    # Matches PyTorch __init__: weight = 1 / 10**linspace(0, 9, E), bias = 0.
    weight = jnp.asarray(1.0 / 10.0 ** np.linspace(0, 9, embedding_dim),
                         dtype=jnp.float32)
    bias = jnp.zeros((embedding_dim,), dtype=jnp.float32)
    return weight, bias


def _reference(stamps, weight, bias):
    return jnp.cos(stamps[:, :, None] * weight[None, None, :]
                   + bias[None, None, :])


if __name__ == "__main__":
    E = 16
    weight, bias = make_params(E)
    key = jax.random.PRNGKey(0)
    k1, k2, k3 = jax.random.split(key, 3)

    # Case 1: small shape implied by the module (batch=2, seq=8, E=16).
    stamps1 = jax.random.uniform(k1, (2, 8), dtype=jnp.float32,
                                 minval=0.0, maxval=200.0)
    out1 = jax.block_until_ready(temporal_embedding(stamps1, weight, bias))
    assert out1.shape == (2, 8, E) and out1.dtype == jnp.float32
    np.testing.assert_allclose(np.asarray(out1),
                               np.asarray(_reference(stamps1, weight, bias)),
                               rtol=1e-4, atol=1e-4)

    # Case 2: multi-step grid (256 slab rows -> 2 row blocks of 128).
    stamps2 = jax.random.uniform(k2, (2, 1024), dtype=jnp.float32,
                                 minval=0.0, maxval=200.0)
    out2 = jax.block_until_ready(
        temporal_embedding(stamps2, weight, bias, block_rows=128))
    assert out2.shape == (2, 1024, E)
    np.testing.assert_allclose(np.asarray(out2),
                               np.asarray(_reference(stamps2, weight, bias)),
                               rtol=1e-4, atol=1e-4)

    # Case 3: L not divisible by 128//E exercises the L-padding path.
    stamps3 = jax.random.uniform(k3, (3, 5), dtype=jnp.float32,
                                 minval=0.0, maxval=200.0)
    out3 = jax.block_until_ready(temporal_embedding(stamps3, weight, bias))
    assert out3.shape == (3, 5, E)
    np.testing.assert_allclose(np.asarray(out3),
                               np.asarray(_reference(stamps3, weight, bias)),
                               rtol=1e-4, atol=1e-4)

    print("KERNEL_OK")
</pallas_src>

<mosaic_0001>
module attributes {stable_mosaic.version = 11 : i64} {
  func.func @_temporal_embedding_kernel(%arg0: i32, %arg1: memref<8x128xf32, #tpu.memory_space<vmem>>, %arg2: memref<8x128xf32, #tpu.memory_space<vmem>>, %arg3: memref<1x128xf32, #tpu.memory_space<vmem>>, %arg4: memref<1x128xf32, #tpu.memory_space<vmem>>, %arg5: memref<128x128xf32, #tpu.memory_space<vmem>>) attributes {dimension_semantics = [#tpu.dimension_semantics<parallel>], iteration_bounds = array<i64: 1>, scalar_prefetch = 0 : i64, scratch_operands = 0 : i64, tpu.core_type = #tpu.core_type<tc>, window_params = [{transform_indices = @transform_0, window_bounds = array<i64: 8, 128>}, {pipeline_mode = #tpu.pipeline_mode<synchronous>, transform_indices = @transform_1, window_bounds = array<i64: 8, 128>}, {pipeline_mode = #tpu.pipeline_mode<synchronous>, transform_indices = @transform_2, window_bounds = array<i64: 1, 128>}, {pipeline_mode = #tpu.pipeline_mode<synchronous>, transform_indices = @transform_3, window_bounds = array<i64: 1, 128>}, {transform_indices = @transform_4, window_bounds = array<i64: 128, 128>}]} {
    %c0 = arith.constant 0 : index
    %c0_0 = arith.constant 0 : index
    %0 = vector.load %arg2[%c0, %c0_0] : memref<8x128xf32, #tpu.memory_space<vmem>>, vector<8x128xf32>
    %c0_1 = arith.constant 0 : index
    %c0_2 = arith.constant 0 : index
    %1 = vector.load %arg1[%c0_1, %c0_2] : memref<8x128xf32, #tpu.memory_space<vmem>>, vector<8x128xf32>
    %2 = arith.truncf %1 : vector<8x128xf32> to vector<8x128xbf16>
    %3 = arith.extf %2 : vector<8x128xbf16> to vector<8x128xf32>
    %4 = arith.subf %1, %3 : vector<8x128xf32>
    %5 = arith.truncf %4 : vector<8x128xf32> to vector<8x128xbf16>
    %6 = arith.extf %5 : vector<8x128xbf16> to vector<8x128xf32>
    %7 = arith.subf %4, %6 : vector<8x128xf32>
    %cst = arith.constant dense<0.000000e+00> : vector<128x128xf32>
    %8 = tpu.matmul %3, %0, %cst {dimension_numbers = #tpu.dot_dimension_numbers<[0], [0], [1], [1], [0, 1, 1, 1], [], []>} : vector<8x128xf32>, vector<8x128xf32>, vector<128x128xf32> -> vector<128x128xf32>
    %cst_3 = arith.constant dense<0.000000e+00> : vector<128x128xf32>
    %9 = tpu.matmul %6, %0, %cst_3 {dimension_numbers = #tpu.dot_dimension_numbers<[0], [0], [1], [1], [0, 1, 1, 1], [], []>} : vector<8x128xf32>, vector<8x128xf32>, vector<128x128xf32> -> vector<128x128xf32>
    %10 = arith.addf %8, %9 : vector<128x128xf32>
    %cst_4 = arith.constant dense<0.000000e+00> : vector<128x128xf32>
    %11 = tpu.matmul %7, %0, %cst_4 {dimension_numbers = #tpu.dot_dimension_numbers<[0], [0], [1], [1], [0, 1, 1, 1], [], []>} : vector<8x128xf32>, vector<8x128xf32>, vector<128x128xf32> -> vector<128x128xf32>
    %12 = arith.addf %10, %11 : vector<128x128xf32>
    %c0_5 = arith.constant 0 : index
    %c0_6 = arith.constant 0 : index
    %13 = vector.load %arg3[%c0_5, %c0_6] : memref<1x128xf32, #tpu.memory_space<vmem>>, vector<1x128xf32>
    %14 = vector.broadcast %13 : vector<1x128xf32> to vector<128x128xf32>
    %15 = arith.mulf %12, %14 : vector<128x128xf32>
    %c0_7 = arith.constant 0 : index
    %c0_8 = arith.constant 0 : index
    %16 = vector.load %arg4[%c0_7, %c0_8] : memref<1x128xf32, #tpu.memory_space<vmem>>, vector<1x128xf32>
    %17 = vector.broadcast %16 : vector<1x128xf32> to vector<128x128xf32>
    %18 = arith.addf %15, %17 : vector<128x128xf32>
    %19 = math.cos %18 : vector<128x128xf32>
    %c0_9 = arith.constant 0 : index
    %c0_10 = arith.constant 0 : index
    %20 = vector.load %arg5[%c0_9, %c0_10] : memref<128x128xf32, #tpu.memory_space<vmem>>, vector<128x128xf32>
    tpu.vector_store %arg5[%c0_9, %c0_10], %19 {strides = array<i32>} : memref<128x128xf32, #tpu.memory_space<vmem>>, vector<128x128xf32>,
    return
  }
  func.func @transform_0(%arg0: i32) -> (i32, i32) {
    %c0_i32 = arith.constant 0 : i32
    %c0_i32_0 = arith.constant 0 : i32
    return %c0_i32, %arg0 : i32, i32
  }
  func.func @transform_1(%arg0: i32) -> (i32, i32) {
    %c0_i32 = arith.constant 0 : i32
    %c0_i32_0 = arith.constant 0 : i32
    %c0_i32_1 = arith.constant 0 : i32
    return %c0_i32, %c0_i32_0 : i32, i32
  }
  func.func @transform_2(%arg0: i32) -> (i32, i32) {
    %c0_i32 = arith.constant 0 : i32
    %c0_i32_0 = arith.constant 0 : i32
    %c0_i32_1 = arith.constant 0 : i32
    return %c0_i32, %c0_i32_0 : i32, i32
  }
  func.func @transform_3(%arg0: i32) -> (i32, i32) {
    %c0_i32 = arith.constant 0 : i32
    %c0_i32_0 = arith.constant 0 : i32
    %c0_i32_1 = arith.constant 0 : i32
    return %c0_i32, %c0_i32_0 : i32, i32
  }
  func.func @transform_4(%arg0: i32) -> (i32, i32) {
    %c0_i32 = arith.constant 0 : i32
    %c0_i32_0 = arith.constant 0 : i32
    return %arg0, %c0_i32 : i32, i32
  }
}

module attributes {stable_mosaic.version = 11 : i64} {
  func.func @_temporal_embedding_kernel(%arg0: i32, %arg1: memref<128x8xf32, #tpu.memory_space<vmem>>, %arg2: memref<8x128xf32, #tpu.memory_space<vmem>>, %arg3: memref<1x128xf32, #tpu.memory_space<vmem>>, %arg4: memref<1x128xf32, #tpu.memory_space<vmem>>, %arg5: memref<128x128xf32, #tpu.memory_space<vmem>>) attributes {dimension_semantics = [#tpu.dimension_semantics<parallel>], iteration_bounds = array<i64: 1>, scalar_prefetch = 0 : i64, scratch_operands = 0 : i64, tpu.core_type = #tpu.core_type<tc>, window_params = [{transform_indices = @transform_0, window_bounds = array<i64: 128, 8>}, {pipeline_mode = #tpu.pipeline_mode<synchronous>, transform_indices = @transform_1, window_bounds = array<i64: 8, 128>}, {pipeline_mode = #tpu.pipeline_mode<synchronous>, transform_indices = @transform_2, window_bounds = array<i64: 1, 128>}, {pipeline_mode = #tpu.pipeline_mode<synchronous>, transform_indices = @transform_3, window_bounds = array<i64: 1, 128>}, {transform_indices = @transform_4, window_bounds = array<i64: 128, 128>}]} {
    %c0 = arith.constant 0 : index
    %c0_0 = arith.constant 0 : index
    %0 = vector.load %arg2[%c0, %c0_0] : memref<8x128xf32, #tpu.memory_space<vmem>>, vector<8x128xf32>
    %c0_1 = arith.constant 0 : index
    %c0_2 = arith.constant 0 : index
    %1 = vector.load %arg1[%c0_1, %c0_2] : memref<128x8xf32, #tpu.memory_space<vmem>>, vector<128x8xf32>
    %2 = arith.truncf %1 : vector<128x8xf32> to vector<128x8xbf16>
    %3 = arith.extf %2 : vector<128x8xbf16> to vector<128x8xf32>
    %4 = arith.subf %1, %3 : vector<128x8xf32>
    %5 = arith.truncf %4 : vector<128x8xf32> to vector<128x8xbf16>
    %6 = arith.extf %5 : vector<128x8xbf16> to vector<128x8xf32>
    %7 = arith.subf %4, %6 : vector<128x8xf32>
    %cst = arith.constant dense<0.000000e+00> : vector<128x128xf32>
    %8 = tpu.matmul %3, %0, %cst {dimension_numbers = #tpu.dot_dimension_numbers<[1], [0], [0], [1], [0, 0, 1, 1], [], []>} : vector<128x8xf32>, vector<8x128xf32>, vector<128x128xf32> -> vector<128x128xf32>
    %cst_3 = arith.constant dense<0.000000e+00> : vector<128x128xf32>
    %9 = tpu.matmul %6, %0, %cst_3 {dimension_numbers = #tpu.dot_dimension_numbers<[1], [0], [0], [1], [0, 0, 1, 1], [], []>} : vector<128x8xf32>, vector<8x128xf32>, vector<128x128xf32> -> vector<128x128xf32>
    %10 = arith.addf %8, %9 : vector<128x128xf32>
    %cst_4 = arith.constant dense<0.000000e+00> : vector<128x128xf32>
    %11 = tpu.matmul %7, %0, %cst_4 {dimension_numbers = #tpu.dot_dimension_numbers<[1], [0], [0], [1], [0, 0, 1, 1], [], []>} : vector<128x8xf32>, vector<8x128xf32>, vector<128x128xf32> -> vector<128x128xf32>
    %12 = arith.addf %10, %11 : vector<128x128xf32>
    %c0_5 = arith.constant 0 : index
    %c0_6 = arith.constant 0 : index
    %13 = vector.load %arg3[%c0_5, %c0_6] : memref<1x128xf32, #tpu.memory_space<vmem>>, vector<1x128xf32>
    %14 = vector.broadcast %13 : vector<1x128xf32> to vector<128x128xf32>
    %15 = arith.mulf %12, %14 : vector<128x128xf32>
    %c0_7 = arith.constant 0 : index
    %c0_8 = arith.constant 0 : index
    %16 = vector.load %arg4[%c0_7, %c0_8] : memref<1x128xf32, #tpu.memory_space<vmem>>, vector<1x128xf32>
    %17 = vector.broadcast %16 : vector<1x128xf32> to vector<128x128xf32>
    %18 = arith.addf %15, %17 : vector<128x128xf32>
    %19 = math.cos %18 : vector<128x128xf32>
    %c0_9 = arith.constant 0 : index
    %c0_10 = arith.constant 0 : index
    %20 = vector.load %arg5[%c0_9, %c0_10] : memref<128x128xf32, #tpu.memory_space<vmem>>, vector<128x128xf32>
    tpu.vector_store %arg5[%c0_9, %c0_10], %19 {strides = array<i32>} : memref<128x128xf32, #tpu.memory_space<vmem>>, vector<128x128xf32>,
    return
  }
  func.func @transform_0(%arg0: i32) -> (i32, i32) {
    %c0_i32 = arith.constant 0 : i32
    %c0_i32_0 = arith.constant 0 : i32
    return %arg0, %c0_i32 : i32, i32
  }
  func.func @transform_1(%arg0: i32) -> (i32, i32) {
    %c0_i32 = arith.constant 0 : i32
    %c0_i32_0 = arith.constant 0 : i32
    %c0_i32_1 = arith.constant 0 : i32
    return %c0_i32, %c0_i32_0 : i32, i32
  }
  func.func @transform_2(%arg0: i32) -> (i32, i32) {
    %c0_i32 = arith.constant 0 : i32
    %c0_i32_0 = arith.constant 0 : i32
    %c0_i32_1 = arith.constant 0 : i32
    return %c0_i32, %c0_i32_0 : i32, i32
  }
  func.func @transform_3(%arg0: i32) -> (i32, i32) {
    %c0_i32 = arith.constant 0 : i32
    %c0_i32_0 = arith.constant 0 : i32
    %c0_i32_1 = arith.constant 0 : i32
    return %c0_i32, %c0_i32_0 : i32, i32
  }
  func.func @transform_4(%arg0: i32) -> (i32, i32) {
    %c0_i32 = arith.constant 0 : i32
    %c0_i32_0 = arith.constant 0 : i32
    return %arg0, %c0_i32 : i32, i32
  }
}

</mosaic_0001>

<bundles_post_ra>
// kernel: tpu_custom_call.1
= control target key start
LH: loop header
LB: loop body
LE: loop exit
PB: predicated region body
PF: predicated region fallthrough
CT: control target
= control target key end

     0   :  { %9 = vsyncpa [#allocation3], 0  ;;  %s4558_s0 = inlined_call_operand.hbm [shape: f32[8,128], index: 0, kind: input, shape index: {}]   ;;  %s4559_s1 = inlined_call_operand.hbm [shape: f32[8,128], index: 1, kind: input, shape index: {}]   ;;  %s4560_s2 = inlined_call_operand.vmem [shape: f32[1,128], index: 2, kind: input, shape index: {}]   ;;  %s4561_s3 = inlined_call_operand.vmem [shape: f32[1,128], index: 3, kind: input, shape index: {}]   ;;  %s4562_s4 = inlined_call_operand.hbm [shape: f32[128,128], index: 4, kind: output, shape index: {}]  }
   0x1   :  { %10 = vsyncpa [#allocation6], 0 }
   0x2   :  { %11 = vsyncpa [#allocation4], 0  ;;  %s3045_s15 = smov [#allocation2]   ;;  %s3046_s17 = smov [#allocation5]  }
   0x3   :  { %s18_s16 = sshll.u32 %s3045_s15, 4  ;;  %s28_s18 = sshll.u32 %s3046_s17, 4  ;;  %s19_s16 = int_to_ptr.vmem [resolvable:$true] %s18_s16  ;;  %s29_s18 = int_to_ptr.vmem [resolvable:$true] %s28_s18 }
   0x4   :  { %s2973_s21 = scalar_lea.hbm %s4558_s0, 128 }
   0x5   :  { %p2974_p0 = scmp.ne.s32.totalorder %s4558_s0, %s2973_s21  ;;  %p2977_p1 = scmp.lt.u32.totalorder %s2973_s21, %s4558_s0 }
   0x7   :  { %p2979_p2 = pnand %p2977_p1, %p2974_p0 }
   0x9   :  { %2982 = shalt.err (!%p2979_p2)
}
   0xa   :  { %s2983_s26 = scalar_lea.vmem %s19_s16, 128  ;;  %p2988_p4 = scmp.lt.s32.totalorder %s19_s16, %s19_s16 }
   0xb   :  { %p2984_p3 = scmp.ne.s32.totalorder %s19_s16, %s2983_s26  ;;  %p2989_p5 = scmp.lt.s32.totalorder %s2983_s26, %s2983_s26 }
   0xd   :  { %p2990_p6 = por %p2989_p5, %p2988_p4 }
   0xf   :  { %p2991_p7 = pnand %p2990_p6, %p2984_p3 }
  0x11   :  { %2994 = shalt.err (!%p2991_p7)
}
  0x12   :  { %21 = dma.hbm_to_vmem [thread:$0]  %s4558_s0, 128, %s19_s16, [#allocation3]  }
  0x13   :  { %s2995_s5 = scalar_lea.hbm %s4559_s1, 128 }
  0x14   :  { %p2996_p8 = scmp.ne.s32.totalorder %s4559_s1, %s2995_s5  ;;  %p2999_p9 = scmp.lt.u32.totalorder %s2995_s5, %s4559_s1 }
  0x16   :  { %p3001_p10 = pnand %p2999_p9, %p2996_p8 }
  0x18   :  { %3004 = shalt.err (!%p3001_p10)
}
  0x19   :  { %s3005_s10 = scalar_lea.vmem %s29_s18, 128  ;;  %p3010_p12 = scmp.lt.s32.totalorder %s29_s18, %s29_s18 }
  0x1a   :  { %p3006_p11 = scmp.ne.s32.totalorder %s29_s18, %s3005_s10  ;;  %p3011_p13 = scmp.lt.s32.totalorder %s3005_s10, %s3005_s10 }
  0x1c   :  { %p3012_p0 = por %p3011_p13, %p3010_p12 }
  0x1e   :  { %p3013_p1 = pnand %p3012_p0, %p3006_p11 }
  0x20   :  { %3016 = shalt.err (!%p3013_p1)
}
  0x21   :  { %31 = dma.hbm_to_vmem [thread:$0]  %s4559_s1, 128, %s29_s18, [#allocation6]  }
  0x22   :  { %3039 = dma.done.wait [#allocation3], 128  }
  0x23   :  { %3040 = vsyncadd [#allocation3], 4294967168 }
  0x24   :  { %3041 = dma.done.wait [#allocation6], 128  }
  0x25   :  { %3042 = vsyncadd [#allocation6], 4294967168  ;;  %v43_v0 = vld [vmem:[#allocation2] sm:$0xff]  ;;  %v42_v7 = vld [vmem:[#allocation5] sm:$0xff]  ;;  %vm82_vm0 = vcmask 64512  }
  0x26   :  { %v44_v1 = vpack.c.bf16 %v43_v0, %v43_v0  ;;  %2635 = vmatprep.subr.mxu1 %v42_v7  ;;  %2661 = vmatprep.subr.mxu0 %v42_v7 }
  0x27   :  { %2636 = vmatpush3.msra.mxu1 %v42_v7  ;;  %2662 = vmatpush3.msra.mxu0 %v42_v7 }
  0x28   :  { %v45_v2 = vunpack.c.l.bf16 %v44_v1  ;;  %2713 = vmatprep.subr.mxu1 %v42_v7  ;;  %2687 = vmatprep.subr.mxu0 %v42_v7 }
  0x2a   :  { %v46_v3 = vsub.f32 %v43_v0, %v45_v2 }
  0x2c   :  { %v47_v4 = vpack.c.bf16 %v46_v3, %v46_v3 }
  0x2e   :  { %v48_v5 = vunpack.c.l.bf16 %v47_v4 }
  0x30   :  { %v2823_v6 = vpack.i.bf16 %v45_v2, %v48_v5  ;;  %v49_v8 = vsub.f32 %v46_v3, %v48_v5 }
  0x32   :  { %2824 = vxpose.xlu0.b32.start.end [1/1] (short) %v2823_v6, 128 }
  0x6f   :  { %501 = vxpose.xlu0.b32.start.end [1/1] (short) %v49_v8, 128 }
  0xb2   :  { %v2825_v9 = vpop.trf.xlu0 }
  0xb3   :  { %v2826_v10 = vunpack.i.l.bf16 %v2825_v9  ;;  %v2829_v11 = vunpack.i.h.bf16 %v2825_v9 }
  0xb5   :  { %2637 = vmatprep.mubr.msk.f32.mxu1 %vm82_vm0, %v2826_v10  ;;  %2663 = vmatprep.mubr.msk.f32.mxu0 %vm82_vm0, %v2829_v11 }
  0xb6   :  { %v2830_v12 = vpop.trf.xlu0 }
  0xb7   :  { %v2834_v13 = vunpack.i.h.bf16 %v2830_v12  ;;  %v2831_v14 = vunpack.i.l.bf16 %v2830_v12 }
  0xb9   :  { %2638 = vmatmul.mubr.msk.f32.vlgmr.msra.gmra.mrb[0].mxu1 %vm82_vm0, %v2831_v14  ;;  %2664 = vmatmul.mubr.msk.f32.vlgmr.msra.gmra.mrb[0].mxu0 %vm82_vm0, %v2834_v13 }
  0xba   :  { %v2835_v15 = vpop.trf.xlu0  ;;  %2714 = vmatpush3.msra.mxu1 %v42_v7  ;;  %2688 = vmatpush3.msra.mxu0 %v42_v7 }
  0xbb   :  { %v2839_v16 = vunpack.i.h.bf16 %v2835_v15  ;;  %v2836_v17 = vunpack.i.l.bf16 %v2835_v15 }
  0xbd   :  { %2640 = vmatprep.mubr.msk.f32.mxu1 %vm82_vm0, %v2836_v17  ;;  %2666 = vmatprep.mubr.msk.f32.mxu0 %vm82_vm0, %v2839_v16 }
  0xbe   :  { %v2840_v18 = vpop.trf.xlu0 }
  0xbf   :  { %v2844_v19 = vunpack.i.h.bf16 %v2840_v18  ;;  %v2841_v20 = vunpack.i.l.bf16 %v2840_v18 }
  0xc1   :  { %2641 = vmatmul.mubr.msk.f32.gmra.mrb[2].mxu1 %vm82_vm0, %v2841_v20  ;;  %2667 = vmatmul.mubr.msk.f32.gmra.mrb[2].mxu0 %vm82_vm0, %v2844_v19  ;;  %v3168_v20 = vld [vmem:[%s4560_s2] ss:$0 sm:$0xff] }
  0xc2   :  { %v2845_v21 = vpop.trf.xlu0 }
  0xc3   :  { %v2849_v22 = vunpack.i.h.bf16 %v2845_v21  ;;  %v2846_v23 = vunpack.i.l.bf16 %v2845_v21 }
  0xc5   :  { %2643 = vmatprep.mubr.msk.f32.mxu1 %vm82_vm0, %v2846_v23  ;;  %2669 = vmatprep.mubr.msk.f32.mxu0 %vm82_vm0, %v2849_v22  ;;  %v3173_v23 = vld [vmem:[%s4561_s3] ss:$0 sm:$0xff] }
  0xc6   :  { %v2850_v24 = vpop.trf.xlu0 }
  0xc7   :  { %v2854_v25 = vunpack.i.h.bf16 %v2850_v24  ;;  %v2851_v26 = vunpack.i.l.bf16 %v2850_v24 }
  0xc9   :  { %2644 = vmatmul.mubr.msk.f32.gmra.mrb[4].mxu1 %vm82_vm0, %v2851_v26  ;;  %2670 = vmatmul.mubr.msk.f32.gmra.mrb[4].mxu0 %vm82_vm0, %v2854_v25 }
  0xca   :  { %v2855_v27 = vpop.trf.xlu0 }
  0xcb   :  { %v2859_v28 = vunpack.i.h.bf16 %v2855_v27  ;;  %v2856_v29 = vunpack.i.l.bf16 %v2855_v27 }
  0xcd   :  { %2646 = vmatprep.mubr.msk.f32.mxu1 %vm82_vm0, %v2856_v29  ;;  %2672 = vmatprep.mubr.msk.f32.mxu0 %vm82_vm0, %v2859_v28 }
  0xce   :  { %v2860_v30 = vpop.trf.xlu0 }
  0xcf   :  { %v2864_v31 = vunpack.i.h.bf16 %v2860_v30  ;;  %v2861_v32 = vunpack.i.l.bf16 %v2860_v30 }
  0xd1   :  { %2647 = vmatmul.mubr.msk.f32.gmra.mrb[6].mxu1 %vm82_vm0, %v2861_v32  ;;  %2673 = vmatmul.mubr.msk.f32.gmra.mrb[6].mxu0 %vm82_vm0, %v2864_v31 }
  0xd2   :  { %v2865_v33 = vpop.trf.xlu0 }
  0xd3   :  { %v2866_v34 = vunpack.i.l.bf16 %v2865_v33  ;;  %v2869_v49 = vunpack.i.h.bf16 %v2865_v33 }
  0xd5   :  { %2649 = vmatprep.mubr.msk.f32.mxu1 %vm82_vm0, %v2866_v34 }
  0xd6   :  { %v2870_v35 = vpop.trf.xlu0 }
  0xd7   :  { %v2871_v36 = vunpack.i.l.bf16 %v2870_v35  ;;  %v2874_v51 = vunpack.i.h.bf16 %v2870_v35 }
  0xd9   :  { %2650 = vmatmul.mubr.msk.f32.gmra.mrb[8].mxu1 %vm82_vm0, %v2871_v36 }
  0xda   :  { %v2875_v37 = vpop.trf.xlu0 }
  0xdb   :  { %v2876_v38 = vunpack.i.l.bf16 %v2875_v37  ;;  %v2879_v52 = vunpack.i.h.bf16 %v2875_v37 }
  0xdd   :  { %2652 = vmatprep.mubr.msk.f32.mxu1 %vm82_vm0, %v2876_v38 }
  0xde   :  { %v2880_v39 = vpop.trf.xlu0 }
  0xdf   :  { %v2881_v40 = vunpack.i.l.bf16 %v2880_v39  ;;  %v2884_v54 = vunpack.i.h.bf16 %v2880_v39 }
  0xe1   :  { %2653 = vmatmul.mubr.msk.f32.gmra.mrb[10].mxu1 %vm82_vm0, %v2881_v40 }
  0xe2   :  { %v2885_v41 = vpop.trf.xlu0 }
  0xe3   :  { %v2886_v42 = vunpack.i.l.bf16 %v2885_v41  ;;  %v2889_v55 = vunpack.i.h.bf16 %v2885_v41 }
  0xe5   :  { %2655 = vmatprep.mubr.msk.f32.mxu1 %vm82_vm0, %v2886_v42 }
  0xe6   :  { %v2890_v43 = vpop.trf.xlu0 }
  0xe7   :  { %v2891_v44 = vunpack.i.l.bf16 %v2890_v43  ;;  %v2894_v57 = vunpack.i.h.bf16 %v2890_v43 }
  0xe9   :  { %2656 = vmatmul.mubr.msk.f32.gmra.mrb[12].mxu1 %vm82_vm0, %v2891_v44 }
  0xea   :  { %v2895_v45 = vpop.trf.xlu0 }
  0xeb   :  { %v2896_v46 = vunpack.i.l.bf16 %v2895_v45  ;;  %v2899_v58 = vunpack.i.h.bf16 %v2895_v45 }
  0xed   :  { %2658 = vmatprep.mubr.msk.f32.mxu1 %vm82_vm0, %v2896_v46 }
  0xee   :  { %v2900_v47 = vpop.trf.xlu0 }
  0xef   :  { %v2901_v48 = vunpack.i.l.bf16 %v2900_v47  ;;  %v2904_v60 = vunpack.i.h.bf16 %v2900_v47 }
  0xf1   :  { %2659 = vmatmul.mubr.msk.f32.gmra.mrb[14].mxu1 %vm82_vm0, %v2901_v48 }
  0xf2   :  { %v517_v50 = vpop.trf.xlu0  ;;  %2675 = vmatprep.mubr.msk.f32.mxu1 %vm82_vm0, %v2869_v49 }
  0xf3   :  { %2689 = vmatprep.mubr.msk.f32.mxu0 %vm82_vm0, %v517_v50 }
  0xf5   :  { %2676 = vmatmul.mubr.msk.f32.vlgmr.msra.gmra.mrb[8].mxu1 %vm82_vm0, %v2874_v51 }
  0xf6   :  { %v518_v53 = vpop.trf.xlu0  ;;  %2678 = vmatprep.mubr.msk.f32.mxu1 %vm82_vm0, %v2879_v52 }
  0xf7   :  { %2690 = vmatmul.mubr.msk.f32.vlgmr.msra.gmra.mrb[0].mxu0 %vm82_vm0, %v518_v53 }
  0xf9   :  { %2679 = vmatmul.mubr.msk.f32.gmra.mrb[10].mxu1 %vm82_vm0, %v2884_v54 }
  0xfa   :  { %v519_v56 = vpop.trf.xlu0  ;;  %2681 = vmatprep.mubr.msk.f32.mxu1 %vm82_vm0, %v2889_v55 }
  0xfb   :  { %2692 = vmatprep.mubr.msk.f32.mxu0 %vm82_vm0, %v519_v56 }
  0xfd   :  { %2682 = vmatmul.mubr.msk.f32.gmra.mrb[12].mxu1 %vm82_vm0, %v2894_v57 }
  0xfe   :  { %v520_v59 = vpop.trf.xlu0  ;;  %2684 = vmatprep.mubr.msk.f32.mxu1 %vm82_vm0, %v2899_v58 }
  0xff   :  { %2693 = vmatmul.mubr.msk.f32.gmra.mrb[2].mxu0 %vm82_vm0, %v520_v59 }
 0x101   :  { %2685 = vmatmul.mubr.msk.f32.gmra.mrb[14].mxu1 %vm82_vm0, %v2904_v60 }
 0x102   :  { %v521_v61 = vpop.trf.xlu0 }
 0x103   :  { %2695 = vmatprep.mubr.msk.f32.mxu0 %vm82_vm0, %v521_v61 }
 0x106   :  { %v522_v62 = vpop.trf.xlu0 }
 0x107   :  { %2696 = vmatmul.mubr.msk.f32.gmra.mrb[4].mxu0 %vm82_vm0, %v522_v62 }
 0x10a   :  { %v523_v63 = vpop.trf.xlu0 }
 0x10b   :  { %2698 = vmatprep.mubr.msk.f32.mxu0 %vm82_vm0, %v523_v63 }
 0x10e   :  { %v524_v0 = vpop.trf.xlu0 }
 0x10f   :  { %2699 = vmatmul.mubr.msk.f32.gmra.mrb[6].mxu0 %vm82_vm0, %v524_v0 }
 0x112   :  { %v525_v1 = vpop.trf.xlu0 }
 0x113   :  { %2701 = vmatprep.mubr.msk.f32.mxu0 %vm82_vm0, %v525_v1 }
 0x116   :  { %v526_v2 = vpop.trf.xlu0 }
 0x117   :  { %2702 = vmatmul.mubr.msk.f32.gmra.mrb[8].mxu0 %vm82_vm0, %v526_v2 }
 0x11a   :  { %v527_v3 = vpop.trf.xlu0 }
 0x11b   :  { %2704 = vmatprep.mubr.msk.f32.mxu0 %vm82_vm0, %v527_v3 }
 0x11e   :  { %v528_v4 = vpop.trf.xlu0 }
 0x11f   :  { %2705 = vmatmul.mubr.msk.f32.gmra.mrb[10].mxu0 %vm82_vm0, %v528_v4  ;;  %v3047_v4 = vmov 683565275  }
 0x122   :  { %v529_v5 = vpop.trf.xlu0 }
 0x123   :  { %2707 = vmatprep.mubr.msk.f32.mxu0 %vm82_vm0, %v529_v5 }
 0x126   :  { %v530_v6 = vpop.trf.xlu0 }
 0x127   :  { %2708 = vmatmul.mubr.msk.f32.gmra.mrb[12].mxu0 %vm82_vm0, %v530_v6 }
 0x12a   :  { %v531_v7 = vpop.trf.xlu0 }
 0x12b   :  { %2710 = vmatprep.mubr.msk.f32.mxu0 %vm82_vm0, %v531_v7 }
 0x12e   :  { %v532_v8 = vpop.trf.xlu0 }
 0x12f   :  { %2711 = vmatmul.mubr.msk.f32.gmra.mrb[14].mxu0 %vm82_vm0, %v532_v8  ;;  %v3048_v8 = vmov 2475754826  }
 0x18c   :  { %v2639_v9 = vpop.f32.mrb[0].mxu1 }
 0x18d   :  { %v197_v10 = vpop.f32.mrb[1].mxu1 }
 0x194   :  { %v2642_v11 = vpop.f32.mrb[2].mxu1 }
 0x195   :  { %v207_v12 = vpop.f32.mrb[3].mxu1 }
 0x19c   :  { %v3153_v13 = vpop.f32.mrb[4].mxu1 }
 0x19d   :  { %v3155_v14 = vpop.f32.mrb[5].mxu1 }
 0x1a4   :  { %v3157_v15 = vpop.f32.mrb[6].mxu1 }
 0x1a5   :  { %v3159_v16 = vpop.f32.mrb[7].mxu1 }
 0x1c8   :  { %v3161_v17 = vpop.f32.mrb[8].mxu1 }
 0x1c9   :  { %v3163_v18 = vpop.f32.mrb[9].mxu1 }
 0x1ca   :  { %v2691_v19 = vpop.f32.mrb[0].mxu0 }
 0x1cb   :  { %v2715_v21 = vadd.f32 %v2691_v19, %v2639_v9  ;;  %v647_v22 = vpop.f32.mrb[1].mxu0 }
 0x1cc   :  { %v2716_v24 = vadd.f32 %v647_v22, %v197_v10  ;;  %v3175_v25 = vpop.f32.mrb[10].mxu1  ;;  %v4565_v10 = vmov 2131351028  }
 0x1cd   :  { %v750_v26 = vmul.f32 %v2715_v21, %v3168_v20  ;;  %v3178_v27 = vpop.f32.mrb[11].mxu1  ;;  %v3051_v21 = vmov 920167782  }
 0x1ce   :  { %v749_v28 = vmul.f32 %v2716_v24, %v3168_v20 }
 0x1cf   :  { %v3182_v29 = vadd.f32 %v3173_v23, %v750_v26 }
 0x1d0   :  { %v3185_v30 = vadd.f32 %v3173_v23, %v749_v28  ;;  %v3187_v31 = vpop.f32.mrb[12].mxu1 }
 0x1d1   :  { %v891_v32 = vand.u32 2147483647, %v3182_v29  ;;  %v894_v33 = vand.u32 2139095040, %v3182_v29  ;;  %v3191_v34 = vpop.f32.mrb[13].mxu1  ;;  %vm893_vm14 = vcmp.lt.s32.totalorder %v3182_v29, 0 }
 0x1d2   :  { %v788_v35 = vand.u32 2147483647, %v3185_v30  ;;  %v791_v36 = vand.u32 2139095040, %v3185_v30  ;;  %v2694_v37 = vpop.f32.mrb[2].mxu0  ;;  %vm790_vm15 = vcmp.lt.s32.totalorder %v3185_v30, 0 }
 0x1d3   :  { %v895_v38 = vshrl.u32 %v894_v33, 23  ;;  %v2717_v39 = vadd.f32 %v2694_v37, %v2642_v11  ;;  %v657_v40 = vpop.f32.mrb[3].mxu0  ;;  %v898_v41 = vand.u32 8388607, %v891_v32  ;;  %v4567_v37 = vmov 1326507024  }
 0x1d4   :  { %v792_v42 = vshrl.u32 %v791_v36, 23  ;;  %v795_v43 = vand.u32 8388607, %v788_v35  ;;  %v2718_v44 = vadd.f32 %v657_v40, %v207_v12  ;;  %v3199_v45 = vpop.f32.mrb[14].mxu1  ;;  %v3050_v12 = vmov 2102212464  }
 0x1d5   :  { %v2524_v46 = vadd.s32 4294967169, %v895_v38  ;;  %v752_v47 = vmul.f32 %v2717_v39, %v3168_v20  ;;  %v3202_v48 = vpop.f32.mrb[15].mxu1  ;;  %v899_v52 = vor.u32 8388608, %v898_v41 }
 0x1d6   :  { %v2520_v49 = vadd.s32 4294967169, %v792_v42  ;;  %v796_v53 = vor.u32 8388608, %v795_v43  ;;  %v3211_v61 = vmul.f32 %v2718_v44, %v3168_v20 }
 0x1d7   :  { %v901_v50 = vadd.s32 1, %v2524_v46  ;;  %v3205_v51 = vadd.f32 %v3173_v23, %v752_v47  ;;  %v3215_v63 = vshll.u32 %v899_v52, 8 }
 0x1d8   :  { %v798_v54 = vadd.s32 1, %v2520_v49  ;;  %v3219_v1 = vshll.u32 %v796_v53, 8 }
 0x1d9   :  { %vm902_vm1 = vcmp.gt.s32.totalorder %v901_v50, 0  ;;  %v1100_v55 = vand.u32 2139095040, %v3205_v51  ;;  %v4564_v2 = vand.u32 2147483647, %v3205_v51 }
 0x1da   :  { %v903_v56 = vsel %vm902_vm1, %v901_v50, 0  ;;  %vm799_vm2 = vcmp.gt.s32.totalorder %v798_v54, 0  ;;  %v3208_v57 = vpop.f32.mrb[4].mxu0 }
 0x1db   :  { %v904_v58 = vshrl.u32 %v903_v56, 5  ;;  %v905_v59 = vand.u32 31, %v903_v56  ;;  %v800_v60 = vsel %vm799_vm2, %v798_v54, 0  ;;  %v3213_v62 = vpop.f32.mrb[5].mxu0  ;;  %v3223_v7 = vshrl.u32 %v1100_v55, 23 }
 0x1dc   :  { %v3217_v0 = vshrl.u32 %v800_v60, 5  ;;  %v802_v6 = vand.u32 31, %v800_v60 }
 0x1dd   :  { %v906_v3 = vsub.s32 32, %v905_v59  ;;  %v908_v5 = vshll.u32 %v3047_v4, %v905_v59  ;;  %v911_v9 = vshll.u32 %v3048_v8, %v905_v59  ;;  %v914_v11 = vshll.u32 %v4565_v10, %v905_v59 }
 0x1de   :  { %v917_v19 = vshll.u32 %v3050_v12, %v905_v59  ;;  %v920_v22 = vshll.u32 %v3051_v21, %v905_v59  ;;  %vm923_vm3 = vcmp.lt.s32.totalorder %v904_v58, 1  ;;  %vm924_vm4 = vcmp.lt.s32.totalorder %v904_v58, 2 }
 0x1df   :  { %v909_v24 = vshrl.u32 %v3048_v8, %v906_v3  ;;  %v912_v26 = vshrl.u32 %v4565_v10, %v906_v3  ;;  %v915_v28 = vshrl.u32 %v3050_v12, %v906_v3  ;;  %v907_v33 = vshrl.u32 %v3047_v4, %v906_v3 }
 0x1e0   :  { %v918_v36 = vshrl.u32 %v3051_v21, %v906_v3  ;;  %v921_v38 = vshrl.u32 %v4567_v37, %v906_v3  ;;  %v803_v42 = vsub.s32 32, %v802_v6  ;;  %vm925_vm5 = vcmp.lt.s32.totalorder %v904_v58, 3 }
 0x1e1   :  { %v910_v39 = vor.u32 %v909_v24, %v908_v5  ;;  %v913_v40 = vor.u32 %v912_v26, %v911_v9  ;;  %v916_v41 = vor.u32 %v915_v28, %v914_v11  ;;  %vm926_vm6 = vcmp.lt.s32.totalorder %v904_v58, 4 }
 0x1e2   :  { %v919_v43 = vor.u32 %v918_v36, %v917_v19  ;;  %v922_v44 = vor.u32 %v921_v38, %v920_v22  ;;  %v3235_v46 = vpop.f32.mrb[6].mxu0  ;;  %v805_v59 = vshll.u32 %v3047_v4, %v802_v6  ;;  %v806_v5 = vshrl.u32 %v3048_v8, %v803_v42 }
 0x1e3   :  { %v927_v47 = vsel %vm923_vm3, %v907_v33, %v910_v39  ;;  %v928_v49 = vsel %vm926_vm6, %v916_v41, 2102212464  ;;  %v931_v50 = vsel %vm923_vm3, %v910_v39, %v913_v40  ;;  %v935_v52 = vsel %vm923_vm3, %v913_v40, %v916_v41  ;;  %v3240_v53 = vpop.f32.mrb[7].mxu0 }
 0x1e4   :  { %v929_v54 = vsel %vm925_vm5, %v913_v40, %v928_v49  ;;  %v932_v55 = vsel %vm926_vm6, %v919_v43, 920167782  ;;  %v936_v56 = vsel %vm926_vm6, %v922_v44, 1326507024  ;;  %v808_v9 = vshll.u32 %v3048_v8, %v802_v6 }
 0x1e5   :  { %v933_v60 = vsel %vm925_vm5, %v916_v41, %v932_v55  ;;  %v937_v3 = vsel %vm925_vm5, %v919_v43, %v936_v56  ;;  %v930_v11 = vsel %vm924_vm4, %v927_v47, %v929_v54  ;;  %v809_v24 = vshrl.u32 %v4565_v10, %v803_v42 }
 0x1e6   :  { %v934_v19 = vsel %vm924_vm4, %v931_v50, %v933_v60  ;;  %v938_v22 = vsel %vm924_vm4, %v935_v52, %v937_v3  ;;  %v807_v38 = vor.u32 %v806_v5, %v805_v59  ;;  %v811_v40 = vshll.u32 %v4565_v10, %v802_v6 }
 0x1e7   :  { %v3250_v26 = vmul.u32.u64.low %v3215_v63, %v938_v22  ;;  %v3251_v28 = vmul.u32.u64.high %v3215_v63, %v938_v22, %v3250_v26  ;;  %v3254_v33 = vmul.u32.u64.low %v3215_v63, %v934_v19  ;;  %v3255_v36 = vmul.u32.u64.high %v3215_v63, %v934_v19, %v3254_v33 }
 0x1e8   :  { %v810_v39 = vor.u32 %v809_v24, %v808_v9  ;;  %v812_v41 = vshrl.u32 %v3050_v12, %v803_v42  ;;  %v804_v58 = vshrl.u32 %v3047_v4, %v803_v42  ;;  %v814_v43 = vshll.u32 %v3050_v12, %v802_v6 }
 0x1e9   :  { %v815_v44 = vshrl.u32 %v3051_v21, %v803_v42  ;;  %v818_v47 = vshrl.u32 %v4567_v37, %v803_v42  ;;  %v946_v49 = vmul.u32 %v3215_v63, %v930_v11  ;;  %v817_v52 = vshll.u32 %v3051_v21, %v802_v6 }
 0x1ea   :  { %v813_v50 = vor.u32 %v812_v41, %v811_v40  ;;  %vm820_vm7 = vcmp.lt.s32.totalorder %v3217_v0, 1  ;;  %vm948_vm8 = vc.u32 %v3251_v28, %v3254_v33  ;;  %v949_v54 = vadd.s32 1, %v3255_v36 }
 0x1eb   :  { %v816_v55 = vor.u32 %v815_v44, %v814_v43  ;;  %vm821_vm9 = vcmp.lt.s32.totalorder %v3217_v0, 2  ;;  %v819_v56 = vor.u32 %v818_v47, %v817_v52  ;;  %vm822_vm10 = vcmp.lt.s32.totalorder %v3217_v0, 3 }
 0x1ec   :  { %vm823_vm11 = vcmp.lt.s32.totalorder %v3217_v0, 4  ;;  %v828_v42 = vsel %vm820_vm7, %v807_v38, %v810_v39  ;;  %v950_v63 = vsel %vm948_vm8, %v949_v54, %v3255_v36  ;;  %v832_v60 = vsel %vm820_vm7, %v810_v39, %v813_v50  ;;  %v3296_v54 = vpop.f32.mrb[8].mxu0 }
 0x1ed   :  { %v825_v59 = vsel %vm823_vm11, %v813_v50, 2102212464  ;;  %v829_v6 = vsel %vm823_vm11, %v816_v55, 920167782  ;;  %v951_v3 = vadd.s32 %v950_v63, %v946_v49  ;;  %v824_v5 = vsel %vm820_vm7, %v804_v58, %v807_v38 }
 0x1ee   :  { %v830_v9 = vsel %vm822_vm10, %v813_v50, %v829_v6  ;;  %v833_v11 = vsel %vm823_vm11, %v819_v56, 1326507024  ;;  %v826_v19 = vsel %vm822_vm10, %v810_v39, %v825_v59  ;;  %v2532_v26 = vadd.s32 4294967169, %v3223_v7 }
 0x1ef   :  { %v831_v22 = vsel %vm821_vm9, %v828_v42, %v830_v9  ;;  %v834_v24 = vsel %vm822_vm10, %v816_v55, %v833_v11  ;;  %v952_v40 = vadd.s32 536870912, %v951_v3  ;;  %v3289_v39 = vadd.f32 %v3173_v23, %v3211_v61 }
 0x1f0   :  { %v835_v41 = vsel %vm821_vm9, %v832_v60, %v834_v24  ;;  %v3280_v36 = vmul.u32.u64.low %v3219_v1, %v831_v22  ;;  %v3281_v43 = vmul.u32.u64.high %v3219_v1, %v831_v22, %v3280_v36  ;;  %v827_v7 = vsel %vm821_vm9, %v824_v5, %v826_v19 }
 0x1f1   :  { %v3284_v44 = vmul.u32.u64.low %v3219_v1, %v835_v41  ;;  %v3285_v38 = vmul.u32.u64.high %v3219_v1, %v835_v41, %v3284_v44  ;;  %v953_v58 = vshrl.u32 %v952_v40, 30  ;;  %v1104_v47 = vand.u32 8388607, %v4564_v2 }
 0x1f2   :  { %v1107_v49 = vadd.s32 1, %v2532_v26  ;;  %v846_v52 = vadd.s32 1, %v3281_v43  ;;  %v843_v55 = vmul.u32 %v3219_v1, %v827_v7  ;;  %v997_v56 = vand.u32 2139095040, %v3289_v39 }
 0x1f3   :  { %v954_v50 = vshll.u32 %v953_v58, 30  ;;  %vm845_vm13 = vc.u32 %v3285_v38, %v3280_v36  ;;  %v1105_v63 = vor.u32 8388608, %v1104_v47  ;;  %v977_v59 = vsub.s32 4, %v953_v58 }
 0x1f4   :  { %vm1108_vm12 = vcmp.gt.s32.totalorder %v1107_v49, 0  ;;  %v847_v0 = vsel %vm845_vm13, %v846_v52, %v3281_v43  ;;  %v4563_v5 = vand.u32 2147483647, %v3289_v39  ;;  %v998_v22 = vshrl.u32 %v997_v56, 23 }
 0x1f5   :  { %v1109_v61 = vsel %vm1108_vm12, %v1107_v49, 0  ;;  %v3301_v42 = vsub.s32 %v951_v3, %v954_v50  ;;  %v848_v6 = vadd.s32 %v847_v0, %v843_v55  ;;  %v947_v3 = vadd.s32 %v3254_v33, %v3251_v28 }
 0x1f6   :  { %v1111_v60 = vand.u32 31, %v1109_v61  ;;  %v3307_v11 = vshrl.u32 %v1109_v61, 5  ;;  %v3313_v26 = vshll.u32 %v1105_v63, 8  ;;  %v3317_v40 = vsel %vm893_vm14, %v977_v59, %v953_v58 }
 0x1f7   :  { %v957_v9 = vsub.s32 0, %v3301_v42  ;;  %v849_v1 = vadd.s32 536870912, %v848_v6  ;;  %v3320_v41 = vadd.s32 %v3280_v36, %v3285_v38  ;;  %v3324_v44 = vand.u32 8388607, %v4563_v5 }
 0x1f8   :  { %v1112_v19 = vsub.s32 32, %v1111_v60  ;;  %v1114_v50 = vshll.u32 %v3047_v4, %v1111_v60  ;;  %vm1129_vm0 = vcmp.lt.s32.totalorder %v3307_v11, 1  ;;  %v2528_v58 = vadd.s32 4294967169, %v998_v22 }
 0x1f9   :  { %v2525_v24 = vmin.u32 %v957_v9, %v3301_v42  ;;  %v850_v43 = vshrl.u32 %v849_v1, 30  ;;  %v1117_v38 = vshll.u32 %v3048_v8, %v1111_v60  ;;  %v1120_v52 = vshll.u32 %v4565_v10, %v1111_v60 }
 0x1fa   :  { %v1115_v28 = vshrl.u32 %v3048_v8, %v1112_v19  ;;  %v1118_v33 = vshrl.u32 %v4565_v10, %v1112_v19  ;;  %v1121_v47 = vshrl.u32 %v3050_v12, %v1112_v19  ;;  %v1124_v55 = vshrl.u32 %v3051_v21, %v1112_v19 }
 0x1fb   :  { %v959_v7 = vclz %v2525_v24  ;;  %v851_v49 = vshll.u32 %v850_v43, 30  ;;  %v874_v56 = vsub.s32 4, %v850_v43  ;;  %v1123_v0 = vshll.u32 %v3050_v12, %v1111_v60 }
 0x1fc   :  { %v1127_v63 = vshrl.u32 %v4567_v37, %v1112_v19  ;;  %v1116_v59 = vor.u32 %v1115_v28, %v1114_v50  ;;  %v1119_v9 = vor.u32 %v1118_v33, %v1117_v38  ;;  %v1122_v1 = vor.u32 %v1121_v47, %v1120_v52 }
 0x1fd   :  { %v2526_v36 = vadd.s32 4294967294, %v959_v7  ;;  %v3334_v61 = vsub.s32 %v848_v6, %v851_v49  ;;  %v1125_v7 = vor.u32 %v1124_v55, %v1123_v0  ;;  %v1126_v5 = vshll.u32 %v3051_v21, %v1111_v60 }
 0x1fe   :  { %v1113_v6 = vshrl.u32 %v3047_v4, %v1112_v19  ;;  %vm1130_vm2 = vcmp.lt.s32.totalorder %v3307_v11, 2  ;;  %v3345_v37 = vsel %vm790_vm15, %v874_v56, %v850_v43  ;;  %vm1132_vm3 = vcmp.lt.s32.totalorder %v3307_v11, 4 }
 0x1ff   :  { %vm2527_vm1 = vcmp.lt.s32.totalorder %v2526_v36, 0  ;;  %v854_v22 = vsub.s32 0, %v3334_v61  ;;  %v1128_v28 = vor.u32 %v1127_v63, %v1126_v5  ;;  %v1137_v60 = vsel %vm1129_vm0, %v1116_v59, %v1119_v9 }
 0x200   :  { %v962_v24 = vsel %vm2527_vm1, 0, %v2526_v36  ;;  %vm1131_vm4 = vcmp.lt.s32.totalorder %v3307_v11, 3  ;;  %v1134_v19 = vsel %vm1132_vm3, %v1122_v1, 2102212464  ;;  %v1138_v43 = vsel %vm1132_vm3, %v1125_v7, 920167782 }
 0x201   :  { %v963_v2 = vsub.s32 32, %v962_v24  ;;  %v967_v10 = vsub.s32 4294967266, %v962_v24  ;;  %v2521_v49 = vmin.u32 %v854_v22, %v3334_v61  ;;  %v964_v33 = vshll.u32 %v3301_v42, %v962_v24 }
 0x202   :  { %vm3358_vm5 = vcmp.le.f32.partialorder %v891_v32, 0.7853982  ;;  %v1139_v42 = vsel %vm1131_vm4, %v1122_v1, %v1138_v43  ;;  %v1133_v52 = vsel %vm1129_vm0, %v1113_v6, %v1116_v59  ;;  %v1142_v56 = vsel %vm1132_vm3, %v1128_v28, 1326507024 }
 0x203   :  { %v965_v47 = vshrl.u32 %v947_v3, %v963_v2  ;;  %v968_v50 = vadd.s32 127, %v967_v10  ;;  %v856_v36 = vclz %v2521_v49  ;;  %v1141_v3 = vsel %vm1129_vm0, %v1119_v9, %v1122_v1 }
 0x204   :  { %v1140_v55 = vsel %vm1130_vm2, %v1137_v60, %v1139_v42  ;;  %v1135_v63 = vsel %vm1131_vm4, %v1119_v9, %v1134_v19  ;;  %v1143_v24 = vsel %vm1131_vm4, %v1125_v7, %v1142_v56  ;;  %v1004_v7 = vadd.s32 1, %v2528_v58  ;;  %v3383_v60 = vpop.f32.mrb[9].mxu0 }
 0x205   :  { %v966_v2 = vor.u32 %v965_v47, %v964_v33  ;;  %v969_v10 = vshll.u32 %v968_v50, 23  ;;  %v2522_v38 = vadd.s32 4294967294, %v856_v36  ;;  %v1144_v22 = vsel %vm1130_vm2, %v1141_v3, %v1143_v24 }
 0x206   :  { %v3373_v1 = vmul.u32.u64.low %v3313_v26, %v1140_v55  ;;  %v3374_v49 = vmul.u32.u64.high %v3313_v26, %v1140_v55, %v3373_v1  ;;  %v3378_v33 = vmul.u32.u64.low %v3313_v26, %v1144_v22  ;;  %v3379_v47 = vmul.u32.u64.high %v3313_v26, %v1144_v22, %v3378_v33 }
 0x207   :  { %v970_v32 = vor.u32 4788187, %v969_v10  ;;  %v973_v0 = vcvt.s32.f32 %v966_v2  ;;  %vm2523_vm6 = vcmp.lt.s32.totalorder %v2522_v38, 0  ;;  %v1136_v9 = vsel %vm1130_vm2, %v1133_v52, %v1135_v63 }
 0x208   :  { %v859_v6 = vsel %vm2523_vm6, 0, %v2522_v38  ;;  %v2719_v43 = vadd.f32 %v3208_v57, %v3153_v13  ;;  %v3390_v2 = vadd.f32 %v3213_v62, %v3155_v14  ;;  %v1155_v3 = vadd.s32 1, %v3374_v49 }
 0x209   :  { %v971_v59 = vand.u32 2147483647, %v970_v32  ;;  %v860_v28 = vsub.s32 32, %v859_v6  ;;  %v864_v50 = vsub.s32 4294967266, %v859_v6  ;;  %v861_v19 = vshll.u32 %v3334_v61, %v859_v6 }
 0x20a   :  { %vm1005_vm7 = vcmp.gt.s32.totalorder %v1004_v7, 0  ;;  %v1152_v58 = vmul.u32 %v3313_v26, %v1136_v9  ;;  %vm1154_vm8 = vc.u32 %v3379_v47, %v3373_v1  ;;  %v980_v13 = vsel %vm3358_vm5, 0, %v3317_v40 }
 0x20b   :  { %v974_v36 = vmul.f32 %v973_v0, %v971_v59  ;;  %v862_v10 = vshrl.u32 %v3320_v41, %v860_v28  ;;  %v865_v42 = vadd.s32 127, %v864_v50  ;;  %v1006_v61 = vsel %vm1005_vm7, %v1004_v7, 0 }
 0x20c   :  { %v1156_v62 = vsel %vm1154_vm8, %v1155_v3, %v3374_v49  ;;  %vm3405_vm9 = vcmp.le.f32.partialorder %v788_v35, 0.7853982  ;;  %v1008_v52 = vand.u32 31, %v1006_v61  ;;  %v1002_v32 = vor.u32 8388608, %v3324_v44 }
 0x20d   :  { %v975_v11 = vxor.u32 2147483648, %v974_v36  ;;  %v863_v57 = vor.u32 %v862_v10, %v861_v19  ;;  %v866_v14 = vshll.u32 %v865_v42, 23  ;;  %v1157_v26 = vadd.s32 %v1156_v62, %v1152_v58 }
 0x20e   :  { %v877_v56 = vsel %vm3405_vm9, 0, %v3345_v37  ;;  %v3416_v0 = vand.u32 3, %v980_v13  ;;  %v1009_v63 = vsub.s32 32, %v1008_v52  ;;  %v4573_v6 = vmov 2131351028  }
 0x20f   :  { %v976_v41 = vsel %vm893_vm14, %v975_v11, %v974_v36  ;;  %v867_v40 = vor.u32 4788187, %v866_v14  ;;  %v1158_v35 = vadd.s32 536870912, %v1157_v26  ;;  %v870_v22 = vcvt.s32.f32 %v863_v57 }
 0x210   :  { %v979_v55 = vsel %vm3358_vm5, %v3182_v29, %v976_v41  ;;  %v3418_v49 = vand.u32 3, %v877_v56  ;;  %v1012_v5 = vshrl.u32 %v3048_v8, %v1009_v63  ;;  %v1015_v33 = vshrl.u32 %v4573_v6, %v1009_v63 }
 0x211   :  { %2905 = vcosq.f32 %v979_v55  ;;  %v868_v24 = vand.u32 2147483647, %v867_v40  ;;  %v3420_v59 = vshrl.u32 %v1158_v35, 30  ;;  %v1018_v37 = vshrl.u32 %v3050_v12, %v1009_v63 }
 0x212   :  { %2907 = vsinq.f32 %v979_v55  ;;  %v1021_v44 = vshrl.u32 %v3051_v21, %v1009_v63  ;;  %v3426_v50 = vshll.u32 %v1002_v32, 8  ;;  %vm989_vm10 = vcmp.eq.s32.totalorder %v3416_v0, 2 }
 0x213   :  { %v871_v28 = vmul.f32 %v870_v22, %v868_v24  ;;  %v1160_v9 = vshll.u32 %v3420_v59, 30  ;;  %v3430_v7 = vshrl.u32 %v1006_v61, 5  ;;  %v1011_v36 = vshll.u32 %v3047_v4, %v1008_v52 }
 0x214   :  { %v1014_v19 = vshll.u32 %v3048_v8, %v1008_v52  ;;  %vm986_vm11 = vcmp.eq.s32.totalorder %v3416_v0, 0  ;;  %v1017_v42 = vshll.u32 %v4573_v6, %v1008_v52  ;;  %v1020_v3 = vshll.u32 %v3050_v12, %v1008_v52 }
 0x215   :  { %v872_v10 = vxor.u32 2147483648, %v871_v28  ;;  %v754_v11 = vmul.f32 %v2719_v43, %v3168_v20  ;;  %vm985_vm12 = vcmp.lt.s32.totalorder %v3416_v0, 2  ;;  %v3439_v58 = vsub.s32 %v1157_v26, %v1160_v9 }
 0x216   :  { %v1013_v13 = vor.u32 %v1012_v5, %v1011_v36  ;;  %v1016_v61 = vor.u32 %v1015_v33, %v1014_v19  ;;  %v4574_v57 = vmov 1326507024   ;;  %vm983_vm13 = vweird.f32 %v3182_v29 }
 0x217   :  { %v1024_v14 = vshrl.u32 %v4574_v57, %v1009_v63  ;;  %v873_v62 = vsel %vm790_vm15, %v872_v10, %v871_v28  ;;  %v1019_v41 = vor.u32 %v1018_v37, %v1017_v42  ;;  %v1022_v55 = vor.u32 %v1021_v44, %v1020_v3 }
 0x218   :  { %v1023_v40 = vshll.u32 %v3051_v21, %v1008_v52  ;;  %v876_v43 = vsel %vm3405_vm9, %v3185_v30, %v873_v62  ;;  %v1163_v26 = vsub.s32 0, %v3439_v58  ;;  %v1010_v56 = vshrl.u32 %v3047_v4, %v1009_v63 }
 0x219   :  { %vm1026_vm14 = vcmp.lt.s32.totalorder %v3430_v7, 1  ;;  %2909 = vcosq.f32 %v876_v43  ;;  %v1183_v32 = vsub.s32 4, %v3420_v59  ;;  %vm1027_vm15 = vcmp.lt.s32.totalorder %v3430_v7, 2 }
 0x21a   :  { %v1025_v35 = vor.u32 %v1024_v14, %v1023_v40  ;;  %2911 = vsinq.f32 %v876_v43  ;;  %vm1099_vm0 = vcmp.lt.s32.totalorder %v3205_v51, 0  ;;  %v2533_v52 = vmin.u32 %v1163_v26, %v3439_v58 }
 0x21b   :  { %v2906_v24 = vpop.eup %2905  ;;  %vm1029_vm1 = vcmp.lt.s32.totalorder %v3430_v7, 4  ;;  %v1034_v38 = vsel %vm1026_vm14, %v1013_v13, %v1016_v61  ;;  %vm1028_vm2 = vcmp.lt.s32.totalorder %v3430_v7, 3  ;;  %v1030_v44 = vsel %vm1026_vm14, %v1010_v56, %v1013_v13 }
 0x21c   :  { %v2908_v63 = vpop.eup %2907  ;;  %v990_v22 = vxor.u32 2147483648, %v2906_v24  ;;  %v1031_v5 = vsel %vm1029_vm1, %v1019_v41, 2102212464  ;;  %v1035_v33 = vsel %vm1029_vm1, %v1022_v55, 920167782  ;;  %v1165_v37 = vclz %v2533_v52 }
 0x21d   :  { %v987_v28 = vxor.u32 2147483648, %v2908_v63  ;;  %v1036_v9 = vsel %vm1028_vm2, %v1019_v41, %v1035_v33  ;;  %v1038_v10 = vsel %vm1026_vm14, %v1016_v61, %v1019_v41  ;;  %v1039_v42 = vsel %vm1029_vm1, %v1025_v35, 1326507024 }
 0x21e   :  { %v991_v36 = vsel %vm989_vm10, %v990_v22, %v2908_v63  ;;  %v1037_v19 = vsel %vm1027_vm15, %v1034_v38, %v1036_v9  ;;  %vm883_vm3 = vcmp.eq.s32.totalorder %v3418_v49, 0  ;;  %v2534_v14 = vadd.s32 4294967294, %v1165_v37 }
 0x21f   :  { %v988_v3 = vsel %vm986_vm11, %v2906_v24, %v987_v28  ;;  %v1032_v62 = vsel %vm1028_vm2, %v1016_v61, %v1031_v5  ;;  %v1040_v40 = vsel %vm1028_vm2, %v1022_v55, %v1039_v42  ;;  %vm882_vm4 = vcmp.lt.s32.totalorder %v3418_v49, 2 }
 0x220   :  { %v992_v13 = vsel %vm985_vm12, %v988_v3, %v991_v36  ;;  %v1041_v43 = vsel %vm1027_vm15, %v1038_v10, %v1040_v40  ;;  %v3477_v26 = vmul.u32.u64.low %v3426_v50, %v1037_v19  ;;  %v3478_v41 = vmul.u32.u64.high %v3426_v50, %v1037_v19, %v3477_v26  ;;  %v3519_v3 = vpop.f32.mrb[10].mxu0 }
 0x221   :  { %v993_v56 = vsel %vm983_vm13, nan, %v992_v13  ;;  %vm2535_vm5 = vcmp.lt.s32.totalorder %v2534_v14, 0  ;;  %v3484_v61 = vmul.u32.u64.low %v3426_v50, %v1041_v43  ;;  %v3485_v55 = vmul.u32.u64.high %v3426_v50, %v1041_v43, %v3484_v61  ;;  %v3571_v40 = vpop.f32.mrb[11].mxu0 }
 0x222   :  { %2437 = vst [vmem:[#allocation7 + $0x8] sm:$0xff] %v993_v56  ;;  %v1153_v0 = vadd.s32 %v3373_v1, %v3379_v47  ;;  %v1168_v35 = vsel %vm2535_vm5, 0, %v2534_v14  ;;  %v3490_v24 = vadd.f32 %v3173_v23, %v754_v11  ;;  %v3494_v52 = vadd.f32 %v3235_v46, %v3157_v15 }
 0x223   :  { %v1169_v38 = vsub.s32 32, %v1168_v35  ;;  %v1173_v29 = vsub.s32 4294967266, %v1168_v35  ;;  %v1033_v63 = vsel %vm1027_vm15, %v1030_v44, %v1032_v62  ;;  %v3500_v22 = vadd.f32 %v3240_v53, %v3159_v16  ;;  %v2910_v5 = vpop.eup %2909 }
 0x224   :  { %vm886_vm6 = vcmp.eq.s32.totalorder %v3418_v49, 2  ;;  %v1184_v1 = vsel %vm1099_vm0, %v1183_v32, %v3420_v59  ;;  %v1052_v47 = vadd.s32 1, %v3478_v41  ;;  %v1306_v15 = vand.u32 2139095040, %v3490_v24  ;;  %v2912_v46 = vpop.eup %2911 }
 0x225   :  { %v887_v11 = vxor.u32 2147483648, %v2910_v5  ;;  %v1170_v7 = vshll.u32 %v3439_v58, %v1168_v35  ;;  %v1171_v33 = vshrl.u32 %v1153_v0, %v1169_v38  ;;  %v1174_v28 = vadd.s32 127, %v1173_v29 }
 0x226   :  { %v884_v37 = vxor.u32 2147483648, %v2912_v46  ;;  %v1049_v16 = vmul.u32 %v3426_v50, %v1033_v63  ;;  %vm1051_vm7 = vc.u32 %v3485_v55, %v3477_v26  ;;  %v1307_v53 = vshrl.u32 %v1306_v15, 23 }
 0x227   :  { %v888_v44 = vsel %vm886_vm6, %v887_v11, %v2912_v46  ;;  %v1172_v9 = vor.u32 %v1171_v33, %v1170_v7  ;;  %v1175_v59 = vshll.u32 %v1174_v28, 23  ;;  %v1053_v32 = vsel %vm1051_vm7, %v1052_v47, %v3478_v41 }
 0x228   :  { %v885_v36 = vsel %vm883_vm3, %v2910_v5, %v884_v37  ;;  %v1054_v19 = vadd.s32 %v1053_v32, %v1049_v16  ;;  %v1303_v58 = vand.u32 2147483647, %v3490_v24  ;;  %v2540_v10 = vadd.s32 4294967169, %v1307_v53 }
 0x229   :  { %vm880_vm8 = vweird.f32 %v3185_v30  ;;  %v889_v50 = vsel %vm882_vm4, %v885_v36, %v888_v44  ;;  %v1176_v42 = vor.u32 4788187, %v1175_v59  ;;  %v4575_v62 = vand.u32 2147483647, %v3205_v51 }
 0x22a   :  { %v890_v14 = vsel %vm880_vm8, nan, %v889_v50  ;;  %v1055_v13 = vadd.s32 536870912, %v1054_v19  ;;  %v1313_v43 = vadd.s32 1, %v2540_v10  ;;  %v1179_v56 = vcvt.s32.f32 %v1172_v9 }
 0x22b   :  { %vm3523_vm9 = vcmp.le.f32.partialorder %v4575_v62, 0.7853982  ;;  %2436 = vst [vmem:[#allocation7] sm:$0xff] %v890_v14  ;;  %v1177_v41 = vand.u32 2147483647, %v1176_v42  ;;  %v753_v49 = vmul.f32 %v3390_v2, %v3168_v20  ;;  %v3537_v35 = vadd.f32 %v3296_v54, %v3161_v17 }
 0x22c   :  { %v1186_v30 = vsel %vm3523_vm9, 0, %v1184_v1  ;;  %v3531_v61 = vshrl.u32 %v1055_v13, 30  ;;  %v1310_v0 = vand.u32 8388607, %v1303_v58  ;;  %vm1314_vm10 = vcmp.gt.s32.totalorder %v1313_v43, 0 }
 0x22d   :  { %v1180_v38 = vmul.f32 %v1179_v56, %v1177_v41  ;;  %v1315_v29 = vsel %vm1314_vm10, %v1313_v43, 0  ;;  %v3540_v1 = vand.u32 3, %v1186_v30  ;;  %v3545_v11 = vadd.f32 %v3173_v23, %v753_v49 }
 0x22e   :  { %v1057_v63 = vshll.u32 %v3531_v61, 30  ;;  %v1317_v5 = vand.u32 31, %v1315_v29  ;;  %v1311_v2 = vor.u32 8388608, %v1310_v0  ;;  %v1050_v17 = vadd.s32 %v3477_v26, %v3485_v55 }
 0x22f   :  { %v1181_v47 = vxor.u32 2147483648, %v1180_v38  ;;  %v3551_v54 = vshrl.u32 %v1315_v29, 5  ;;  %v1200_v59 = vand.u32 2147483647, %v3545_v11  ;;  %v1080_v32 = vsub.s32 4, %v3531_v61 }
 0x230   :  { %v3542_v15 = vsub.s32 %v1054_v19, %v1057_v63  ;;  %v1318_v46 = vsub.s32 32, %v1317_v5  ;;  %v1320_v33 = vshll.u32 %v3047_v4, %v1317_v5  ;;  %v1323_v16 = vshll.u32 %v3048_v8, %v1317_v5 }
 0x231   :  { %v1182_v7 = vsel %vm1099_vm0, %v1181_v47, %v1180_v38  ;;  %v1326_v23 = vshll.u32 %v4573_v6, %v1317_v5  ;;  %v3564_v9 = vshll.u32 %v1311_v2, 8  ;;  %v1329_v42 = vshll.u32 %v3050_v12, %v1317_v5 }
 0x232   :  { %v1185_v28 = vsel %vm3523_vm9, %v3205_v51, %v1182_v7  ;;  %v1060_v37 = vsub.s32 0, %v3542_v15  ;;  %v1321_v53 = vshrl.u32 %v3048_v8, %v1318_v46  ;;  %v1324_v44 = vshrl.u32 %v4573_v6, %v1318_v46 }
 0x233   :  { %2913 = vcosq.f32 %v1185_v28  ;;  %v1327_v26 = vshrl.u32 %v3050_v12, %v1318_v46  ;;  %v1330_v14 = vshrl.u32 %v3051_v21, %v1318_v46  ;;  %v1203_v62 = vand.u32 2139095040, %v3545_v11 }
 0x234   :  { %2915 = vsinq.f32 %v1185_v28  ;;  %v2529_v55 = vmin.u32 %v1060_v37, %v3542_v15  ;;  %v1322_v36 = vor.u32 %v1321_v53, %v1320_v33  ;;  %v1325_v19 = vor.u32 %v1324_v44, %v1323_v16 }
 0x235   :  { %v1328_v10 = vor.u32 %v1327_v26, %v1326_v23  ;;  %vm1195_vm11 = vcmp.eq.s32.totalorder %v3540_v1, 2  ;;  %v1319_v13 = vshrl.u32 %v3047_v4, %v1318_v46  ;;  %v1332_v43 = vshll.u32 %v3051_v21, %v1317_v5 }
 0x236   :  { %v1062_v50 = vclz %v2529_v55  ;;  %v1333_v41 = vshrl.u32 %v4574_v57, %v1318_v46  ;;  %vm1335_vm12 = vcmp.lt.s32.totalorder %v3551_v54, 1  ;;  %vm1192_vm13 = vcmp.eq.s32.totalorder %v3540_v1, 0 }
 0x237   :  { %v1331_v30 = vor.u32 %v1330_v14, %v1329_v42  ;;  %vm1336_vm14 = vcmp.lt.s32.totalorder %v3551_v54, 2  ;;  %vm1338_vm15 = vcmp.lt.s32.totalorder %v3551_v54, 4  ;;  %vm996_vm0 = vcmp.lt.s32.totalorder %v3289_v39, 0 }
 0x238   :  { %v2530_v56 = vadd.s32 4294967294, %v1062_v50  ;;  %v1334_v49 = vor.u32 %v1333_v41, %v1332_v43  ;;  %vm1337_vm1 = vcmp.lt.s32.totalorder %v3551_v54, 3  ;;  %v1340_v0 = vsel %vm1338_vm15, %v1328_v10, 2102212464 }
 0x239   :  { %v1343_v38 = vsel %vm1335_vm12, %v1322_v36, %v1325_v19  ;;  %vm1189_vm2 = vweird.f32 %v3205_v51  ;;  %v1339_v29 = vsel %vm1335_vm12, %v1319_v13, %v1322_v36  ;;  %v1344_v63 = vsel %vm1338_vm15, %v1331_v30, 920167782 }
 0x23a   :  { %vm2531_vm3 = vcmp.lt.s32.totalorder %v2530_v56, 0  ;;  %v1347_v5 = vsel %vm1335_vm12, %v1325_v19, %v1328_v10  ;;  %v1345_v2 = vsel %vm1337_vm1, %v1328_v10, %v1344_v63  ;;  %v1348_v46 = vsel %vm1338_vm15, %v1334_v49, 1326507024 }
 0x23b   :  { %v1065_v47 = vsel %vm2531_vm3, 0, %v2530_v56  ;;  %v1204_v7 = vshrl.u32 %v1203_v62, 23  ;;  %v1341_v37 = vsel %vm1337_vm1, %v1325_v19, %v1340_v0  ;;  %v1346_v16 = vsel %vm1336_vm14, %v1343_v38, %v1345_v2 }
 0x23c   :  { %v1066_v33 = vsub.s32 32, %v1065_v47  ;;  %v1070_v28 = vsub.s32 4294967266, %v1065_v47  ;;  %v1067_v53 = vshll.u32 %v3542_v15, %v1065_v47  ;;  %v1349_v44 = vsel %vm1337_vm1, %v1331_v30, %v1348_v46 }
 0x23d   :  { %v2914_v23 = vpop.eup %2913  ;;  %v3594_v26 = vmul.u32.u64.low %v3564_v9, %v1346_v16  ;;  %v3595_v55 = vmul.u32.u64.high %v3564_v9, %v1346_v16, %v3594_v26  ;;  %v1350_v19 = vsel %vm1336_vm14, %v1347_v5, %v1349_v44  ;;  %v2536_v15 = vadd.s32 4294967169, %v1204_v7 }
 0x23e   :  { %v2916_v36 = vpop.eup %2915  ;;  %v1196_v10 = vxor.u32 2147483648, %v2914_v23  ;;  %v1068_v50 = vshrl.u32 %v1050_v17, %v1066_v33  ;;  %v1071_v42 = vadd.s32 127, %v1070_v28  ;;  %v1342_v30 = vsel %vm1336_vm14, %v1339_v29, %v1341_v37 }
 0x23f   :  { %v1193_v14 = vxor.u32 2147483648, %v2916_v36  ;;  %v3601_v62 = vmul.u32.u64.low %v3564_v9, %v1350_v19  ;;  %v3602_v13 = vmul.u32.u64.high %v3564_v9, %v1350_v19, %v3601_v62  ;;  %vm1191_vm4 = vcmp.lt.s32.totalorder %v3540_v1, 2 }
 0x240   :  { %v1197_v43 = vsel %vm1195_vm11, %v1196_v10, %v2916_v36  ;;  %v1069_v41 = vor.u32 %v1068_v50, %v1067_v53  ;;  %v1072_v56 = vshll.u32 %v1071_v42, 23  ;;  %v1361_v49 = vadd.s32 1, %v3595_v55 }
 0x241   :  { %v1194_v17 = vsel %vm1192_vm13, %v2914_v23, %v1193_v14  ;;  %v1210_v0 = vadd.s32 1, %v2536_v15  ;;  %v1081_v5 = vsel %vm996_vm0, %v1080_v32, %v3531_v61  ;;  %v1207_v47 = vand.u32 8388607, %v1200_v59 }
 0x242   :  { %v1198_v38 = vsel %vm1191_vm4, %v1194_v17, %v1197_v43  ;;  %v1073_v63 = vor.u32 4788187, %v1072_v56  ;;  %v1358_v29 = vmul.u32 %v3564_v9, %v1342_v30  ;;  %vm1360_vm5 = vc.u32 %v3602_v13, %v3594_v26 }
 0x243   :  { %v1199_v54 = vsel %vm1189_vm2, nan, %v1198_v38  ;;  %vm1211_vm6 = vcmp.gt.s32.totalorder %v1210_v0, 0  ;;  %v1076_v2 = vcvt.s32.f32 %v1069_v41  ;;  %v1362_v46 = vsel %vm1360_vm5, %v1361_v49, %v3595_v55 }
 0x244   :  { %2439 = vst [vmem:[#allocation7 + $0x18] sm:$0xff] %v1199_v54  ;;  %v1074_v1 = vand.u32 2147483647, %v1073_v63  ;;  %v1212_v7 = vsel %vm1211_vm6, %v1210_v0, 0  ;;  %v4578_v61 = vand.u32 2147483647, %v3289_v39  ;;  %v1363_v51 = vadd.s32 %v1362_v46, %v1358_v29 }
 0x245   :  { %v1214_v33 = vand.u32 31, %v1212_v7  ;;  %v756_v37 = vmul.f32 %v3494_v52, %v3168_v20  ;;  %v1208_v23 = vor.u32 8388608, %v1207_v47  ;;  %v3633_v53 = vshrl.u32 %v1212_v7, 5 }
 0x246   :  { %vm3625_vm7 = vcmp.le.f32.partialorder %v4578_v61, 0.7853982  ;;  %v1077_v28 = vmul.f32 %v1076_v2, %v1074_v1  ;;  %v1364_v16 = vadd.s32 536870912, %v1363_v51  ;;  %v3666_v1 = vld [vmem:[%s4560_s2] ss:$0 sm:$0xff]  ;;  %vm1305_vm8 = vcmp.lt.s32.totalorder %v3490_v24, 0 }
 0x247   :  { %v1083_v9 = vsel %vm3625_vm7, 0, %v1081_v5  ;;  %v1215_v44 = vsub.s32 32, %v1214_v33  ;;  %v1217_v36 = vshll.u32 %v3047_v4, %v1214_v33  ;;  %v1220_v10 = vshll.u32 %v3048_v8, %v1214_v33  ;;  %v3658_v5 = vld [vmem:[%s4561_s3] ss:$0 sm:$0xff] }
 0x248   :  { %v1078_v55 = vxor.u32 2147483648, %v1077_v28  ;;  %v1223_v50 = vshll.u32 %v4573_v6, %v1214_v33  ;;  %v3638_v42 = vshrl.u32 %v1364_v16, 30  ;;  %v1226_v20 = vshll.u32 %v3050_v12, %v1214_v33 }
 0x249   :  { %v1218_v19 = vshrl.u32 %v3048_v8, %v1215_v44  ;;  %v1221_v14 = vshrl.u32 %v4573_v6, %v1215_v44  ;;  %v1224_v62 = vshrl.u32 %v3050_v12, %v1215_v44  ;;  %v1227_v15 = vshrl.u32 %v3051_v21, %v1215_v44 }
 0x24a   :  { %v1079_v52 = vsel %vm996_vm0, %v1078_v55, %v1077_v28  ;;  %v1230_v43 = vshrl.u32 %v4574_v57, %v1215_v44  ;;  %v1366_v56 = vshll.u32 %v3638_v42, 30  ;;  %v1229_v17 = vshll.u32 %v3051_v21, %v1214_v33 }
 0x24b   :  { %v1082_v41 = vsel %vm3625_vm7, %v3289_v39, %v1079_v52  ;;  %v1219_v30 = vor.u32 %v1218_v19, %v1217_v36  ;;  %v1222_v49 = vor.u32 %v1221_v14, %v1220_v10  ;;  %v1225_v0 = vor.u32 %v1224_v62, %v1223_v50 }
 0x24c   :  { %2917 = vcosq.f32 %v1082_v41  ;;  %v1228_v38 = vor.u32 %v1227_v15, %v1226_v20  ;;  %v3653_v63 = vsub.s32 %v1363_v51, %v1366_v56  ;;  %v3661_v47 = vadd.f32 %v3658_v5, %v756_v37 }
 0x24d   :  { %2919 = vsinq.f32 %v1082_v41  ;;  %v1087_v54 = vand.u32 3, %v1083_v9  ;;  %v1231_v29 = vor.u32 %v1230_v43, %v1229_v17  ;;  %v3670_v2 = vmul.f32 %v3666_v1, %v3500_v22 }
 0x24e   :  { %v1369_v46 = vsub.s32 0, %v3653_v63  ;;  %vm1232_vm9 = vcmp.lt.s32.totalorder %v3633_v53, 1  ;;  %vm1235_vm10 = vcmp.lt.s32.totalorder %v3633_v53, 4  ;;  %v1248_v7 = vshll.u32 %v1208_v23, 8 }
 0x24f   :  { %v1216_v61 = vshrl.u32 %v3047_v4, %v1215_v44  ;;  %v1237_v32 = vsel %vm1235_vm10, %v1225_v0, 2102212464  ;;  %v1240_v51 = vsel %vm1232_vm9, %v1219_v30, %v1222_v49  ;;  %v1241_v33 = vsel %vm1235_vm10, %v1228_v38, 920167782 }
 0x250   :  { %v2541_v28 = vmin.u32 %v1369_v46, %v3653_v63  ;;  %vm1234_vm11 = vcmp.lt.s32.totalorder %v3633_v53, 3  ;;  %v1244_v22 = vsel %vm1232_vm9, %v1222_v49, %v1225_v0  ;;  %v1512_v9 = vand.u32 2139095040, %v3661_v47 }
 0x251   :  { %vm1088_vm12 = vcmp.lt.s32.totalorder %v1087_v54, 2  ;;  %vm1233_vm13 = vcmp.lt.s32.totalorder %v3633_v53, 2  ;;  %v1236_v37 = vsel %vm1232_vm9, %v1216_v61, %v1219_v30  ;;  %v1242_v16 = vsel %vm1234_vm11, %v1225_v0, %v1241_v33 }
 0x252   :  { %v1245_v55 = vsel %vm1235_vm10, %v1231_v29, 1326507024  ;;  %vm1086_vm14 = vweird.f32 %v3289_v39  ;;  %v1371_v23 = vclz %v2541_v28  ;;  %v1238_v44 = vsel %vm1234_vm11, %v1222_v49, %v1237_v32 }
 0x253   :  { %v1243_v36 = vsel %vm1233_vm13, %v1240_v51, %v1242_v16  ;;  %v1246_v10 = vsel %vm1234_vm11, %v1228_v38, %v1245_v55  ;;  %vm3686_vm15 = vcmp.le.f32.partialorder %v1303_v58, 0.7853982  ;;  %v1389_v19 = vsub.s32 4, %v3638_v42  ;;  %v3715_v55 = vpop.f32.mrb[12].mxu0 }
 0x254   :  { %v1247_v14 = vsel %vm1233_vm13, %v1244_v22, %v1246_v10  ;;  %v3693_v20 = vmul.u32.u64.low %v1248_v7, %v1243_v36  ;;  %v3694_v52 = vmul.u32.u64.high %v1248_v7, %v1243_v36, %v3693_v20  ;;  %v2542_v62 = vadd.s32 4294967294, %v1371_v23 }
 0x255   :  { %v3697_v15 = vmul.u32.u64.low %v1248_v7, %v1247_v14  ;;  %v3698_v43 = vmul.u32.u64.high %v1248_v7, %v1247_v14, %v3697_v15  ;;  %v1513_v41 = vshrl.u32 %v1512_v9, 23  ;;  %vm1089_vm0 = vcmp.eq.s32.totalorder %v1087_v54, 0 }
 0x256   :  { %v2918_v56 = vpop.eup %2917  ;;  %vm1092_vm1 = vcmp.eq.s32.totalorder %v1087_v54, 2  ;;  %v1359_v58 = vadd.s32 %v3594_v26, %v3602_v13  ;;  %v1239_v30 = vsel %vm1233_vm13, %v1236_v37, %v1238_v44  ;;  %vm2543_vm2 = vcmp.lt.s32.totalorder %v2542_v62, 0 }
 0x257   :  { %v2920_v17 = vpop.eup %2919  ;;  %v1093_v49 = vxor.u32 2147483648, %v2918_v56  ;;  %v1509_v0 = vand.u32 2147483647, %v3661_v47  ;;  %v2548_v38 = vadd.s32 4294967169, %v1513_v41  ;;  %v1374_v46 = vsel %vm2543_vm2, 0, %v2542_v62 }
 0x258   :  { %v1090_v29 = vxor.u32 2147483648, %v2920_v17  ;;  %v1390_v61 = vsel %vm1305_vm8, %v1389_v19, %v3638_v42  ;;  %v1258_v32 = vadd.s32 1, %v3694_v52  ;;  %v1375_v33 = vsub.s32 32, %v1374_v46 }
 0x259   :  { %v1094_v51 = vsel %vm1092_vm1, %v1093_v49, %v2920_v17  ;;  %v1379_v26 = vsub.s32 4294967266, %v1374_v46  ;;  %v1255_v13 = vmul.u32 %v1248_v7, %v1239_v30  ;;  %v1376_v28 = vshll.u32 %v3653_v63, %v1374_v46 }
 0x25a   :  { %v1091_v53 = vsel %vm1089_vm0, %v2918_v56, %v1090_v29  ;;  %vm1257_vm3 = vc.u32 %v3698_v43, %v3693_v20  ;;  %v1519_v22 = vadd.s32 1, %v2548_v38  ;;  %v1377_v37 = vshrl.u32 %v1359_v58, %v1375_v33 }
 0x25b   :  { %v1095_v9 = vsel %vm1088_vm12, %v1091_v53, %v1094_v51  ;;  %v1380_v16 = vadd.s32 127, %v1379_v26  ;;  %v1259_v42 = vsel %vm1257_vm3, %v1258_v32, %v3694_v52  ;;  %v3721_v63 = vadd.f32 %v3658_v5, %v3670_v2 }
 0x25c   :  { %v1096_v23 = vsel %vm1086_vm14, nan, %v1095_v9  ;;  %v1260_v7 = vadd.s32 %v1259_v42, %v1255_v13  ;;  %vm1520_vm4 = vcmp.gt.s32.totalorder %v1519_v22, 0  ;;  %v1378_v44 = vor.u32 %v1377_v37, %v1376_v28 }
 0x25d   :  { %2438 = vst [vmem:[#allocation7 + $0x10] sm:$0xff] %v1096_v23  ;;  %v1381_v36 = vshll.u32 %v1380_v16, 23  ;;  %v1392_v54 = vsel %vm3686_vm15, 0, %v1390_v61  ;;  %v1521_v10 = vsel %vm1520_vm4, %v1519_v22, 0  ;;  %v1516_v14 = vand.u32 8388607, %v1509_v0 }
 0x25e   :  { %v1261_v19 = vadd.s32 536870912, %v1260_v7  ;;  %v1523_v52 = vand.u32 31, %v1521_v10  ;;  %v3727_v62 = vand.u32 3, %v1392_v54  ;;  %v1385_v56 = vcvt.s32.f32 %v1378_v44 }
 0x25f   :  { %v1382_v39 = vor.u32 4788187, %v1381_v36  ;;  %v1406_v58 = vand.u32 2147483647, %v3721_v63  ;;  %v1409_v30 = vand.u32 2139095040, %v3721_v63  ;;  %v1517_v49 = vor.u32 8388608, %v1516_v14 }
 0x260   :  { %v3729_v15 = vshrl.u32 %v1261_v19, 30  ;;  %v1524_v41 = vsub.s32 32, %v1523_v52  ;;  %v1526_v38 = vshll.u32 %v3047_v4, %v1523_v52  ;;  %v1529_v26 = vshll.u32 %v3048_v8, %v1523_v52 }
 0x261   :  { %v1383_v2 = vand.u32 2147483647, %v1382_v39  ;;  %v1532_v13 = vshll.u32 %v4573_v6, %v1523_v52  ;;  %v1522_v22 = vshrl.u32 %v1521_v10, 5  ;;  %v1535_v9 = vshll.u32 %v3050_v12, %v1523_v52 }
 0x262   :  { %v1263_v17 = vshll.u32 %v3729_v15, 30  ;;  %v1527_v29 = vshrl.u32 %v3048_v8, %v1524_v41  ;;  %v1530_v61 = vshrl.u32 %v4573_v6, %v1524_v41  ;;  %v1533_v32 = vshrl.u32 %v3050_v12, %v1524_v41 }
 0x263   :  { %v1386_v46 = vmul.f32 %v1385_v56, %v1383_v2  ;;  %v1536_v51 = vshrl.u32 %v3051_v21, %v1524_v41  ;;  %v1539_v53 = vshrl.u32 %v4574_v57, %v1524_v41  ;;  %v1538_v37 = vshll.u32 %v3051_v21, %v1523_v52 }
 0x264   :  { %v3739_v33 = vsub.s32 %v1260_v7, %v1263_v17  ;;  %v1528_v42 = vor.u32 %v1527_v29, %v1526_v38  ;;  %v1531_v23 = vor.u32 %v1530_v61, %v1529_v26  ;;  %v1534_v44 = vor.u32 %v1533_v32, %v1532_v13 }
 0x265   :  { %v1387_v28 = vxor.u32 2147483648, %v1386_v46  ;;  %v1537_v36 = vor.u32 %v1536_v51, %v1535_v9  ;;  %v1540_v54 = vor.u32 %v1539_v53, %v1538_v37  ;;  %v3749_v19 = vshll.u32 %v1517_v49, 8 }
 0x266   :  { %v1266_v16 = vsub.s32 0, %v3739_v33  ;;  %v1286_v52 = vsub.s32 4, %v3729_v15  ;;  %v1410_v39 = vshrl.u32 %v1409_v30, 23  ;;  %v1525_v2 = vshrl.u32 %v3047_v4, %v1524_v41 }
 0x267   :  { %v1388_v7 = vsel %vm1305_vm8, %v1387_v28, %v1386_v46  ;;  %vm1541_vm5 = vcmp.lt.s32.totalorder %v1522_v22, 1  ;;  %vm1544_vm6 = vcmp.lt.s32.totalorder %v1522_v22, 4  ;;  %vm1202_vm7 = vcmp.lt.s32.totalorder %v3545_v11, 0  ;;  %v3760_v46 = vpop.f32.mrb[13].mxu0 }
 0x268   :  { %v1391_v10 = vsel %vm3686_vm15, %v3490_v24, %v1388_v7  ;;  %v2537_v14 = vmin.u32 %v1266_v16, %v3739_v33  ;;  %v1546_v17 = vsel %vm1544_vm6, %v1534_v44, 2102212464  ;;  %v1549_v49 = vsel %vm1541_vm5, %v1528_v42, %v1531_v23 }
 0x269   :  { %2921 = vcosq.f32 %v1391_v10  ;;  %vm1543_vm8 = vcmp.lt.s32.totalorder %v1522_v22, 3  ;;  %v1550_v50 = vsel %vm1544_vm6, %v1537_v36, 920167782  ;;  %v1553_v38 = vsel %vm1541_vm5, %v1531_v23, %v1534_v44 }
 0x26a   :  { %2923 = vsinq.f32 %v1391_v10  ;;  %v1268_v56 = vclz %v2537_v14  ;;  %v1554_v29 = vsel %vm1544_vm6, %v1540_v54, 1326507024  ;;  %vm1542_vm9 = vcmp.lt.s32.totalorder %v1522_v22, 2 }
 0x26b   :  { %v1551_v61 = vsel %vm1543_vm8, %v1534_v44, %v1550_v50  ;;  %v1555_v41 = vsel %vm1543_vm8, %v1537_v36, %v1554_v29  ;;  %v1545_v32 = vsel %vm1541_vm5, %v1525_v2, %v1528_v42  ;;  %v2544_v13 = vadd.s32 4294967169, %v1410_v39 }
 0x26c   :  { %v2538_v30 = vadd.s32 4294967294, %v1268_v56  ;;  %v1552_v51 = vsel %vm1542_vm9, %v1549_v49, %v1551_v61  ;;  %v1556_v26 = vsel %vm1542_vm9, %v1553_v38, %v1555_v41  ;;  %vm3767_vm10 = vcmp.le.f32.partialorder %v1200_v59, 0.7853982 }
 0x26d   :  { %v1547_v28 = vsel %vm1543_vm8, %v1531_v23, %v1546_v17  ;;  %v3772_v9 = vmul.u32.u64.low %v3749_v19, %v1556_v26  ;;  %v3773_v37 = vmul.u32.u64.high %v3749_v19, %v1556_v26, %v3772_v9  ;;  %v1416_v7 = vadd.s32 1, %v2544_v13 }
 0x26e   :  { %vm2539_vm11 = vcmp.lt.s32.totalorder %v2538_v30, 0  ;;  %v3776_v42 = vmul.u32.u64.low %v3749_v19, %v1552_v51  ;;  %v3777_v44 = vmul.u32.u64.high %v3749_v19, %v1552_v51, %v3776_v42  ;;  %vm1395_vm12 = vweird.f32 %v3490_v24 }
 0x26f   :  { %v1271_v16 = vsel %vm2539_vm11, 0, %v2538_v30  ;;  %vm1397_vm13 = vcmp.lt.s32.totalorder %v3727_v62, 2  ;;  %v1256_v59 = vadd.s32 %v3693_v20, %v3698_v43  ;;  %v1548_v54 = vsel %vm1542_vm9, %v1545_v32, %v1547_v28 }
 0x270   :  { %v1272_v36 = vsub.s32 32, %v1271_v16  ;;  %v1276_v23 = vsub.s32 4294967266, %v1271_v16  ;;  %vm1417_vm14 = vcmp.gt.s32.totalorder %v1416_v7, 0  ;;  %v3787_v10 = vadd.f32 %v3383_v60, %v3163_v18 }
 0x271   :  { %v3791_v14 = vadd.f32 %v3519_v3, %v3175_v25  ;;  %v1273_v39 = vshll.u32 %v3739_v33, %v1271_v16  ;;  %vm1566_vm15 = vc.u32 %v3773_v37, %v3776_v42  ;;  %v1287_v43 = vsel %vm1202_vm7, %v1286_v52, %v3729_v15 }
 0x272   :  { %v1274_v2 = vshrl.u32 %v1256_v59, %v1272_v36  ;;  %v1277_v56 = vadd.s32 127, %v1276_v23  ;;  %v1567_v22 = vadd.s32 1, %v3777_v44  ;;  %v1413_v18 = vand.u32 8388607, %v1406_v58 }
 0x273   :  { %v2922_v20 = vpop.eup %2921  ;;  %v1418_v60 = vsel %vm1417_vm14, %v1416_v7, 0  ;;  %v1564_v49 = vmul.u32 %v3749_v19, %v1548_v54  ;;  %vm1401_vm0 = vcmp.eq.s32.totalorder %v3727_v62, 2  ;;  %vm1398_vm1 = vcmp.eq.s32.totalorder %v3727_v62, 0 }
 0x274   :  { %v2924_v25 = vpop.eup %2923  ;;  %v1402_v3 = vxor.u32 2147483648, %v2922_v20  ;;  %v1275_v17 = vor.u32 %v1274_v2, %v1273_v39  ;;  %v1278_v33 = vshll.u32 %v1277_v56, 23  ;;  %v1568_v38 = vsel %vm1566_vm15, %v1567_v22, %v3777_v44 }
 0x275   :  { %v1399_v50 = vxor.u32 2147483648, %v2924_v25  ;;  %v1420_v29 = vand.u32 31, %v1418_v60  ;;  %v1569_v30 = vadd.s32 %v1568_v38, %v1564_v49  ;;  %v1289_v41 = vsel %vm3767_vm10, 0, %v1287_v43 }
 0x276   :  { %v1403_v15 = vsel %vm1401_vm0, %v1402_v3, %v2924_v25  ;;  %v1279_v52 = vor.u32 4788187, %v1278_v33  ;;  %v1414_v32 = vor.u32 8388608, %v1413_v18  ;;  %v1282_v13 = vcvt.s32.f32 %v1275_v17 }
 0x277   :  { %v1400_v61 = vsel %vm1398_vm1, %v2922_v20, %v1399_v50  ;;  %v1421_v51 = vsub.s32 32, %v1420_v29  ;;  %v1570_v28 = vadd.s32 536870912, %v1569_v30  ;;  %v1423_v16 = vshll.u32 %v3047_v4, %v1420_v29 }
 0x278   :  { %v1404_v19 = vsel %vm1397_vm13, %v1400_v61, %v1403_v15  ;;  %v1280_v26 = vand.u32 2147483647, %v1279_v52  ;;  %v1426_v23 = vshll.u32 %v3048_v8, %v1420_v29  ;;  %v1419_v54 = vshrl.u32 %v1418_v60, 5 }
 0x279   :  { %v1405_v9 = vsel %vm1395_vm12, nan, %v1404_v19  ;;  %v1424_v44 = vshrl.u32 %v3048_v8, %v1421_v51  ;;  %v1427_v7 = vshrl.u32 %v4573_v6, %v1421_v51  ;;  %v3815_v36 = vshrl.u32 %v1570_v28, 30 }
 0x27a   :  { %2441 = vst [vmem:[#allocation7 + $0x28] sm:$0xff] %v1405_v9  ;;  %v1283_v59 = vmul.f32 %v1282_v13, %v1280_v26  ;;  %v1430_v62 = vshrl.u32 %v3050_v12, %v1421_v51  ;;  %v1429_v39 = vshll.u32 %v4573_v6, %v1420_v29  ;;  %v1432_v24 = vshll.u32 %v3050_v12, %v1420_v29 }
 0x27b   :  { %v1433_v2 = vshrl.u32 %v3051_v21, %v1421_v51  ;;  %v1572_v20 = vshll.u32 %v3815_v36, 30  ;;  %v1425_v43 = vor.u32 %v1424_v44, %v1423_v16  ;;  %v1428_v22 = vor.u32 %v1427_v7, %v1426_v23 }
 0x27c   :  { %v1284_v56 = vxor.u32 2147483648, %v1283_v59  ;;  %v1431_v18 = vor.u32 %v1430_v62, %v1429_v39  ;;  %v1435_v3 = vshll.u32 %v3051_v21, %v1420_v29  ;;  %v1436_v17 = vshrl.u32 %v4574_v57, %v1421_v51 }
 0x27d   :  { %v1434_v25 = vor.u32 %v1433_v2, %v1432_v24  ;;  %v3827_v33 = vand.u32 3, %v1289_v41  ;;  %v3829_v49 = vsub.s32 %v1569_v30, %v1572_v20  ;;  %v758_v50 = vmul.f32 %v3666_v1, %v3537_v35 }
 0x27e   :  { %v1285_v60 = vsel %vm1202_vm7, %v1284_v56, %v1283_v59  ;;  %v1422_v15 = vshrl.u32 %v3047_v4, %v1421_v51  ;;  %v1437_v52 = vor.u32 %v1436_v17, %v1435_v3  ;;  %v1454_v29 = vshll.u32 %v1414_v32, 8 }
 0x27f   :  { %v1288_v38 = vsel %vm3767_vm10, %v3545_v11, %v1285_v60  ;;  %v1575_v61 = vsub.s32 0, %v3829_v49  ;;  %vm1438_vm2 = vcmp.lt.s32.totalorder %v1419_v54, 1  ;;  %vm1441_vm3 = vcmp.lt.s32.totalorder %v1419_v54, 4 }
 0x280   :  { %2925 = vcosq.f32 %v1288_v38  ;;  %v1443_v41 = vsel %vm1441_vm3, %v1431_v18, 2102212464  ;;  %v1446_v30 = vsel %vm1438_vm2, %v1425_v43, %v1428_v22  ;;  %v1447_v19 = vsel %vm1441_vm3, %v1434_v25, 920167782 }
 0x281   :  { %2927 = vsinq.f32 %v1288_v38  ;;  %v2549_v26 = vmin.u32 %v1575_v61, %v3829_v49  ;;  %vm1439_vm4 = vcmp.lt.s32.totalorder %v1419_v54, 2  ;;  %vm1440_vm5 = vcmp.lt.s32.totalorder %v1419_v54, 3 }
 0x282   :  { %v3840_v35 = vadd.f32 %v3658_v5, %v758_v50  ;;  %v1442_v53 = vsel %vm1438_vm2, %v1422_v15, %v1425_v43  ;;  %v1448_v51 = vsel %vm1440_vm5, %v1431_v18, %v1447_v19  ;;  %v1450_v13 = vsel %vm1438_vm2, %v1428_v22, %v1431_v18 }
 0x283   :  { %v1451_v32 = vsel %vm1441_vm3, %v1437_v52, 1326507024  ;;  %v1577_v28 = vclz %v2549_v26  ;;  %v1444_v9 = vsel %vm1440_vm5, %v1428_v22, %v1443_v41  ;;  %v1449_v16 = vsel %vm1439_vm4, %v1446_v30, %v1448_v51 }
 0x284   :  { %v1452_v44 = vsel %vm1440_vm5, %v1434_v25, %v1451_v32  ;;  %v3844_v59 = vmul.u32.u64.low %v1454_v29, %v1449_v16  ;;  %v3845_v23 = vmul.u32.u64.high %v1454_v29, %v1449_v16, %v3844_v59  ;;  %vm1511_vm6 = vcmp.lt.s32.totalorder %v3661_v47, 0 }
 0x285   :  { %v1453_v7 = vsel %vm1439_vm4, %v1450_v13, %v1452_v44  ;;  %v2550_v62 = vadd.s32 4294967294, %v1577_v28  ;;  %vm1292_vm7 = vweird.f32 %v3545_v11  ;;  %vm1294_vm8 = vcmp.lt.s32.totalorder %v3827_v33, 2 }
 0x286   :  { %v3849_v39 = vmul.u32.u64.low %v1454_v29, %v1453_v7  ;;  %v3850_v24 = vmul.u32.u64.high %v1454_v29, %v1453_v7, %v3849_v39  ;;  %vm1295_vm9 = vcmp.eq.s32.totalorder %v3827_v33, 0  ;;  %v1445_v2 = vsel %vm1439_vm4, %v1442_v53, %v1444_v9 }
 0x287   :  { %v1718_v56 = vand.u32 2139095040, %v3840_v35  ;;  %vm1298_vm10 = vcmp.eq.s32.totalorder %v3827_v33, 2  ;;  %v1565_v20 = vadd.s32 %v3776_v42, %v3773_v37  ;;  %vm2551_vm11 = vcmp.lt.s32.totalorder %v2550_v62, 0 }
 0x288   :  { %v3862_v43 = vadd.f32 %v3571_v40, %v3178_v27  ;;  %v1580_v22 = vsel %vm2551_vm11, 0, %v2550_v62  ;;  %v1464_v18 = vadd.s32 1, %v3845_v23  ;;  %v1715_v25 = vand.u32 2147483647, %v3840_v35  ;;  %v3870_v40 = vpop.f32.mrb[14].mxu0 }
 0x289   :  { %v1719_v3 = vshrl.u32 %v1718_v56, 23  ;;  %v1581_v17 = vsub.s32 32, %v1580_v22  ;;  %v1585_v60 = vsub.s32 4294967266, %v1580_v22  ;;  %v1595_v50 = vsub.s32 4, %v3815_v36 }
 0x28a   :  { %v2926_v54 = vpop.eup %2925  ;;  %v1461_v38 = vmul.u32 %v1454_v29, %v1445_v2  ;;  %v1582_v37 = vshll.u32 %v3829_v49, %v1580_v22  ;;  %vm1463_vm12 = vc.u32 %v3850_v24, %v3844_v59  ;;  %v1722_v29 = vand.u32 8388607, %v1715_v25 }
 0x28b   :  { %v2928_v15 = vpop.eup %2927  ;;  %v1299_v52 = vxor.u32 2147483648, %v2926_v54  ;;  %v2556_v27 = vadd.s32 4294967169, %v1719_v3  ;;  %v1583_v61 = vshrl.u32 %v1565_v20, %v1581_v17  ;;  %v1586_v41 = vadd.s32 127, %v1585_v60 }
 0x28c   :  { %v1296_v42 = vxor.u32 2147483648, %v2928_v15  ;;  %v1465_v30 = vsel %vm1463_vm12, %v1464_v18, %v3845_v23  ;;  %v1596_v32 = vsel %vm1511_vm6, %v1595_v50, %v3815_v36  ;;  %vm3886_vm13 = vcmp.le.f32.partialorder %v1509_v0, 0.7853982 }
 0x28d   :  { %v1300_v19 = vsel %vm1298_vm10, %v1299_v52, %v2928_v15  ;;  %v1466_v26 = vadd.s32 %v1465_v30, %v1461_v38  ;;  %v1725_v53 = vadd.s32 1, %v2556_v27  ;;  %v1584_v51 = vor.u32 %v1583_v61, %v1582_v37 }
 0x28e   :  { %v1297_v49 = vsel %vm1295_vm9, %v2926_v54, %v1296_v42  ;;  %v1587_v13 = vshll.u32 %v1586_v41, 23  ;;  %v757_v62 = vmul.f32 %v3666_v1, %v3787_v10  ;;  %v1598_v36 = vsel %vm3886_vm13, 0, %v1596_v32 }
 0x28f   :  { %v1301_v28 = vsel %vm1294_vm8, %v1297_v49, %v1300_v19  ;;  %v1467_v16 = vadd.s32 536870912, %v1466_v26  ;;  %vm1726_vm14 = vcmp.gt.s32.totalorder %v1725_v53, 0  ;;  %v1723_v0 = vor.u32 8388608, %v1722_v29 }
 0x290   :  { %v1302_v44 = vsel %vm1292_vm7, nan, %v1301_v28  ;;  %v1588_v7 = vor.u32 4788187, %v1587_v13  ;;  %v1727_v23 = vsel %vm1726_vm14, %v1725_v53, 0  ;;  %v1591_v56 = vcvt.s32.f32 %v1584_v51 }
 0x291   :  { %2440 = vst [vmem:[#allocation7 + $0x20] sm:$0xff] %v1302_v44  ;;  %v3896_v33 = vshrl.u32 %v1467_v16, 30  ;;  %v1729_v39 = vand.u32 31, %v1727_v23  ;;  %v3899_v18 = vand.u32 3, %v1598_v36  ;;  %v3902_v3 = vadd.f32 %v3658_v5, %v757_v62 }
 0x292   :  { %v1589_v2 = vand.u32 2147483647, %v1588_v7  ;;  %v3906_v10 = vmul.f32 %v3666_v1, %v3791_v14  ;;  %v3910_v17 = vshrl.u32 %v1727_v23, 5  ;;  %v3913_v50 = vshll.u32 %v1723_v0, 8 }
 0x293   :  { %v1469_v20 = vshll.u32 %v3896_v33, 30  ;;  %v1730_v22 = vsub.s32 32, %v1729_v39  ;;  %v1732_v15 = vshll.u32 %v3047_v4, %v1729_v39  ;;  %v1735_v1 = vshll.u32 %v3048_v8, %v1729_v39 }
 0x294   :  { %v1592_v11 = vmul.f32 %v1591_v56, %v1589_v2  ;;  %v1738_v14 = vshll.u32 %v4573_v6, %v1729_v39  ;;  %v1741_v30 = vshll.u32 %v3050_v12, %v1729_v39  ;;  %v1615_v19 = vand.u32 2139095040, %v3902_v3 }
 0x295   :  { %v3908_v54 = vsub.s32 %v1466_v26, %v1469_v20  ;;  %v1733_v60 = vshrl.u32 %v3048_v8, %v1730_v22  ;;  %v1736_v52 = vshrl.u32 %v4573_v6, %v1730_v22  ;;  %v1739_v37 = vshrl.u32 %v3050_v12, %v1730_v22 }
 0x296   :  { %v1593_v38 = vxor.u32 2147483648, %v1592_v11  ;;  %v1742_v42 = vshrl.u32 %v3051_v21, %v1730_v22  ;;  %v1744_v13 = vshll.u32 %v3051_v21, %v1729_v39  ;;  %v1745_v32 = vshrl.u32 %v4574_v57, %v1730_v22 }
 0x297   :  { %v1472_v27 = vsub.s32 0, %v3908_v54  ;;  %v1734_v41 = vor.u32 %v1733_v60, %v1732_v15  ;;  %v1737_v53 = vor.u32 %v1736_v52, %v1735_v1  ;;  %v1740_v49 = vor.u32 %v1739_v37, %v1738_v14  ;;  %v3949_v52 = vpop.f32.mrb[15].mxu0 }
 0x298   :  { %v1594_v61 = vsel %vm1511_vm6, %v1593_v38, %v1592_v11  ;;  %v1743_v51 = vor.u32 %v1742_v42, %v1741_v30  ;;  %v1731_v16 = vshrl.u32 %v3047_v4, %v1730_v22  ;;  %vm1747_vm15 = vcmp.lt.s32.totalorder %v3910_v17, 1 }
 0x299   :  { %v1597_v26 = vsel %vm3886_vm13, %v3661_v47, %v1594_v61  ;;  %v2545_v29 = vmin.u32 %v1472_v27, %v3908_v54  ;;  %v1746_v44 = vor.u32 %v1745_v32, %v1744_v13  ;;  %vm1748_vm0 = vcmp.lt.s32.totalorder %v3910_v17, 2 }
 0x29a   :  { %2929 = vcosq.f32 %v1597_v26  ;;  %vm1749_vm1 = vcmp.lt.s32.totalorder %v3910_v17, 3  ;;  %vm1750_vm2 = vcmp.lt.s32.totalorder %v3910_v17, 4  ;;  %v1755_v23 = vsel %vm1747_vm15, %v1734_v41, %v1737_v53 }
 0x29b   :  { %2931 = vsinq.f32 %v1597_v26  ;;  %v1474_v28 = vclz %v2545_v29  ;;  %v1752_v7 = vsel %vm1750_vm2, %v1740_v49, 2102212464  ;;  %v1756_v62 = vsel %vm1750_vm2, %v1743_v51, 920167782 }
 0x29c   :  { %vm1408_vm3 = vcmp.lt.s32.totalorder %v3721_v63, 0  ;;  %v1751_v36 = vsel %vm1747_vm15, %v1731_v16, %v1734_v41  ;;  %v1757_v0 = vsel %vm1749_vm1, %v1740_v49, %v1756_v62  ;;  %v1759_v39 = vsel %vm1747_vm15, %v1737_v53, %v1740_v49 }
 0x29d   :  { %v2546_v9 = vadd.s32 4294967294, %v1474_v28  ;;  %v1760_v2 = vsel %vm1750_vm2, %v1746_v44, 1326507024  ;;  %vm1604_vm4 = vcmp.eq.s32.totalorder %v3899_v18, 0  ;;  %v1753_v56 = vsel %vm1749_vm1, %v1737_v53, %v1752_v7 }
 0x29e   :  { %v1758_v20 = vsel %vm1748_vm0, %v1755_v23, %v1757_v0  ;;  %v1761_v22 = vsel %vm1749_vm1, %v1743_v51, %v1760_v2  ;;  %vm1603_vm6 = vcmp.lt.s32.totalorder %v3899_v18, 2  ;;  %vm1601_vm7 = vweird.f32 %v3661_v47 }
 0x29f   :  { %vm2547_vm5 = vcmp.lt.s32.totalorder %v2546_v9, 0  ;;  %v1762_v60 = vsel %vm1748_vm0, %v1759_v39, %v1761_v22  ;;  %v3945_v38 = vmul.u32.u64.low %v3913_v50, %v1758_v20  ;;  %v3946_v15 = vmul.u32.u64.high %v3913_v50, %v1758_v20, %v3945_v38 }
 0x2a0   :  { %v1477_v11 = vsel %vm2547_vm5, 0, %v2546_v9  ;;  %v1462_v37 = vadd.s32 %v3844_v59, %v3850_v24  ;;  %v1612_v14 = vand.u32 2147483647, %v3902_v3  ;;  %v1492_v42 = vsub.s32 4, %v3896_v33 }
 0x2a1   :  { %v1478_v27 = vsub.s32 32, %v1477_v11  ;;  %v1482_v1 = vsub.s32 4294967266, %v1477_v11  ;;  %v3957_v61 = vmul.u32.u64.low %v3913_v50, %v1762_v60  ;;  %v3958_v41 = vmul.u32.u64.high %v3913_v50, %v1762_v60, %v3957_v61 }
 0x2a2   :  { %v1616_v30 = vshrl.u32 %v1615_v19, 23  ;;  %v1479_v26 = vshll.u32 %v3908_v54, %v1477_v11  ;;  %v1754_v49 = vsel %vm1748_vm0, %v1751_v36, %v1753_v56  ;;  %vm1607_vm8 = vcmp.eq.s32.totalorder %v3899_v18, 2 }
 0x2a3   :  { %v1480_v29 = vshrl.u32 %v1462_v37, %v1478_v27  ;;  %v1483_v53 = vadd.s32 127, %v1482_v1  ;;  %v1773_v59 = vadd.s32 1, %v3946_v15  ;;  %v3967_v13 = vadd.f32 %v3658_v5, %v3906_v10 }
 0x2a4   :  { %v2930_v51 = vpop.eup %2929  ;;  %v2552_v24 = vadd.s32 4294967169, %v1616_v30  ;;  %v1619_v54 = vand.u32 8388607, %v1612_v14  ;;  %v1770_v17 = vmul.u32 %v3913_v50, %v1754_v49  ;;  %vm1772_vm9 = vc.u32 %v3958_v41, %v3945_v38 }
 0x2a5   :  { %v2932_v32 = vpop.eup %2931  ;;  %v1608_v28 = vxor.u32 2147483648, %v2930_v51  ;;  %v1481_v19 = vor.u32 %v1480_v29, %v1479_v26  ;;  %v1484_v16 = vshll.u32 %v1483_v53, 23  ;;  %v1493_v5 = vsel %vm1408_vm3, %v1492_v42, %v3896_v33 }
 0x2a6   :  { %v1605_v44 = vxor.u32 2147483648, %v2932_v32  ;;  %v1622_v9 = vadd.s32 1, %v2552_v24  ;;  %v1774_v10 = vsel %vm1772_vm9, %v1773_v59, %v3946_v15  ;;  %v1924_v0 = vand.u32 2139095040, %v3967_v13 }
 0x2a7   :  { %v1609_v7 = vsel %vm1607_vm8, %v1608_v28, %v2932_v32  ;;  %v1485_v23 = vor.u32 4788187, %v1484_v16  ;;  %v1775_v36 = vadd.s32 %v1774_v10, %v1770_v17  ;;  %v1488_v2 = vcvt.s32.f32 %v1481_v19 }
 0x2a8   :  { %v1606_v62 = vsel %vm1604_vm4, %v2930_v51, %v1605_v44  ;;  %vm1623_vm10 = vcmp.gt.s32.totalorder %v1622_v9, 0  ;;  %vm3987_vm11 = vcmp.le.f32.partialorder %v1406_v58, 0.7853982  ;;  %v1620_v37 = vor.u32 8388608, %v1619_v54 }
 0x2a9   :  { %v1610_v50 = vsel %vm1603_vm6, %v1606_v62, %v1609_v7  ;;  %v1486_v39 = vand.u32 2147483647, %v1485_v23  ;;  %v1624_v56 = vsel %vm1623_vm10, %v1622_v9, 0  ;;  %v1776_v22 = vadd.s32 536870912, %v1775_v36 }
 0x2aa   :  { %v1611_v20 = vsel %vm1601_vm7, nan, %v1610_v50  ;;  %v1626_v33 = vand.u32 31, %v1624_v56  ;;  %v1495_v18 = vsel %vm3987_vm11, 0, %v1493_v5  ;;  %v3995_v47 = vshrl.u32 %v1624_v56, 5 }
 0x2ab   :  { %2443 = vst [vmem:[#allocation7 + $0x38] sm:$0xff] %v1611_v20  ;;  %v1489_v60 = vmul.f32 %v1488_v2, %v1486_v39  ;;  %v3993_v15 = vshrl.u32 %v1776_v22, 30  ;;  %v1921_v42 = vand.u32 2147483647, %v3967_v13  ;;  %v1925_v61 = vshrl.u32 %v1924_v0, 23 }
 0x2ac   :  { %v1627_v27 = vsub.s32 32, %v1626_v33  ;;  %v1629_v58 = vshll.u32 %v3047_v4, %v1626_v33  ;;  %v1632_v29 = vshll.u32 %v3048_v8, %v1626_v33  ;;  %v1635_v28 = vshll.u32 %v4573_v6, %v1626_v33 }
 0x2ad   :  { %v1490_v1 = vxor.u32 2147483648, %v1489_v60  ;;  %v1778_v30 = vshll.u32 %v3993_v15, 30  ;;  %v1638_v19 = vshll.u32 %v3050_v12, %v1626_v33  ;;  %v4014_v16 = vand.u32 3, %v1495_v18 }
 0x2ae   :  { %v1630_v26 = vshrl.u32 %v3048_v8, %v1627_v27  ;;  %v1633_v49 = vshrl.u32 %v4573_v6, %v1627_v27  ;;  %v1636_v51 = vshrl.u32 %v3050_v12, %v1627_v27  ;;  %v1639_v59 = vshrl.u32 %v3051_v21, %v1627_v27 }
 0x2af   :  { %v1491_v53 = vsel %vm1408_vm3, %v1490_v1, %v1489_v60  ;;  %v4010_v32 = vsub.s32 %v1775_v36, %v1778_v30  ;;  %v1641_v23 = vshll.u32 %v3051_v21, %v1626_v33  ;;  %v1642_v5 = vshrl.u32 %v4574_v57, %v1627_v27 }
 0x2b0   :  { %v1494_v24 = vsel %vm3987_vm11, %v3721_v63, %v1491_v53  ;;  %v1631_v54 = vor.u32 %v1630_v26, %v1629_v58  ;;  %v1634_v44 = vor.u32 %v1633_v49, %v1632_v29  ;;  %v1637_v9 = vor.u32 %v1636_v51, %v1635_v28 }
 0x2b1   :  { %2933 = vcosq.f32 %v1494_v24  ;;  %v1781_v17 = vsub.s32 0, %v4010_v32  ;;  %v1640_v7 = vor.u32 %v1639_v59, %v1638_v19  ;;  %v4019_v10 = vshll.u32 %v1620_v37, 8 }
 0x2b2   :  { %2935 = vsinq.f32 %v1494_v24  ;;  %v2564_v62 = vadd.s32 4294967169, %v1925_v61  ;;  %v1628_v0 = vshrl.u32 %v3047_v4, %v1627_v27  ;;  %vm1644_vm12 = vcmp.lt.s32.totalorder %v3995_v47, 1 }
 0x2b3   :  { %v2557_v36 = vmin.u32 %v1781_v17, %v4010_v32  ;;  %v4026_v50 = vand.u32 8388607, %v1921_v42  ;;  %vm1504_vm13 = vcmp.eq.s32.totalorder %v4014_v16, 2  ;;  %v1643_v39 = vor.u32 %v1642_v5, %v1641_v23 }
 0x2b4   :  { %vm1646_vm14 = vcmp.lt.s32.totalorder %v3995_v47, 3  ;;  %vm1647_vm15 = vcmp.lt.s32.totalorder %v3995_v47, 4  ;;  %v1652_v2 = vsel %vm1644_vm12, %v1631_v54, %v1634_v44  ;;  %vm1501_vm0 = vcmp.eq.s32.totalorder %v4014_v16, 0 }
 0x2b5   :  { %v1783_v56 = vclz %v2557_v36  ;;  %v1649_v20 = vsel %vm1647_vm15, %v1637_v9, 2102212464  ;;  %v1653_v22 = vsel %vm1647_vm15, %v1640_v7, 920167782  ;;  %v1656_v33 = vsel %vm1644_vm12, %v1634_v44, %v1637_v9 }
 0x2b6   :  { %vm1500_vm1 = vcmp.lt.s32.totalorder %v4014_v16, 2  ;;  %vm1645_vm2 = vcmp.lt.s32.totalorder %v3995_v47, 2  ;;  %v1654_v11 = vsel %vm1646_vm14, %v1637_v9, %v1653_v22  ;;  %v1657_v60 = vsel %vm1647_vm15, %v1643_v39, 1326507024 }
 0x2b7   :  { %v1931_v18 = vadd.s32 1, %v2564_v62  ;;  %vm1498_vm3 = vweird.f32 %v3721_v63  ;;  %vm1717_vm4 = vcmp.lt.s32.totalorder %v3840_v35, 0  ;;  %v2558_v37 = vadd.s32 4294967294, %v1783_v56 }
 0x2b8   :  { %v1648_v27 = vsel %vm1644_vm12, %v1628_v0, %v1631_v54  ;;  %v1655_v1 = vsel %vm1645_vm2, %v1652_v2, %v1654_v11  ;;  %v1658_v61 = vsel %vm1646_vm14, %v1640_v7, %v1657_v60  ;;  %v1650_v30 = vsel %vm1646_vm14, %v1634_v44, %v1649_v20 }
 0x2b9   :  { %v1659_v58 = vsel %vm1645_vm2, %v1656_v33, %v1658_v61  ;;  %v4053_v26 = vmul.u32.u64.low %v4019_v10, %v1655_v1  ;;  %v4054_v29 = vmul.u32.u64.high %v4019_v10, %v1655_v1, %v4053_v26  ;;  %vm2559_vm5 = vcmp.lt.s32.totalorder %v2558_v37, 0 }
 0x2ba   :  { %v4058_v53 = vmul.u32.u64.low %v4019_v10, %v1659_v58  ;;  %v4059_v49 = vmul.u32.u64.high %v4019_v10, %v1659_v58, %v4058_v53  ;;  %vm1932_vm6 = vcmp.gt.s32.totalorder %v1931_v18, 0  ;;  %v1771_v59 = vadd.s32 %v3945_v38, %v3958_v41 }
 0x2bb   :  { %v2934_v51 = vpop.eup %2933  ;;  %v1786_v24 = vsel %vm2559_vm5, 0, %v2558_v37  ;;  %v1929_v28 = vor.u32 8388608, %v4026_v50  ;;  %v1933_v19 = vsel %vm1932_vm6, %v1931_v18, 0  ;;  %v1651_v7 = vsel %vm1645_vm2, %v1648_v27, %v1650_v30 }
 0x2bc   :  { %v2936_v54 = vpop.eup %2935  ;;  %v1505_v44 = vxor.u32 2147483648, %v2934_v51  ;;  %v1787_v17 = vsub.s32 32, %v1786_v24  ;;  %v1791_v9 = vsub.s32 4294967266, %v1786_v24  ;;  %v1801_v5 = vsub.s32 4, %v3993_v15 }
 0x2bd   :  { %v1502_v23 = vxor.u32 2147483648, %v2936_v54  ;;  %v1670_v62 = vadd.s32 1, %v4054_v29  ;;  %v1935_v36 = vand.u32 31, %v1933_v19  ;;  %vm4072_vm7 = vcmp.le.f32.partialorder %v1715_v25, 0.7853982 }
 0x2be   :  { %v1506_v38 = vsel %vm1504_vm13, %v1505_v44, %v2936_v54  ;;  %v1788_v0 = vshll.u32 %v4010_v32, %v1786_v24  ;;  %v1789_v50 = vshrl.u32 %v1771_v59, %v1787_v17  ;;  %v1792_v47 = vadd.s32 127, %v1791_v9 }
 0x2bf   :  { %v1503_v39 = vsel %vm1501_vm0, %v2934_v51, %v1502_v23  ;;  %v1667_v2 = vmul.u32 %v4019_v10, %v1651_v7  ;;  %vm1669_vm8 = vc.u32 %v4059_v49, %v4053_v26  ;;  %v1936_v56 = vsub.s32 32, %v1935_v36 }
 0x2c0   :  { %v1507_v20 = vsel %vm1500_vm1, %v1503_v39, %v1506_v38  ;;  %v1790_v25 = vor.u32 %v1789_v50, %v1788_v0  ;;  %v1793_v22 = vshll.u32 %v1792_v47, 23  ;;  %v1671_v33 = vsel %vm1669_vm8, %v1670_v62, %v4054_v29 }
 0x2c1   :  { %v1508_v32 = vsel %vm1498_vm3, nan, %v1507_v20  ;;  %v1802_v11 = vsel %vm1717_vm4, %v1801_v5, %v3993_v15  ;;  %v1672_v60 = vadd.s32 %v1671_v33, %v1667_v2  ;;  %v1939_v10 = vshrl.u32 %v3048_v8, %v1936_v56 }
 0x2c2   :  { %2442 = vst [vmem:[#allocation7 + $0x30] sm:$0xff] %v1508_v32  ;;  %v1794_v18 = vor.u32 4788187, %v1793_v22  ;;  %v1934_v37 = vshrl.u32 %v1933_v19, 5  ;;  %v1938_v16 = vshll.u32 %v3047_v4, %v1935_v36  ;;  %v1942_v27 = vshrl.u32 %v4573_v6, %v1936_v56 }
 0x2c3   :  { %v1797_v1 = vcvt.s32.f32 %v1790_v25  ;;  %v1673_v61 = vadd.s32 536870912, %v1672_v60  ;;  %v1941_v30 = vshll.u32 %v3048_v8, %v1935_v36  ;;  %v1945_v63 = vshrl.u32 %v3050_v12, %v1936_v56 }
 0x2c4   :  { %v1795_v58 = vand.u32 2147483647, %v1794_v18  ;;  %v1944_v29 = vshll.u32 %v4573_v6, %v1935_v36  ;;  %v1947_v15 = vshll.u32 %v3050_v12, %v1935_v36  ;;  %v1948_v53 = vshrl.u32 %v3051_v21, %v1936_v56 }
 0x2c5   :  { %v4098_v51 = vshrl.u32 %v1673_v61, 30  ;;  %v1940_v59 = vor.u32 %v1939_v10, %v1938_v16  ;;  %v1943_v24 = vor.u32 %v1942_v27, %v1941_v30  ;;  %v1951_v19 = vshrl.u32 %v4574_v57, %v1936_v56  ;;  %v4140_v30 = vld [vmem:[%s4561_s3] ss:$0 sm:$0xff]  ;;  %s3053_s3 = smov [#allocation7]  }
 0x2c6   :  { %v1798_v54 = vmul.f32 %v1797_v1, %v1795_v58  ;;  %v1946_v44 = vor.u32 %v1945_v63, %v1944_v29  ;;  %v1949_v17 = vor.u32 %v1948_v53, %v1947_v15  ;;  %v1950_v9 = vshll.u32 %v3051_v21, %v1935_v36  ;;  %s2457_s22 = sshll.u32 %s3053_s3, 4  ;;  %s2458_s22 = int_to_ptr.vmem [resolvable:$true] %s2457_s22 }
 0x2c7   :  { %v1804_v7 = vsel %vm4072_vm7, 0, %v1802_v11  ;;  %v1675_v23 = vshll.u32 %v4098_v51, 30  ;;  %v1969_v5 = vshll.u32 %v1929_v28, 8  ;;  %vm1953_vm9 = vcmp.lt.s32.totalorder %v1934_v37, 1  ;;  %v4116_v28 = vld [vmem:[%s4560_s2] ss:$0 sm:$0xff]  ;;  %p3022_p3 = scmp.lt.s32.totalorder %s2458_s22, %s2458_s22 }
 0x2c8   :  { %v1799_v62 = vxor.u32 2147483648, %v1798_v54  ;;  %v1952_v38 = vor.u32 %v1951_v19, %v1950_v9  ;;  %vm1956_vm10 = vcmp.lt.s32.totalorder %v1934_v37, 4  ;;  %vm1955_vm11 = vcmp.lt.s32.totalorder %v1934_v37, 3  ;;  %s3017_s23 = scalar_lea.vmem %s2458_s22, 2048 }
 0x2c9   :  { %v4105_v0 = vsub.s32 %v1672_v60, %v1675_v23  ;;  %v1961_v50 = vsel %vm1953_vm9, %v1940_v59, %v1943_v24  ;;  %v1962_v47 = vsel %vm1956_vm10, %v1949_v17, 920167782  ;;  %v1937_v39 = vshrl.u32 %v3047_v4, %v1936_v56  ;;  %p3018_p2 = scmp.ne.s32.totalorder %s2458_s22, %s3017_s23  ;;  %p3023_p4 = scmp.lt.s32.totalorder %s3017_s23, %s3017_s23 }
 0x2ca   :  { %v1800_v36 = vsel %vm1717_vm4, %v1799_v62, %v1798_v54  ;;  %v1963_v2 = vsel %vm1955_vm11, %v1946_v44, %v1962_v47  ;;  %v759_v20 = vmul.f32 %v4116_v28, %v3862_v43  ;;  %vm1954_vm12 = vcmp.lt.s32.totalorder %v1934_v37, 2 }
 0x2cb   :  { %v1803_v25 = vsel %vm4072_vm7, %v3840_v35, %v1800_v36  ;;  %v1678_v22 = vsub.s32 0, %v4105_v0  ;;  %v1958_v33 = vsel %vm1956_vm10, %v1946_v44, 2102212464  ;;  %v1964_v56 = vsel %vm1954_vm12, %v1961_v50, %v1963_v2  ;;  %p3024_p5 = por %p3023_p4, %p3022_p3 }
 0x2cc   :  { %2937 = vcosq.f32 %v1803_v25  ;;  %v1965_v32 = vsel %vm1953_vm9, %v1943_v24, %v1946_v44  ;;  %v1966_v11 = vsel %vm1956_vm10, %v1952_v38, 1326507024  ;;  %v1957_v43 = vsel %vm1953_vm9, %v1937_v39, %v1940_v59 }
 0x2cd   :  { %2939 = vsinq.f32 %v1803_v25  ;;  %v2553_v60 = vmin.u32 %v1678_v22, %v4105_v0  ;;  %v1959_v41 = vsel %vm1955_vm11, %v1943_v24, %v1958_v33  ;;  %v1967_v10 = vsel %vm1955_vm11, %v1949_v17, %v1966_v11  ;;  %p3025_p6 = pnand %p3024_p5, %p3018_p2 }
 0x2ce   :  { %v4132_v18 = vmul.u32.u64.low %v1969_v5, %v1964_v56  ;;  %v4133_v16 = vmul.u32.u64.high %v1969_v5, %v1964_v56, %v4132_v18  ;;  %v1808_v27 = vand.u32 3, %v1804_v7  ;;  %v1968_v61 = vsel %vm1954_vm12, %v1965_v32, %v1967_v10 }
 0x2cf   :  { %v1680_v1 = vclz %v2553_v60  ;;  %v4143_v63 = vadd.f32 %v4140_v30, %v759_v20  ;;  %v4145_v58 = vmul.u32.u64.low %v1969_v5, %v1968_v61  ;;  %v4146_v29 = vmul.u32.u64.high %v1969_v5, %v1968_v61, %v4145_v58 }
 0x2d0   :  { %v2727_v15 = vadd.f32 %v3715_v55, %v3187_v31  ;;  %v4152_v53 = vadd.f32 %v3760_v46, %v3191_v34  ;;  %v1960_v24 = vsel %vm1954_vm12, %v1957_v43, %v1959_v41  ;;  %vm4158_vm13 = vcmp.le.f32.partialorder %v1612_v14, 0.7853982 }
 0x2d1   :  { %v2554_v59 = vadd.s32 4294967294, %v1680_v1  ;;  %v1821_v19 = vand.u32 2139095040, %v4143_v63  ;;  %vm1614_vm14 = vcmp.lt.s32.totalorder %v3902_v3, 0  ;;  %v1698_v44 = vsub.s32 4, %v4098_v51 }
 0x2d2   :  { %v1979_v31 = vadd.s32 1, %v4133_v16  ;;  %vm1807_vm15 = vweird.f32 %v3840_v35  ;;  %vm1809_vm0 = vcmp.lt.s32.totalorder %v1808_v27, 2  ;;  %vm1813_vm1 = vcmp.eq.s32.totalorder %v1808_v27, 2 }
 0x2d3   :  { %vm2555_vm2 = vcmp.lt.s32.totalorder %v2554_v59, 0  ;;  %v1822_v34 = vshrl.u32 %v1821_v19, 23  ;;  %v1976_v46 = vmul.u32 %v1969_v5, %v1960_v24  ;;  %vm1978_vm3 = vc.u32 %v4146_v29, %v4132_v18 }
 0x2d4   :  { %v1683_v55 = vsel %vm2555_vm2, 0, %v2554_v59  ;;  %v1818_v14 = vand.u32 2147483647, %v4143_v63  ;;  %v1668_v37 = vadd.s32 %v4053_v26, %v4059_v49  ;;  %v1980_v7 = vsel %vm1978_vm3, %v1979_v31, %v4133_v16 }
 0x2d5   :  { %v1684_v17 = vsub.s32 32, %v1683_v55  ;;  %v1688_v9 = vsub.s32 4294967266, %v1683_v55  ;;  %v1699_v62 = vsel %vm1614_vm14, %v1698_v44, %v4098_v51  ;;  %v1981_v38 = vadd.s32 %v1980_v7, %v1976_v46 }
 0x2d6   :  { %v2938_v23 = vpop.eup %2937  ;;  %v2560_v50 = vadd.s32 4294967169, %v1822_v34  ;;  %v762_v5 = vmul.f32 %v4116_v28, %v2727_v15  ;;  %v1685_v39 = vshll.u32 %v4105_v0, %v1683_v55  ;;  %v1825_v25 = vand.u32 8388607, %v1818_v14 }
 0x2d7   :  { %v2940_v47 = vpop.eup %2939  ;;  %v1814_v36 = vxor.u32 2147483648, %v2938_v23  ;;  %v1686_v2 = vshrl.u32 %v1668_v37, %v1684_v17  ;;  %v1689_v20 = vadd.s32 127, %v1688_v9  ;;  %v1982_v49 = vadd.s32 536870912, %v1981_v38 }
 0x2d8   :  { %v1811_v26 = vxor.u32 2147483648, %v2940_v47  ;;  %v1828_v22 = vadd.s32 1, %v2560_v50  ;;  %vm1810_vm4 = vcmp.eq.s32.totalorder %v1808_v27, 0  ;;  %v4183_v60 = vadd.f32 %v4140_v30, %v762_v5 }
 0x2d9   :  { %v1815_v33 = vsel %vm1813_vm1, %v1814_v36, %v2940_v47  ;;  %v1687_v51 = vor.u32 %v1686_v2, %v1685_v39  ;;  %v1690_v56 = vshll.u32 %v1689_v20, 23  ;;  %v4180_v11 = vshrl.u32 %v1982_v49, 30 }
 0x2da   :  { %v1812_v32 = vsel %vm1810_vm4, %v2938_v23, %v1811_v26  ;;  %vm1829_vm5 = vcmp.gt.s32.totalorder %v1828_v22, 0  ;;  %v1701_v41 = vsel %vm4158_vm13, 0, %v1699_v62  ;;  %v1826_v61 = vor.u32 8388608, %v1825_v25 }
 0x2db   :  { %v1816_v0 = vsel %vm1809_vm0, %v1812_v32, %v1815_v33  ;;  %v1691_v43 = vor.u32 4788187, %v1690_v56  ;;  %v1830_v10 = vsel %vm1829_vm5, %v1828_v22, 0  ;;  %v1984_v1 = vshll.u32 %v4180_v11, 30 }
 0x2dc   :  { %v1817_v16 = vsel %vm1807_vm15, nan, %v1816_v0  ;;  %v1694_v15 = vcvt.s32.f32 %v1687_v51  ;;  %v1832_v59 = vand.u32 31, %v1830_v10  ;;  %v4191_v24 = vand.u32 3, %v1701_v41 }
 0x2dd   :  { %2445 = vst [vmem:[#allocation7 + $0x48] sm:$0xff] %v1817_v16  ;;  %v1692_v58 = vand.u32 2147483647, %v1691_v43  ;;  %v4193_v19 = vsub.s32 %v1981_v38, %v1984_v1  ;;  %v2130_v27 = vand.u32 2139095040, %v4183_v60  ;;  %v1977_v31 = vadd.s32 %v4132_v18, %v4146_v29 }
 0x2de   :  { %v1833_v34 = vsub.s32 32, %v1832_v59  ;;  %v2127_v35 = vand.u32 2147483647, %v4183_v60  ;;  %v2007_v46 = vsub.s32 4, %v4180_v11  ;;  %v1835_v37 = vshll.u32 %v3047_v4, %v1832_v59 }
 0x2df   :  { %v1695_v44 = vmul.f32 %v1694_v15, %v1692_v58  ;;  %v1987_v55 = vsub.s32 0, %v4193_v19  ;;  %v4202_v17 = vshll.u32 %v1826_v61, 8  ;;  %v1838_v23 = vshll.u32 %v3048_v8, %v1832_v59 }
 0x2e0   :  { %v1836_v7 = vshrl.u32 %v3048_v8, %v1833_v34  ;;  %v1839_v62 = vshrl.u32 %v4573_v6, %v1833_v34  ;;  %v1831_v29 = vshrl.u32 %v1830_v10, 5  ;;  %v1841_v38 = vshll.u32 %v4573_v6, %v1832_v59 }
 0x2e1   :  { %v1696_v9 = vxor.u32 2147483648, %v1695_v44  ;;  %v2565_v18 = vmin.u32 %v1987_v55, %v4193_v19  ;;  %v2131_v50 = vshrl.u32 %v2130_v27, 23  ;;  %v1842_v39 = vshrl.u32 %v3050_v12, %v1833_v34 }
 0x2e2   :  { %v1837_v47 = vor.u32 %v1836_v7, %v1835_v37  ;;  %v1840_v36 = vor.u32 %v1839_v62, %v1838_v23  ;;  %v1844_v26 = vshll.u32 %v3050_v12, %v1832_v59  ;;  %v1845_v49 = vshrl.u32 %v3051_v21, %v1833_v34 }
 0x2e3   :  { %v1697_v5 = vsel %vm1614_vm14, %v1696_v9, %v1695_v44  ;;  %v1989_v20 = vclz %v2565_v18  ;;  %v1843_v25 = vor.u32 %v1842_v39, %v1841_v38  ;;  %v1847_v22 = vshll.u32 %v3051_v21, %v1832_v59 }
 0x2e4   :  { %v1700_v2 = vsel %vm4158_vm13, %v3902_v3, %v1697_v5  ;;  %v1848_v33 = vshrl.u32 %v4574_v57, %v1833_v34  ;;  %v1846_v56 = vor.u32 %v1845_v49, %v1844_v26  ;;  %vm1850_vm6 = vcmp.lt.s32.totalorder %v1831_v29, 1 }
 0x2e5   :  { %2941 = vcosq.f32 %v1700_v2  ;;  %v2566_v51 = vadd.s32 4294967294, %v1989_v20  ;;  %vm1923_vm7 = vcmp.lt.s32.totalorder %v3967_v13, 0  ;;  %v1834_v54 = vshrl.u32 %v3047_v4, %v1833_v34 }
 0x2e6   :  { %2943 = vsinq.f32 %v1700_v2  ;;  %v1849_v32 = vor.u32 %v1848_v33, %v1847_v22  ;;  %vm1852_vm8 = vcmp.lt.s32.totalorder %v1831_v29, 3  ;;  %vm1853_vm9 = vcmp.lt.s32.totalorder %v1831_v29, 4 }
 0x2e7   :  { %vm2567_vm10 = vcmp.lt.s32.totalorder %v2566_v51, 0  ;;  %v1855_v0 = vsel %vm1853_vm9, %v1843_v25, 2102212464  ;;  %v1858_v43 = vsel %vm1850_vm6, %v1837_v47, %v1840_v36  ;;  %v1859_v41 = vsel %vm1853_vm9, %v1846_v56, 920167782 }
 0x2e8   :  { %v1992_v10 = vsel %vm2567_vm10, 0, %v2566_v51  ;;  %v1860_v16 = vsel %vm1852_vm8, %v1843_v25, %v1859_v41  ;;  %v1862_v1 = vsel %vm1850_vm6, %v1840_v36, %v1843_v25  ;;  %v1863_v61 = vsel %vm1853_vm9, %v1849_v32, 1326507024 }
 0x2e9   :  { %vm1707_vm11 = vcmp.eq.s32.totalorder %v4191_v24, 0  ;;  %v1993_v58 = vsub.s32 32, %v1992_v10  ;;  %v1997_v15 = vsub.s32 4294967266, %v1992_v10  ;;  %vm1851_vm12 = vcmp.lt.s32.totalorder %v1831_v29, 2 }
 0x2ea   :  { %v1854_v59 = vsel %vm1850_vm6, %v1834_v54, %v1837_v47  ;;  %v1856_v27 = vsel %vm1852_vm8, %v1840_v36, %v1855_v0  ;;  %v1861_v44 = vsel %vm1851_vm12, %v1858_v43, %v1860_v16  ;;  %v1864_v34 = vsel %vm1852_vm8, %v1846_v56, %v1863_v61 }
 0x2eb   :  { %v2572_v55 = vadd.s32 4294967169, %v2131_v50  ;;  %vm1704_vm13 = vweird.f32 %v3902_v3  ;;  %v1994_v37 = vshll.u32 %v4193_v19, %v1992_v10  ;;  %v1995_v9 = vshrl.u32 %v1977_v31, %v1993_v58 }
 0x2ec   :  { %v1998_v7 = vadd.s32 127, %v1997_v15  ;;  %v1865_v23 = vsel %vm1851_vm12, %v1862_v1, %v1864_v34  ;;  %v4235_v38 = vmul.u32.u64.low %v4202_v17, %v1861_v44  ;;  %v4236_v5 = vmul.u32.u64.high %v4202_v17, %v1861_v44, %v4235_v38 }
 0x2ed   :  { %v4231_v62 = vmul.u32.u64.low %v4202_v17, %v1865_v23  ;;  %v4232_v18 = vmul.u32.u64.high %v4202_v17, %v1865_v23, %v4231_v62  ;;  %v1996_v47 = vor.u32 %v1995_v9, %v1994_v37  ;;  %v1857_v36 = vsel %vm1851_vm12, %v1854_v59, %v1856_v27 }
 0x2ee   :  { %v1999_v29 = vshll.u32 %v1998_v7, 23  ;;  %v2137_v50 = vadd.s32 1, %v2572_v55  ;;  %vm1710_vm14 = vcmp.eq.s32.totalorder %v4191_v24, 2  ;;  %v2134_v19 = vand.u32 8388607, %v2127_v35 }
 0x2ef   :  { %v2942_v39 = vpop.eup %2941  ;;  %v4244_v31 = vadd.f32 %v3870_v40, %v3199_v45  ;;  %v4248_v2 = vadd.f32 %v3949_v52, %v3202_v48  ;;  %v2008_v25 = vsel %vm1923_vm7, %v2007_v46, %v4180_v11  ;;  %v1873_v33 = vmul.u32 %v4202_v17, %v1857_v36 }
 0x2f0   :  { %v2944_v20 = vpop.eup %2943  ;;  %v1711_v26 = vxor.u32 2147483648, %v2942_v39  ;;  %v2000_v49 = vor.u32 4788187, %v1999_v29  ;;  %vm2138_vm15 = vcmp.gt.s32.totalorder %v2137_v50, 0  ;;  %vm1875_vm0 = vc.u32 %v4232_v18, %v4235_v38 }
 0x2f1   :  { %v1708_v22 = vxor.u32 2147483648, %v2944_v20  ;;  %v1876_v45 = vadd.s32 1, %v4236_v5  ;;  %v2003_v52 = vcvt.s32.f32 %v1996_v47  ;;  %v2139_v51 = vsel %vm2138_vm15, %v2137_v50, 0 }
 0x2f2   :  { %v1712_v48 = vsel %vm1710_vm14, %v1711_v26, %v2944_v20  ;;  %v2001_v40 = vand.u32 2147483647, %v2000_v49  ;;  %vm1706_vm1 = vcmp.lt.s32.totalorder %v4191_v24, 2  ;;  %v2141_v46 = vand.u32 31, %v2139_v51 }
 0x2f3   :  { %v1709_v56 = vsel %vm1707_vm11, %v2942_v39, %v1708_v22  ;;  %v1877_v11 = vsel %vm1875_vm0, %v1876_v45, %v4236_v5  ;;  %vm4265_vm2 = vcmp.le.f32.partialorder %v1921_v42, 0.7853982  ;;  %v761_v10 = vmul.f32 %v4116_v28, %v4152_v53 }
 0x2f4   :  { %v1713_v54 = vsel %vm1706_vm1, %v1709_v56, %v1712_v48  ;;  %v2004_v32 = vmul.f32 %v2003_v52, %v2001_v40  ;;  %v1878_v0 = vadd.s32 %v1877_v11, %v1873_v33  ;;  %v2010_v41 = vsel %vm4265_vm2, 0, %v2008_v25 }
 0x2f5   :  { %v1714_v43 = vsel %vm1704_vm13, nan, %v1713_v54  ;;  %v2142_v24 = vsub.s32 32, %v2141_v46  ;;  %v2135_v61 = vor.u32 8388608, %v2134_v19  ;;  %v4275_v42 = vshrl.u32 %v2139_v51, 5 }
 0x2f6   :  { %2444 = vst [vmem:[#allocation7 + $0x40] sm:$0xff] %v1714_v43  ;;  %v2005_v16 = vxor.u32 2147483648, %v2004_v32  ;;  %v1879_v1 = vadd.s32 536870912, %v1878_v0  ;;  %v2144_v58 = vshll.u32 %v3047_v4, %v2141_v46  ;;  %v2150_v53 = vshll.u32 %v4573_v6, %v2141_v46 }
 0x2f7   :  { %v2145_v15 = vshrl.u32 %v3048_v8, %v2142_v24  ;;  %v2148_v3 = vshrl.u32 %v4573_v6, %v2142_v24  ;;  %v2151_v59 = vshrl.u32 %v3050_v12, %v2142_v24  ;;  %v2154_v34 = vshrl.u32 %v3051_v21, %v2142_v24 }
 0x2f8   :  { %v2006_v27 = vsel %vm1923_vm7, %v2005_v16, %v2004_v32  ;;  %v1880_v44 = vshrl.u32 %v1879_v1, 30  ;;  %v2147_v37 = vshll.u32 %v3048_v8, %v2141_v46  ;;  %v2153_v9 = vshll.u32 %v3050_v12, %v2141_v46 }
 0x2f9   :  { %v2009_v55 = vsel %vm4265_vm2, %v3967_v13, %v2006_v27  ;;  %v2156_v7 = vshll.u32 %v3051_v21, %v2141_v46  ;;  %v2146_v62 = vor.u32 %v2145_v15, %v2144_v58  ;;  %v2152_v5 = vor.u32 %v2151_v59, %v2150_v53 }
 0x2fa   :  { %2945 = vcosq.f32 %v2009_v55  ;;  %v1881_v23 = vshll.u32 %v1880_v44, 30  ;;  %v2149_v47 = vor.u32 %v2148_v3, %v2147_v37  ;;  %v2155_v29 = vor.u32 %v2154_v34, %v2153_v9 }
 0x2fb   :  { %2947 = vsinq.f32 %v2009_v55  ;;  %v2157_v36 = vshrl.u32 %v4574_v57, %v2142_v24  ;;  %v2014_v50 = vand.u32 3, %v2010_v41  ;;  %vm1820_vm3 = vcmp.lt.s32.totalorder %v4143_v63, 0 }
 0x2fc   :  { %v4293_v39 = vsub.s32 %v1878_v0, %v1881_v23  ;;  %vm2162_vm4 = vcmp.lt.s32.totalorder %v4275_v42, 4  ;;  %v4296_v20 = vshll.u32 %v2135_v61, 8  ;;  %v4299_v26 = vadd.f32 %v4140_v30, %v761_v10 }
 0x2fd   :  { %v2158_v19 = vor.u32 %v2157_v36, %v2156_v7  ;;  %vm4303_vm5 = vcmp.le.f32.partialorder %v1818_v14, 0.7853982  ;;  %v2143_v22 = vshrl.u32 %v3047_v4, %v2142_v24  ;;  %vm2159_vm6 = vcmp.lt.s32.totalorder %v4275_v42, 1 }
 0x2fe   :  { %v1884_v25 = vsub.s32 0, %v4293_v39  ;;  %v2164_v33 = vsel %vm2162_vm4, %v2152_v5, 2102212464  ;;  %v2167_v45 = vsel %vm2159_vm6, %v2146_v62, %v2149_v47  ;;  %v2168_v48 = vsel %vm2162_vm4, %v2155_v29, 920167782 }
 0x2ff   :  { %v2171_v40 = vsel %vm2159_vm6, %v2149_v47, %v2152_v5  ;;  %v2172_v52 = vsel %vm2162_vm4, %v2158_v19, 1326507024  ;;  %v1904_v56 = vsub.s32 4, %v1880_v44  ;;  %vm2160_vm7 = vcmp.lt.s32.totalorder %v4275_v42, 2 }
 0x300   :  { %v2561_v51 = vmin.u32 %v1884_v25, %v4293_v39  ;;  %vm2161_vm8 = vcmp.lt.s32.totalorder %v4275_v42, 3  ;;  %vm2013_vm9 = vweird.f32 %v3967_v13  ;;  %v2163_v14 = vsel %vm2159_vm6, %v2143_v22, %v2146_v62 }
 0x301   :  { %v2165_v11 = vsel %vm2161_vm8, %v2149_v47, %v2164_v33  ;;  %v2169_v46 = vsel %vm2161_vm8, %v2152_v5, %v2168_v48  ;;  %v2173_v54 = vsel %vm2161_vm8, %v2155_v29, %v2172_v52  ;;  %v2027_v43 = vand.u32 2139095040, %v4299_v26 }
 0x302   :  { %v1886_v17 = vclz %v2561_v51  ;;  %v2170_v32 = vsel %vm2160_vm7, %v2167_v45, %v2169_v46  ;;  %v2174_v0 = vsel %vm2160_vm7, %v2171_v40, %v2173_v54  ;;  %vm2015_vm10 = vcmp.lt.s32.totalorder %v2014_v50, 2 }
 0x303   :  { %v4320_v41 = vmul.u32.u64.low %v4296_v20, %v2174_v0  ;;  %v4321_v24 = vmul.u32.u64.high %v4296_v20, %v2174_v0, %v4320_v41  ;;  %v4324_v10 = vmul.u32.u64.low %v4296_v20, %v2170_v32  ;;  %v4325_v16 = vmul.u32.u64.high %v4296_v20, %v2170_v32, %v4324_v10 }
 0x304   :  { %v2946_v1 = vpop.eup %2945  ;;  %v2562_v61 = vadd.s32 4294967294, %v1886_v17  ;;  %v1905_v58 = vsel %vm1820_vm3, %v1904_v56, %v1880_v44  ;;  %v2028_v15 = vshrl.u32 %v2027_v43, 23  ;;  %vm2016_vm11 = vcmp.eq.s32.totalorder %v2014_v50, 0 }
 0x305   :  { %v2948_v3 = vpop.eup %2947  ;;  %vm2019_vm12 = vcmp.eq.s32.totalorder %v2014_v50, 2  ;;  %v2020_v59 = vxor.u32 2147483648, %v2946_v1  ;;  %v1874_v27 = vadd.s32 %v4235_v38, %v4232_v18  ;;  %v2166_v34 = vsel %vm2160_vm7, %v2163_v14, %v2165_v11 }
 0x306   :  { %v2017_v53 = vxor.u32 2147483648, %v2948_v3  ;;  %vm2563_vm13 = vcmp.lt.s32.totalorder %v2562_v61, 0  ;;  %v2568_v55 = vadd.s32 4294967169, %v2028_v15  ;;  %v1907_v7 = vsel %vm4303_vm5, 0, %v1905_v58 }
 0x307   :  { %v2021_v37 = vsel %vm2019_vm12, %v2020_v59, %v2948_v3  ;;  %v1889_v9 = vsel %vm2563_vm13, 0, %v2562_v61  ;;  %v2024_v44 = vand.u32 2147483647, %v4299_v26  ;;  %vm2184_vm14 = vc.u32 %v4321_v24, %v4324_v10 }
 0x308   :  { %v2018_v23 = vsel %vm2016_vm11, %v2946_v1, %v2017_v53  ;;  %v1890_v62 = vsub.s32 32, %v1889_v9  ;;  %v1894_v5 = vsub.s32 4294967266, %v1889_v9  ;;  %v2182_v38 = vmul.u32 %v4296_v20, %v2166_v34 }
 0x309   :  { %v2022_v18 = vsel %vm2015_vm10, %v2018_v23, %v2021_v37  ;;  %v2185_v42 = vadd.s32 1, %v4325_v16  ;;  %v2034_v47 = vadd.s32 1, %v2568_v55  ;;  %v1891_v36 = vshll.u32 %v4293_v39, %v1889_v9 }
 0x30a   :  { %v2023_v29 = vsel %vm2013_vm9, nan, %v2022_v18  ;;  %v1892_v19 = vshrl.u32 %v1874_v27, %v1890_v62  ;;  %v1895_v25 = vadd.s32 127, %v1894_v5  ;;  %v2031_v33 = vand.u32 8388607, %v2024_v44 }
 0x30b   :  { %2447 = vst [vmem:[#allocation7 + $0x58] sm:$0xff] %v2023_v29  ;;  %v2186_v22 = vsel %vm2184_vm14, %v2185_v42, %v4325_v16  ;;  %vm2035_vm15 = vcmp.gt.s32.totalorder %v2034_v47, 0  ;;  %v764_v50 = vmul.f32 %v4116_v28, %v4244_v31  ;;  %v4350_v39 = vand.u32 3, %v1907_v7 }
 0x30c   :  { %v1893_v20 = vor.u32 %v1892_v19, %v1891_v36  ;;  %v1896_v45 = vshll.u32 %v1895_v25, 23  ;;  %v2187_v48 = vadd.s32 %v2186_v22, %v2182_v38  ;;  %v2036_v40 = vsel %vm2035_vm15, %v2034_v47, 0 }
 0x30d   :  { %v2038_v13 = vand.u32 31, %v2036_v40  ;;  %v2032_v56 = vor.u32 8388608, %v2031_v33  ;;  %v4355_v17 = vadd.f32 %v4140_v30, %v764_v50  ;;  %v2037_v58 = vshrl.u32 %v2036_v40, 5 }
 0x30e   :  { %v1897_v52 = vor.u32 4788187, %v1896_v45  ;;  %v2188_v51 = vadd.s32 536870912, %v2187_v48  ;;  %v1900_v46 = vcvt.s32.f32 %v1893_v20  ;;  %v763_v23 = vmul.f32 %v4116_v28, %v4248_v2 }
 0x30f   :  { %v2039_v14 = vsub.s32 32, %v2038_v13  ;;  %v2041_v31 = vshll.u32 %v3047_v4, %v2038_v13  ;;  %v2044_v1 = vshll.u32 %v3048_v8, %v2038_v13  ;;  %v2047_v15 = vshll.u32 %v4573_v6, %v2038_v13 }
 0x310   :  { %v1898_v11 = vand.u32 2147483647, %v1897_v52  ;;  %v4352_v54 = vshrl.u32 %v2188_v51, 30  ;;  %v2050_v3 = vshll.u32 %v3050_v12, %v2038_v13  ;;  %v2053_v7 = vshll.u32 %v3051_v21, %v2038_v13 }
 0x311   :  { %v2042_v32 = vshrl.u32 %v3048_v8, %v2039_v14  ;;  %v2045_v0 = vshrl.u32 %v4573_v6, %v2039_v14  ;;  %v2048_v43 = vshrl.u32 %v3050_v12, %v2039_v14  ;;  %v2051_v61 = vshrl.u32 %v3051_v21, %v2039_v14 }
 0x312   :  { %v1901_v41 = vmul.f32 %v1900_v46, %v1898_v11  ;;  %v2190_v16 = vshll.u32 %v4352_v54, 30  ;;  %v2054_v59 = vshrl.u32 %v4574_v57, %v2039_v14  ;;  %v2072_v18 = vshll.u32 %v2032_v56, 8 }
 0x313   :  { %v2043_v34 = vor.u32 %v2042_v32, %v2041_v31  ;;  %v2046_v55 = vor.u32 %v2045_v0, %v2044_v1  ;;  %v2049_v37 = vor.u32 %v2048_v43, %v2047_v15  ;;  %v2052_v9 = vor.u32 %v2051_v61, %v2050_v3 }
 0x314   :  { %v1902_v27 = vxor.u32 2147483648, %v1901_v41  ;;  %v4367_v53 = vsub.s32 %v2187_v48, %v2190_v16  ;;  %v2336_v38 = vand.u32 2139095040, %v4355_v17  ;;  %v2040_v47 = vshrl.u32 %v3047_v4, %v2039_v14 }
 0x315   :  { %v2055_v29 = vor.u32 %v2054_v59, %v2053_v7  ;;  %vm2056_vm0 = vcmp.lt.s32.totalorder %v2037_v58, 1  ;;  %vm2059_vm1 = vcmp.lt.s32.totalorder %v2037_v58, 4  ;;  %vm2058_vm2 = vcmp.lt.s32.totalorder %v2037_v58, 3 }
 0x316   :  { %v1903_v62 = vsel %vm1820_vm3, %v1902_v27, %v1901_v41  ;;  %v2193_v5 = vsub.s32 0, %v4367_v53  ;;  %v2064_v28 = vsel %vm2056_vm0, %v2043_v34, %v2046_v55  ;;  %v2061_v2 = vsel %vm2059_vm1, %v2049_v37, 2102212464 }
 0x317   :  { %v1906_v42 = vsel %vm4303_vm5, %v4143_v63, %v1903_v62  ;;  %v2065_v19 = vsel %vm2059_vm1, %v2052_v9, 920167782  ;;  %vm2057_vm3 = vcmp.lt.s32.totalorder %v2037_v58, 2  ;;  %v2068_v33 = vsel %vm2056_vm0, %v2046_v55, %v2049_v37 }
 0x318   :  { %2949 = vcosq.f32 %v1906_v42  ;;  %v2573_v36 = vmin.u32 %v2193_v5, %v4367_v53  ;;  %v2066_v22 = vsel %vm2058_vm2, %v2049_v37, %v2065_v19  ;;  %v2060_v50 = vsel %vm2056_vm0, %v2040_v47, %v2043_v34 }
 0x319   :  { %2951 = vsinq.f32 %v1906_v42  ;;  %v2062_v49 = vsel %vm2058_vm2, %v2046_v55, %v2061_v2  ;;  %v2067_v20 = vsel %vm2057_vm3, %v2064_v28, %v2066_v22  ;;  %v2069_v45 = vsel %vm2059_vm1, %v2055_v29, 1326507024 }
 0x31a   :  { %v2195_v25 = vclz %v2573_v36  ;;  %v2070_v40 = vsel %vm2058_vm2, %v2052_v9, %v2069_v45  ;;  %v4381_v13 = vmul.u32.u64.low %v2072_v18, %v2067_v20  ;;  %v4382_v52 = vmul.u32.u64.high %v2072_v18, %v2067_v20, %v4381_v13 }
 0x31b   :  { %vm2129_vm4 = vcmp.lt.s32.totalorder %v4183_v60, 0  ;;  %v2071_v51 = vsel %vm2057_vm3, %v2068_v33, %v2070_v40  ;;  %v2337_v56 = vshrl.u32 %v2336_v38, 23  ;;  %vm1912_vm5 = vcmp.lt.s32.totalorder %v4350_v39, 2 }
 0x31c   :  { %v2574_v48 = vadd.s32 4294967294, %v2195_v25  ;;  %v2063_v14 = vsel %vm2057_vm3, %v2060_v50, %v2062_v49  ;;  %v4387_v11 = vmul.u32.u64.low %v2072_v18, %v2071_v51  ;;  %v4388_v46 = vmul.u32.u64.high %v2072_v18, %v2071_v51, %v4387_v11 }
 0x31d   :  { %vm1913_vm7 = vcmp.eq.s32.totalorder %v4350_v39, 0  ;;  %v2183_v31 = vadd.s32 %v4324_v10, %v4321_v24  ;;  %v2580_v0 = vadd.s32 4294967169, %v2337_v56  ;;  %v2082_v16 = vadd.s32 1, %v4382_v52 }
 0x31e   :  { %vm2575_vm6 = vcmp.lt.s32.totalorder %v2574_v48, 0  ;;  %v4395_v1 = vadd.f32 %v4140_v30, %v763_v23  ;;  %v2213_v61 = vsub.s32 4, %v4352_v54  ;;  %v2079_v58 = vmul.u32 %v2072_v18, %v2063_v14 }
 0x31f   :  { %v2198_v32 = vsel %vm2575_vm6, 0, %v2574_v48  ;;  %v2333_v15 = vand.u32 2147483647, %v4355_v17  ;;  %v2343_v3 = vadd.s32 1, %v2580_v0  ;;  %vm2081_vm8 = vc.u32 %v4388_v46, %v4381_v13 }
 0x320   :  { %v2199_v43 = vsub.s32 32, %v2198_v32  ;;  %v2203_v41 = vsub.s32 4294967266, %v2198_v32  ;;  %v2200_v27 = vshll.u32 %v4367_v53, %v2198_v32  ;;  %vm1916_vm9 = vcmp.eq.s32.totalorder %v4350_v39, 2 }
 0x321   :  { %v2083_v30 = vsel %vm2081_vm8, %v2082_v16, %v4382_v52  ;;  %vm2344_vm10 = vcmp.gt.s32.totalorder %v2343_v3, 0  ;;  %v2214_v53 = vsel %vm2129_vm4, %v2213_v61, %v4352_v54  ;;  %v2340_v5 = vand.u32 8388607, %v2333_v15 }
 0x322   :  { %v2950_v59 = vpop.eup %2949  ;;  %v2201_v34 = vshrl.u32 %v2183_v31, %v2199_v43  ;;  %v2204_v24 = vadd.s32 127, %v2203_v41  ;;  %v2084_v23 = vadd.s32 %v2083_v30, %v2079_v58  ;;  %v2345_v18 = vsel %vm2344_vm10, %v2343_v3, 0 }
 0x323   :  { %v2952_v10 = vpop.eup %2951  ;;  %v1917_v55 = vxor.u32 2147483648, %v2950_v59  ;;  %v2233_v29 = vand.u32 2139095040, %v4395_v1  ;;  %vm1910_vm11 = vweird.f32 %v4143_v63  ;;  %vm4417_vm12 = vcmp.le.f32.partialorder %v2127_v35, 0.7853982 }
 0x324   :  { %v1914_v37 = vxor.u32 2147483648, %v2952_v10  ;;  %v2202_v9 = vor.u32 %v2201_v34, %v2200_v27  ;;  %v2205_v7 = vshll.u32 %v2204_v24, 23  ;;  %v2085_v47 = vadd.s32 536870912, %v2084_v23 }
 0x325   :  { %v1918_v62 = vsel %vm1916_vm9, %v1917_v55, %v2952_v10  ;;  %v2347_v28 = vand.u32 31, %v2345_v18  ;;  %v2216_v33 = vsel %vm4417_vm12, 0, %v2214_v53  ;;  %v2341_v63 = vor.u32 8388608, %v2340_v5 }
 0x326   :  { %v1915_v38 = vsel %vm1913_vm7, %v2950_v59, %v1914_v37  ;;  %v2206_v42 = vor.u32 4788187, %v2205_v7  ;;  %v2209_v25 = vcvt.s32.f32 %v2202_v9  ;;  %v4421_v22 = vshrl.u32 %v2085_v47, 30 }
 0x327   :  { %v1919_v36 = vsel %vm1912_vm5, %v1915_v38, %v1918_v62  ;;  %v2348_v50 = vsub.s32 32, %v2347_v28  ;;  %v2350_v35 = vshll.u32 %v3047_v4, %v2347_v28  ;;  %v2234_v20 = vshrl.u32 %v2233_v29, 23 }
 0x328   :  { %v1920_v2 = vsel %vm1910_vm11, nan, %v1919_v36  ;;  %v2207_v19 = vand.u32 2147483647, %v2206_v42  ;;  %v2087_v49 = vshll.u32 %v4421_v22, 30  ;;  %v2353_v48 = vshll.u32 %v3048_v8, %v2347_v28 }
 0x329   :  { %2446 = vst [vmem:[#allocation7 + $0x50] sm:$0xff] %v1920_v2  ;;  %v2351_v45 = vshrl.u32 %v3048_v8, %v2348_v50  ;;  %v2354_v40 = vshrl.u32 %v4573_v6, %v2348_v50  ;;  %v2357_v52 = vshrl.u32 %v3050_v12, %v2348_v50  ;;  %v2356_v14 = vshll.u32 %v4573_v6, %v2347_v28 }
 0x32a   :  { %v2210_v39 = vmul.f32 %v2209_v25, %v2207_v19  ;;  %v4431_v56 = vsub.s32 %v2084_v23, %v2087_v49  ;;  %v2360_v11 = vshrl.u32 %v3051_v21, %v2348_v50  ;;  %v4435_v31 = vand.u32 3, %v2216_v33 }
 0x32b   :  { %v2346_v32 = vshrl.u32 %v2345_v18, 5  ;;  %v2352_v0 = vor.u32 %v2351_v45, %v2350_v35  ;;  %v2359_v43 = vshll.u32 %v3050_v12, %v2347_v28  ;;  %v2355_v61 = vor.u32 %v2354_v40, %v2353_v48 }
 0x32c   :  { %v2211_v51 = vxor.u32 2147483648, %v2210_v39  ;;  %v2090_v16 = vsub.s32 0, %v4431_v56  ;;  %v2358_v58 = vor.u32 %v2357_v52, %v2356_v14  ;;  %v2362_v27 = vshll.u32 %v3051_v21, %v2347_v28 }
 0x32d   :  { %v2361_v59 = vor.u32 %v2360_v11, %v2359_v43  ;;  %v2363_v34 = vshrl.u32 %v4574_v57, %v2348_v50  ;;  %v2381_v10 = vshll.u32 %v2341_v63, 8  ;;  %v2576_v55 = vadd.s32 4294967169, %v2234_v20 }
 0x32e   :  { %v2212_v41 = vsel %vm2129_vm4, %v2211_v51, %v2210_v39  ;;  %v2569_v24 = vmin.u32 %v2090_v16, %v4431_v56  ;;  %v2349_v30 = vshrl.u32 %v3047_v4, %v2348_v50  ;;  %vm2365_vm13 = vcmp.lt.s32.totalorder %v2346_v32, 1 }
 0x32f   :  { %v2215_v3 = vsel %vm4417_vm12, %v4183_v60, %v2212_v41  ;;  %v2364_v37 = vor.u32 %v2363_v34, %v2362_v27  ;;  %vm2366_vm14 = vcmp.lt.s32.totalorder %v2346_v32, 2  ;;  %vm2367_vm15 = vcmp.lt.s32.totalorder %v2346_v32, 3 }
 0x330   :  { %2953 = vcosq.f32 %v2215_v3  ;;  %v2092_v9 = vclz %v2569_v24  ;;  %vm2368_vm0 = vcmp.lt.s32.totalorder %v2346_v32, 4  ;;  %v2373_v23 = vsel %vm2365_vm13, %v2352_v0, %v2355_v61 }
 0x331   :  { %2955 = vsinq.f32 %v2215_v3  ;;  %v2370_v7 = vsel %vm2368_vm0, %v2358_v58, 2102212464  ;;  %v2374_v62 = vsel %vm2368_vm0, %v2361_v59, 920167782  ;;  %v2377_v53 = vsel %vm2365_vm13, %v2355_v61, %v2358_v58 }
 0x332   :  { %v2570_v5 = vadd.s32 4294967294, %v2092_v9  ;;  %v2369_v18 = vsel %vm2365_vm13, %v2349_v30, %v2352_v0  ;;  %v2375_v38 = vsel %vm2367_vm15, %v2358_v58, %v2374_v62  ;;  %v2378_v42 = vsel %vm2368_vm0, %v2364_v37, 1326507024 }
 0x333   :  { %v2371_v47 = vsel %vm2367_vm15, %v2355_v61, %v2370_v7  ;;  %v2376_v29 = vsel %vm2366_vm14, %v2373_v23, %v2375_v38  ;;  %v2379_v36 = vsel %vm2367_vm15, %v2361_v59, %v2378_v42  ;;  %v2240_v54 = vadd.s32 1, %v2576_v55 }
 0x334   :  { %vm2571_vm1 = vcmp.lt.s32.totalorder %v2570_v5, 0  ;;  %v2380_v28 = vsel %vm2366_vm14, %v2377_v53, %v2379_v36  ;;  %v4450_v2 = vmul.u32.u64.low %v2381_v10, %v2376_v29  ;;  %v4451_v19 = vmul.u32.u64.high %v2381_v10, %v2376_v29, %v4450_v2 }
 0x335   :  { %v2080_v25 = vadd.s32 %v4381_v13, %v4388_v46  ;;  %v2095_v33 = vsel %vm2571_vm1, 0, %v2570_v5  ;;  %v4456_v63 = vmul.u32.u64.low %v2381_v10, %v2380_v28  ;;  %v4457_v50 = vmul.u32.u64.high %v2381_v10, %v2380_v28, %v4456_v63 }
 0x336   :  { %v2096_v39 = vsub.s32 32, %v2095_v33  ;;  %v2100_v49 = vsub.s32 4294967266, %v2095_v33  ;;  %v2372_v35 = vsel %vm2366_vm14, %v2369_v18, %v2371_v47  ;;  %vm2241_vm2 = vcmp.gt.s32.totalorder %v2240_v54, 0 }
 0x337   :  { %vm2219_vm3 = vweird.f32 %v4183_v60  ;;  %vm2225_vm4 = vcmp.eq.s32.totalorder %v4435_v31, 2  ;;  %v2230_v20 = vand.u32 2147483647, %v4395_v1  ;;  %v2242_v45 = vsel %vm2241_vm2, %v2240_v54, 0 }
 0x338   :  { %v2097_v40 = vshll.u32 %v4431_v56, %v2095_v33  ;;  %v2098_v13 = vshrl.u32 %v2080_v25, %v2096_v39  ;;  %v2101_v46 = vadd.s32 127, %v2100_v49  ;;  %v2391_v52 = vadd.s32 1, %v4451_v19 }
 0x339   :  { %v2388_v11 = vmul.u32 %v2381_v10, %v2372_v35  ;;  %vm2390_vm5 = vc.u32 %v4457_v50, %v4450_v2  ;;  %v2244_v32 = vand.u32 31, %v2242_v45  ;;  %vm2222_vm6 = vcmp.eq.s32.totalorder %v4435_v31, 0 }
 0x33a   :  { %v2954_v48 = vpop.eup %2953  ;;  %v2099_v43 = vor.u32 %v2098_v13, %v2097_v40  ;;  %v2102_v41 = vshll.u32 %v2101_v46, 23  ;;  %v2392_v16 = vsel %vm2390_vm5, %v2391_v52, %v4451_v19  ;;  %vm2221_vm7 = vcmp.lt.s32.totalorder %v4435_v31, 2 }
 0x33b   :  { %v2956_v51 = vpop.eup %2955  ;;  %v2226_v14 = vxor.u32 2147483648, %v2954_v48  ;;  %v2393_v61 = vadd.s32 %v2392_v16, %v2388_v11  ;;  %v2245_v58 = vsub.s32 32, %v2244_v32  ;;  %v2237_v27 = vand.u32 8388607, %v2230_v20 }
 0x33c   :  { %v2223_v0 = vxor.u32 2147483648, %v2956_v51  ;;  %v2103_v59 = vor.u32 4788187, %v2102_v41  ;;  %v2106_v24 = vcvt.s32.f32 %v2099_v43  ;;  %v2110_v10 = vsub.s32 4, %v4421_v22 }
 0x33d   :  { %v2227_v56 = vsel %vm2225_vm4, %v2226_v14, %v2956_v51  ;;  %v2394_v55 = vadd.s32 536870912, %v2393_v61  ;;  %v2248_v9 = vshrl.u32 %v3048_v8, %v2245_v58  ;;  %v2251_v7 = vshrl.u32 %v4573_v6, %v2245_v58 }
 0x33e   :  { %v2224_v3 = vsel %vm2222_vm6, %v2954_v48, %v2223_v0  ;;  %v2104_v37 = vand.u32 2147483647, %v2103_v59  ;;  %v2243_v23 = vshrl.u32 %v2242_v45, 5  ;;  %v2247_v62 = vshll.u32 %v3047_v4, %v2244_v32 }
 0x33f   :  { %v2228_v34 = vsel %vm2221_vm7, %v2224_v3, %v2227_v56  ;;  %v4479_v31 = vshrl.u32 %v2394_v55, 30  ;;  %v2254_v53 = vshrl.u32 %v3050_v12, %v2245_v58  ;;  %v2250_v18 = vshll.u32 %v3048_v8, %v2244_v32 }
 0x340   :  { %v2229_v30 = vsel %vm2219_vm3, nan, %v2228_v34  ;;  %v2107_v5 = vmul.f32 %v2106_v24, %v2104_v37  ;;  %v2256_v38 = vshll.u32 %v3050_v12, %v2244_v32  ;;  %v2257_v60 = vshrl.u32 %v3051_v21, %v2245_v58 }
 0x341   :  { %2449 = vst [vmem:[#allocation7 + $0x68] sm:$0xff] %v2229_v30  ;;  %vm4488_vm8 = vcmp.le.f32.partialorder %v2024_v44, 0.7853982  ;;  %v2396_v47 = vshll.u32 %v4479_v31, 30  ;;  %v2253_v29 = vshll.u32 %v4573_v6, %v2244_v32  ;;  %v2260_v36 = vshrl.u32 %v4574_v57, %v2245_v58 }
 0x342   :  { %v2108_v54 = vxor.u32 2147483648, %v2107_v5  ;;  %v2249_v28 = vor.u32 %v2248_v9, %v2247_v62  ;;  %v2252_v19 = vor.u32 %v2251_v7, %v2250_v18  ;;  %v2258_v8 = vor.u32 %v2257_v60, %v2256_v38 }
 0x343   :  { %vm2026_vm9 = vcmp.lt.s32.totalorder %v4299_v26, 0  ;;  %v2397_v12 = vsub.s32 %v2393_v61, %v2396_v47  ;;  %v2255_v25 = vor.u32 %v2254_v53, %v2253_v29  ;;  %v2259_v33 = vshll.u32 %v3051_v21, %v2244_v32 }
 0x344   :  { %v2109_v44 = vsel %vm2026_vm9, %v2108_v54, %v2107_v5  ;;  %v2111_v63 = vsel %vm2026_vm9, %v2110_v10, %v4421_v22  ;;  %v2238_v39 = vor.u32 8388608, %v2237_v27  ;;  %vm2262_vm10 = vcmp.lt.s32.totalorder %v2243_v23, 1 }
 0x345   :  { %v2112_v6 = vsel %vm4488_vm8, %v4299_v26, %v2109_v44  ;;  %v2399_v57 = vsub.s32 0, %v2397_v12  ;;  %v2261_v49 = vor.u32 %v2260_v36, %v2259_v33  ;;  %vm2265_vm11 = vcmp.lt.s32.totalorder %v2243_v23, 4 }
 0x346   :  { %2957 = vcosq.f32 %v2112_v6  ;;  %v2246_v35 = vshrl.u32 %v3047_v4, %v2245_v58  ;;  %v2270_v45 = vsel %vm2262_vm10, %v2249_v28, %v2252_v19  ;;  %v2271_v48 = vsel %vm2265_vm11, %v2258_v8, 920167782 }
 0x347   :  { %2959 = vsinq.f32 %v2112_v6  ;;  %v2581_v21 = vmin.u32 %v2399_v57, %v2397_v12  ;;  %vm2264_vm12 = vcmp.lt.s32.totalorder %v2243_v23, 3  ;;  %v2267_v22 = vsel %vm2265_vm11, %v2255_v25, 2102212464 }
 0x348   :  { %vm2263_vm13 = vcmp.lt.s32.totalorder %v2243_v23, 2  ;;  %v2272_v40 = vsel %vm2264_vm12, %v2255_v25, %v2271_v48  ;;  %v2274_v13 = vsel %vm2262_vm10, %v2252_v19, %v2255_v25  ;;  %v2278_v46 = vshll.u32 %v2238_v39, 8 }
 0x349   :  { %v2401_v52 = vclz %v2581_v21  ;;  %v2266_v51 = vsel %vm2262_vm10, %v2246_v35, %v2249_v28  ;;  %v2273_v14 = vsel %vm2263_vm13, %v2270_v45, %v2272_v40  ;;  %v2275_v4 = vsel %vm2265_vm11, %v2261_v49, 1326507024 }
 0x34a   :  { %v2268_v11 = vsel %vm2264_vm12, %v2252_v19, %v2267_v22  ;;  %v2276_v32 = vsel %vm2264_vm12, %v2258_v8, %v2275_v4  ;;  %v4509_v0 = vmul.u32.u64.low %v2278_v46, %v2273_v14  ;;  %v4510_v43 = vmul.u32.u64.high %v2278_v46, %v2273_v14, %v4509_v0 }
 0x34b   :  { %v2113_v41 = vsel %vm4488_vm8, 0, %v2111_v63  ;;  %v2582_v16 = vadd.s32 4294967294, %v2401_v52  ;;  %v2277_v56 = vsel %vm2263_vm13, %v2274_v13, %v2276_v32  ;;  %v2269_v3 = vsel %vm2263_vm13, %v2266_v51, %v2268_v11 }
 0x34c   :  { %v4515_v61 = vmul.u32.u64.low %v2278_v46, %v2277_v56  ;;  %v4516_v58 = vmul.u32.u64.high %v2278_v46, %v2277_v56, %v4515_v61  ;;  %v2117_v59 = vand.u32 3, %v2113_v41  ;;  %v2288_v34 = vadd.s32 1, %v4510_v43 }
 0x34d   :  { %vm2583_vm14 = vcmp.lt.s32.totalorder %v2582_v16, 0  ;;  %v2389_v24 = vadd.s32 %v4450_v2, %v4457_v50  ;;  %v2285_v9 = vmul.u32 %v2278_v46, %v2269_v3  ;;  %vm2116_vm3 = vweird.f32 %v4299_v26 }
 0x34e   :  { %v2404_v27 = vsel %vm2583_vm14, 0, %v2582_v16  ;;  %vm2287_vm15 = vc.u32 %v4516_v58, %v4509_v0  ;;  %vm2122_vm0 = vcmp.eq.s32.totalorder %v2117_v59, 2  ;;  %vm2119_vm1 = vcmp.eq.s32.totalorder %v2117_v59, 0 }
 0x34f   :  { %v2405_v10 = vsub.s32 32, %v2404_v27  ;;  %v2409_v55 = vsub.s32 4294967266, %v2404_v27  ;;  %v2406_v37 = vshll.u32 %v2397_v12, %v2404_v27  ;;  %v2289_v23 = vsel %vm2287_vm15, %v2288_v34, %v4510_v43 }
 0x350   :  { %v2958_v30 = vpop.eup %2957  ;;  %v2290_v38 = vadd.s32 %v2289_v23, %v2285_v9  ;;  %vm2118_vm2 = vcmp.lt.s32.totalorder %v2117_v59, 2  ;;  %vm2335_vm4 = vcmp.lt.s32.totalorder %v4355_v17, 0  ;;  %vm4528_vm5 = vcmp.le.f32.partialorder %v2333_v15, 0.7853982 }
 0x351   :  { %v2960_v7 = vpop.eup %2959  ;;  %v2123_v62 = vxor.u32 2147483648, %v2958_v30  ;;  %v2407_v53 = vshrl.u32 %v2389_v24, %v2405_v10  ;;  %v2410_v5 = vadd.s32 127, %v2409_v55  ;;  %v2419_v6 = vsub.s32 4, %v4479_v31 }
 0x352   :  { %v2120_v18 = vxor.u32 2147483648, %v2960_v7  ;;  %v2291_v47 = vadd.s32 536870912, %v2290_v38  ;;  %v2286_v22 = vadd.s32 %v4509_v0, %v4516_v58  ;;  %vm2425_vm10 = vweird.f32 %v4355_v17 }
 0x353   :  { %v2124_v60 = vsel %vm2122_vm0, %v2123_v62, %v2960_v7  ;;  %v2408_v42 = vor.u32 %v2407_v53, %v2406_v37  ;;  %v2411_v2 = vshll.u32 %v2410_v5, 23  ;;  %v2420_v45 = vsel %vm2335_vm4, %v2419_v6, %v4479_v31 }
 0x354   :  { %v2121_v50 = vsel %vm2119_vm1, %v2958_v30, %v2120_v18  ;;  %v2292_v28 = vshrl.u32 %v2291_v47, 30  ;;  %v2422_v15 = vsel %vm4528_vm5, 0, %v2420_v45  ;;  %vm2232_vm11 = vcmp.lt.s32.totalorder %v4395_v1, 0 }
 0x355   :  { %v2125_v29 = vsel %vm2118_vm2, %v2121_v50, %v2124_v60  ;;  %v2412_v36 = vor.u32 4788187, %v2411_v2  ;;  %v2415_v8 = vcvt.s32.f32 %v2408_v42  ;;  %v2426_v46 = vand.u32 3, %v2422_v15 }
 0x356   :  { %v2126_v54 = vsel %vm2116_vm3, nan, %v2125_v29  ;;  %v2293_v12 = vshll.u32 %v2292_v28, 30  ;;  %vm2231_vm12 = vcmp.le.f32.partialorder %v2230_v20, 0.7853982  ;;  %v2316_v10 = vsub.s32 4, %v2292_v28 }
 0x357   :  { %2448 = vst [vmem:[#allocation7 + $0x60] sm:$0xff] %v2126_v54  ;;  %v2413_v19 = vand.u32 2147483647, %v2412_v36  ;;  %vm2431_vm7 = vcmp.eq.s32.totalorder %v2426_v46, 2  ;;  %vm2428_vm8 = vcmp.eq.s32.totalorder %v2426_v46, 0  ;;  %vm2427_vm9 = vcmp.lt.s32.totalorder %v2426_v46, 2 }
 0x358   :  { %v2294_v33 = vsub.s32 %v2290_v38, %v2293_v12  ;;  %v2317_v30 = vsel %vm2232_vm11, %v2316_v10, %v2292_v28  ;;  %vm2322_vm0 = vweird.f32 %v4395_v1 }
 0x359   :  { %v2416_v25 = vmul.f32 %v2415_v8, %v2413_v19 }
 0x35a   :  { %v2296_v63 = vsub.s32 0, %v2294_v33 }
 0x35b   :  { %v2417_v44 = vxor.u32 2147483648, %v2416_v25 }
 0x35c   :  { %v2577_v49 = vmin.u32 %v2296_v63, %v2294_v33 }
 0x35d   :  { %v2418_v26 = vsel %vm2335_vm4, %v2417_v44, %v2416_v25 }
 0x35e   :  { %v2421_v57 = vsel %vm4528_vm5, %v4355_v17, %v2418_v26  ;;  %v2298_v35 = vclz %v2577_v49  ;;  %v2319_v17 = vsel %vm2231_vm12, 0, %v2317_v30 }
 0x35f   :  { %2961 = vcosq.f32 %v2421_v57  ;;  %v2323_v37 = vand.u32 3, %v2319_v17 }
 0x360   :  { %2963 = vsinq.f32 %v2421_v57  ;;  %v2578_v48 = vadd.s32 4294967294, %v2298_v35 }
 0x361   :  { %vm2328_vm13 = vcmp.eq.s32.totalorder %v2323_v37, 2  ;;  %vm2325_vm14 = vcmp.eq.s32.totalorder %v2323_v37, 0  ;;  %vm2324_vm15 = vcmp.lt.s32.totalorder %v2323_v37, 2 }
 0x362   :  { %vm2579_vm6 = vcmp.lt.s32.totalorder %v2578_v48, 0 }
 0x363   :  { %v2301_v21 = vsel %vm2579_vm6, 0, %v2578_v48 }
 0x364   :  { %v2302_v40 = vsub.s32 32, %v2301_v21  ;;  %v2306_v13 = vsub.s32 4294967266, %v2301_v21  ;;  %v2303_v52 = vshll.u32 %v2294_v33, %v2301_v21 }
 0x366   :  { %v2304_v51 = vshrl.u32 %v2286_v22, %v2302_v40  ;;  %v2307_v14 = vadd.s32 127, %v2306_v13 }
 0x368   :  { %v2305_v43 = vor.u32 %v2304_v51, %v2303_v52  ;;  %v2308_v41 = vshll.u32 %v2307_v14, 23 }
 0x369   :  { %v2962_v4 = vpop.eup %2961 }
 0x36a   :  { %v2964_v11 = vpop.eup %2963  ;;  %v2432_v32 = vxor.u32 2147483648, %v2962_v4  ;;  %v2309_v56 = vor.u32 4788187, %v2308_v41  ;;  %v2312_v3 = vcvt.s32.f32 %v2305_v43 }
 0x36b   :  { %v2429_v31 = vxor.u32 2147483648, %v2964_v11 }
 0x36c   :  { %v2433_v16 = vsel %vm2431_vm7, %v2432_v32, %v2964_v11  ;;  %v2310_v58 = vand.u32 2147483647, %v2309_v56 }
 0x36d   :  { %v2430_v61 = vsel %vm2428_vm8, %v2962_v4, %v2429_v31 }
 0x36e   :  { %v2434_v0 = vsel %vm2427_vm9, %v2430_v61, %v2433_v16  ;;  %v2313_v27 = vmul.f32 %v2312_v3, %v2310_v58 }
 0x36f   :  { %v2435_v59 = vsel %vm2425_vm10, nan, %v2434_v0 }
 0x370   :  { %2451 = vst [vmem:[#allocation7 + $0x78] sm:$0xff] %v2435_v59  ;;  %v2314_v34 = vxor.u32 2147483648, %v2313_v27 }
 0x372   :  { %v2315_v24 = vsel %vm2232_vm11, %v2314_v34, %v2313_v27 }
 0x373   :  { %v2318_v55 = vsel %vm2231_vm12, %v4395_v1, %v2315_v24 }
 0x374   :  { %2965 = vcosq.f32 %v2318_v55 }
 0x375   :  { %2967 = vsinq.f32 %v2318_v55 }
 0x37e   :  { %v2966_v9 = vpop.eup %2965 }
 0x37f   :  { %v2968_v7 = vpop.eup %2967  ;;  %v2329_v62 = vxor.u32 2147483648, %v2966_v9 }
 0x380   :  { %v2326_v53 = vxor.u32 2147483648, %v2968_v7 }
 0x381   :  { %v2330_v5 = vsel %vm2328_vm13, %v2329_v62, %v2968_v7 }
 0x382   :  { %v2327_v20 = vsel %vm2325_vm14, %v2966_v9, %v2326_v53 }
 0x383   :  { %v2331_v23 = vsel %vm2324_vm15, %v2327_v20, %v2330_v5 }
 0x384   :  { %v2332_v18 = vsel %vm2322_vm0, nan, %v2331_v23 }
 0x385   :  { %2450 = vst [vmem:[#allocation7 + $0x70] sm:$0xff] %v2332_v18 }
 0x386   :  { %3028 = shalt.err (!%p3025_p6)
}
 0x387   :  { %s3029_s26 = scalar_lea.hbm %s4562_s4, 2048 }
 0x388   :  { %p3030_p7 = scmp.ne.s32.totalorder %s4562_s4, %s3029_s26  ;;  %p3033_p8 = scmp.lt.u32.totalorder %s3029_s26, %s4562_s4 }
 0x38a   :  { %p3035_p9 = pnand %p3033_p8, %p3030_p7 }
 0x38c   :  { %3038 = shalt.err (!%p3035_p9)
}
 0x38d   :  { %s3054_s5 = smov 128   ;;  %s3055_s6 = smov 8  }
 0x38e   :  { %2463 = dma.vmem_to_hbm [thread:$0]  %s2458_s22, 2048, %s4562_s4, [#allocation4], %s3054_s5, %s3054_s5, %s3055_s6  }
 0x38f   :  { %3043 = dma.done.wait [#allocation4], 2048  }
 0x390   :  { %3044 = vsyncadd [#allocation4], 4294965248 }
 0x391   :  { %2467 = vsyncpa [#allocation3], 1 }
 0x392   :  { %2468 = vsyncpa [#allocation6], 1 }
 0x393   :  { %2469 = vsyncpa [#allocation4], 1 }

// kernel: tpu_custom_call.1
= control target key start
LH: loop header
LB: loop body
LE: loop exit
PB: predicated region body
PF: predicated region fallthrough
CT: control target
= control target key end

     0   :  { %vm115_vm0 = vcmask 64512   ;;  %s4541_s0 = inlined_call_operand.vmem [shape: f32[128,8], index: 0, kind: input, shape index: {}]   ;;  %s4542_s1 = inlined_call_operand.vmem [shape: f32[8,128], index: 1, kind: input, shape index: {}]   ;;  %s4543_s2 = inlined_call_operand.vmem [shape: f32[1,128], index: 2, kind: input, shape index: {}]   ;;  %s4544_s3 = inlined_call_operand.vmem [shape: f32[1,128], index: 3, kind: input, shape index: {}]   ;;  %s4545_s4 = inlined_call_operand.hbm [shape: f32[128,128], index: 4, kind: output, shape index: {}]  }
   0x1   :  { %v2916_v0 = vld [vmem:[%s4542_s1] sm:$0xff]  ;;  %v20_v2 = vld [vmem:[%s4541_s0 + $0x8] sm:$0xff]  ;;  %v21_v4 = vld [vmem:[%s4541_s0 + $0x10] sm:$0xff] }
   0x2   :  { %v19_v1 = vld [vmem:[%s4541_s0] sm:$0xff]  ;;  %2628 = vmatprep.subr.mxu0 %v2916_v0  ;;  %2602 = vmatprep.subr.mxu1 %v2916_v0  ;;  %v22_v5 = vld [vmem:[%s4541_s0 + $0x18] sm:$0xff]  ;;  %v24_v8 = vld [vmem:[%s4541_s0 + $0x28] sm:$0xff] }
   0x3   :  { %v35_v3 = vpack.c.bf16 %v20_v2, %v19_v1  ;;  %v23_v6 = vld [vmem:[%s4541_s0 + $0x20] sm:$0xff]  ;;  %2629 = vmatpush3.msra.mxu0 %v2916_v0  ;;  %v36_v7 = vpack.c.bf16 %v22_v5, %v21_v4  ;;  %2603 = vmatpush3.msra.mxu1 %v2916_v0  ;;  %v25_v9 = vld [vmem:[%s4541_s0 + $0x30] sm:$0xff]  ;;  %v26_v10 = vld [vmem:[%s4541_s0 + $0x38] sm:$0xff] }
   0x4   :  { %2680 = vmatprep.subr.mxu1 %v2916_v0  ;;  %2654 = vmatprep.subr.mxu0 %v2916_v0  ;;  %v37_v13 = vpack.c.bf16 %v24_v8, %v23_v6  ;;  %v2948_v14 = vpack.c.bf16 %v26_v10, %v25_v9  ;;  %v27_v15 = vld [vmem:[%s4541_s0 + $0x40] sm:$0xff]  ;;  %v28_v16 = vld [vmem:[%s4541_s0 + $0x48] sm:$0xff] }
   0x5   :  { %v43_v11 = vunpack.c.l.bf16 %v35_v3  ;;  %v44_v12 = vunpack.c.h.bf16 %v35_v3  ;;  %v45_v17 = vunpack.c.l.bf16 %v36_v7  ;;  %v46_v18 = vunpack.c.h.bf16 %v36_v7 }
   0x6   :  { %v2956_v19 = vpack.c.bf16 %v28_v16, %v27_v15  ;;  %v47_v22 = vunpack.c.l.bf16 %v37_v13  ;;  %v48_v23 = vunpack.c.h.bf16 %v37_v13 }
   0x7   :  { %v59_v20 = vsub.f32 %v19_v1, %v43_v11  ;;  %2630 = vmatprep.mubr.msk.f32.mxu0 %vm115_vm0, %v43_v11  ;;  %v60_v21 = vsub.f32 %v20_v2, %v44_v12 }
   0x8   :  { %9 = vsyncpa [#allocation3], 0  ;;  %2631 = vmatmul.mubr.msk.f32.vlgmr.msra.gmra.mrb[0].mxu0 %vm115_vm0, %v44_v12  ;;  %v61_v24 = vsub.f32 %v21_v4, %v45_v17  ;;  %v2960_v25 = vsub.f32 %v22_v5, %v46_v18  ;;  %v49_v26 = vunpack.c.l.bf16 %v2948_v14  ;;  %v50_v27 = vunpack.c.h.bf16 %v2948_v14  ;;  %v29_v40 = vld [vmem:[%s4541_s0 + $0x50] sm:$0xff]  ;;  %v30_v41 = vld [vmem:[%s4541_s0 + $0x58] sm:$0xff] }
   0x9   :  { %2633 = vmatprep.mubr.msk.f32.mxu0 %vm115_vm0, %v45_v17  ;;  %v75_v28 = vpack.c.bf16 %v60_v21, %v59_v20  ;;  %2655 = vmatpush3.msra.mxu0 %v2916_v0  ;;  %v63_v29 = vsub.f32 %v23_v6, %v47_v22  ;;  %v2966_v30 = vsub.f32 %v24_v8, %v48_v23  ;;  %v51_v33 = vunpack.c.l.bf16 %v2956_v19  ;;  %v31_v42 = vld [vmem:[%s4541_s0 + $0x60] sm:$0xff]  ;;  %v32_v43 = vld [vmem:[%s4541_s0 + $0x68] sm:$0xff]  ;;  %v33_v49 = vld [vmem:[%s4541_s0 + $0x70] sm:$0xff] }
   0xa   :  { %v76_v31 = vpack.c.bf16 %v2960_v25, %v61_v24  ;;  %v2969_v32 = vsub.f32 %v25_v9, %v49_v26  ;;  %v52_v34 = vunpack.c.h.bf16 %v2956_v19  ;;  %v2973_v37 = vsub.f32 %v26_v10, %v50_v27  ;;  %v34_v50 = vld [vmem:[%s4541_s0 + $0x78] sm:$0xff] }
   0xb   :  { %v83_v35 = vunpack.c.l.bf16 %v75_v28  ;;  %v84_v36 = vunpack.c.h.bf16 %v75_v28  ;;  %v77_v38 = vpack.c.bf16 %v2966_v30, %v63_v29  ;;  %v67_v45 = vsub.f32 %v27_v15, %v51_v33 }
   0xc   :  { %2634 = vmatmul.mubr.msk.f32.gmra.mrb[2].mxu0 %vm115_vm0, %v46_v18  ;;  %v85_v39 = vunpack.c.l.bf16 %v76_v31  ;;  %v86_v44 = vunpack.c.h.bf16 %v76_v31  ;;  %v2996_v46 = vsub.f32 %v28_v16, %v52_v34  ;;  %v78_v48 = vpack.c.bf16 %v2973_v37, %v2969_v32 }
   0xd   :  { %2604 = vmatprep.mubr.msk.f32.mxu1 %vm115_vm0, %v83_v35  ;;  %2636 = vmatprep.mubr.msk.f32.mxu0 %vm115_vm0, %v47_v22  ;;  %v87_v47 = vunpack.c.l.bf16 %v77_v38  ;;  %v3009_v51 = vpack.c.bf16 %v30_v41, %v29_v40  ;;  %v3011_v52 = vpack.c.bf16 %v32_v43, %v31_v42  ;;  %v99_v53 = vsub.f32 %v59_v20, %v83_v35 }
   0xe   :  { %2605 = vmatmul.mubr.msk.f32.vlgmr.msra.gmra.mrb[0].mxu1 %vm115_vm0, %v84_v36  ;;  %v88_v54 = vunpack.c.h.bf16 %v77_v38  ;;  %v79_v55 = vpack.c.bf16 %v2996_v46, %v67_v45  ;;  %v3018_v58 = vpack.c.bf16 %v34_v50, %v33_v49  ;;  %v89_v59 = vunpack.c.l.bf16 %v78_v48 }
   0xf   :  { %2681 = vmatpush3.msra.mxu1 %v2916_v0  ;;  %2607 = vmatprep.mubr.msk.f32.mxu1 %vm115_vm0, %v85_v39  ;;  %v53_v56 = vunpack.c.l.bf16 %v3009_v51  ;;  %v54_v57 = vunpack.c.h.bf16 %v3009_v51  ;;  %v55_v60 = vunpack.c.l.bf16 %v3011_v52  ;;  %v56_v61 = vunpack.c.h.bf16 %v3011_v52 }
  0x10   :  { %2637 = vmatmul.mubr.msk.f32.gmra.mrb[4].mxu0 %vm115_vm0, %v48_v23  ;;  %v100_v62 = vsub.f32 %v60_v21, %v84_v36  ;;  %v101_v1 = vsub.f32 %v61_v24, %v85_v39  ;;  %v90_v2 = vunpack.c.h.bf16 %v78_v48  ;;  %v91_v3 = vunpack.c.l.bf16 %v79_v55 }
  0x11   :  { %2639 = vmatprep.mubr.msk.f32.mxu0 %vm115_vm0, %v49_v26  ;;  %v69_v63 = vsub.f32 %v29_v40, %v53_v56  ;;  %v70_v0 = vsub.f32 %v30_v41, %v54_v57  ;;  %v57_v4 = vunpack.c.l.bf16 %v3018_v58  ;;  %v71_v6 = vsub.f32 %v31_v42, %v55_v60  ;;  %v3089_v40 = vld [vmem:[%s4543_s2] ss:$0 sm:$0xff] }
  0x12   :  { %2608 = vmatmul.mubr.msk.f32.gmra.mrb[2].mxu1 %vm115_vm0, %v86_v44  ;;  %v72_v7 = vsub.f32 %v32_v43, %v56_v61  ;;  %v58_v8 = vunpack.c.h.bf16 %v3018_v58  ;;  %v102_v9 = vsub.f32 %v2960_v25, %v86_v44  ;;  %v103_v10 = vsub.f32 %v63_v29, %v87_v47  ;;  %v3094_v43 = vld [vmem:[%s4544_s3] ss:$0 sm:$0xff] }
  0x13   :  { %2610 = vmatprep.mubr.msk.f32.mxu1 %vm115_vm0, %v87_v47  ;;  %v80_v5 = vpack.c.bf16 %v70_v0, %v69_v63  ;;  %v92_v11 = vunpack.c.h.bf16 %v79_v55  ;;  %v73_v14 = vsub.f32 %v33_v49, %v57_v4  ;;  %v104_v16 = vsub.f32 %v2966_v30, %v88_v54 }
  0x14   :  { %2640 = vmatmul.mubr.msk.f32.gmra.mrb[6].mxu0 %vm115_vm0, %v50_v27  ;;  %v81_v13 = vpack.c.bf16 %v72_v7, %v71_v6  ;;  %v74_v15 = vsub.f32 %v34_v50, %v58_v8  ;;  %v105_v17 = vsub.f32 %v2969_v32, %v89_v59  ;;  %v106_v22 = vsub.f32 %v2973_v37, %v90_v2 }
  0x15   :  { %2656 = vmatprep.mubr.msk.f32.mxu0 %vm115_vm0, %v99_v53  ;;  %v93_v12 = vunpack.c.l.bf16 %v80_v5  ;;  %v94_v18 = vunpack.c.h.bf16 %v80_v5  ;;  %v107_v23 = vsub.f32 %v67_v45, %v91_v3  ;;  %v108_v26 = vsub.f32 %v2996_v46, %v92_v11 }
  0x16   :  { %2611 = vmatmul.mubr.msk.f32.gmra.mrb[4].mxu1 %vm115_vm0, %v88_v54  ;;  %v95_v20 = vunpack.c.l.bf16 %v81_v13  ;;  %v82_v21 = vpack.c.bf16 %v74_v15, %v73_v14  ;;  %v96_v24 = vunpack.c.h.bf16 %v81_v13 }
  0x17   :  { %2613 = vmatprep.mubr.msk.f32.mxu1 %vm115_vm0, %v89_v59  ;;  %v109_v27 = vsub.f32 %v69_v63, %v93_v12  ;;  %v110_v29 = vsub.f32 %v70_v0, %v94_v18 }
  0x18   :  { %2657 = vmatmul.mubr.msk.f32.vlgmr.msra.gmra.mrb[0].mxu0 %vm115_vm0, %v100_v62  ;;  %v97_v25 = vunpack.c.l.bf16 %v82_v21  ;;  %v98_v28 = vunpack.c.h.bf16 %v82_v21  ;;  %v111_v30 = vsub.f32 %v71_v6, %v95_v20  ;;  %v112_v31 = vsub.f32 %v72_v7, %v96_v24 }
  0x19   :  { %2659 = vmatprep.mubr.msk.f32.mxu0 %vm115_vm0, %v101_v1 }
  0x1a   :  { %2614 = vmatmul.mubr.msk.f32.gmra.mrb[6].mxu1 %vm115_vm0, %v90_v2  ;;  %v113_v32 = vsub.f32 %v73_v14, %v97_v25  ;;  %v114_v35 = vsub.f32 %v74_v15, %v98_v28 }
  0x1b   :  { %2616 = vmatprep.mubr.msk.f32.mxu1 %vm115_vm0, %v91_v3 }
  0x1c   :  { %2660 = vmatmul.mubr.msk.f32.gmra.mrb[2].mxu0 %vm115_vm0, %v102_v9 }
  0x1d   :  { %2662 = vmatprep.mubr.msk.f32.mxu0 %vm115_vm0, %v103_v10 }
  0x1e   :  { %2617 = vmatmul.mubr.msk.f32.gmra.mrb[8].mxu1 %vm115_vm0, %v92_v11 }
  0x1f   :  { %2619 = vmatprep.mubr.msk.f32.mxu1 %vm115_vm0, %v93_v12 }
  0x20   :  { %2663 = vmatmul.mubr.msk.f32.gmra.mrb[4].mxu0 %vm115_vm0, %v104_v16 }
  0x21   :  { %2665 = vmatprep.mubr.msk.f32.mxu0 %vm115_vm0, %v105_v17 }
  0x22   :  { %2620 = vmatmul.mubr.msk.f32.gmra.mrb[10].mxu1 %vm115_vm0, %v94_v18 }
  0x23   :  { %2622 = vmatprep.mubr.msk.f32.mxu1 %vm115_vm0, %v95_v20 }
  0x24   :  { %2666 = vmatmul.mubr.msk.f32.gmra.mrb[6].mxu0 %vm115_vm0, %v106_v22 }
  0x25   :  { %2668 = vmatprep.mubr.msk.f32.mxu0 %vm115_vm0, %v107_v23 }
  0x26   :  { %2623 = vmatmul.mubr.msk.f32.gmra.mrb[12].mxu1 %vm115_vm0, %v96_v24 }
  0x27   :  { %2625 = vmatprep.mubr.msk.f32.mxu1 %vm115_vm0, %v97_v25 }
  0x28   :  { %2669 = vmatmul.mubr.msk.f32.gmra.mrb[8].mxu0 %vm115_vm0, %v108_v26 }
  0x29   :  { %2671 = vmatprep.mubr.msk.f32.mxu0 %vm115_vm0, %v109_v27  ;;  %v2879_v27 = vmov 683565275  }
  0x2a   :  { %2626 = vmatmul.mubr.msk.f32.gmra.mrb[14].mxu1 %vm115_vm0, %v98_v28 }
  0x2b   :  { %2642 = vmatprep.mubr.msk.f32.mxu1 %vm115_vm0, %v51_v33 }
  0x2c   :  { %2672 = vmatmul.mubr.msk.f32.gmra.mrb[10].mxu0 %vm115_vm0, %v110_v29 }
  0x2d   :  { %2674 = vmatprep.mubr.msk.f32.mxu0 %vm115_vm0, %v111_v30 }
  0x2e   :  { %2643 = vmatmul.mubr.msk.f32.vlgmr.msra.gmra.mrb[8].mxu1 %vm115_vm0, %v52_v34 }
  0x2f   :  { %2645 = vmatprep.mubr.msk.f32.mxu1 %vm115_vm0, %v53_v56 }
  0x30   :  { %2675 = vmatmul.mubr.msk.f32.gmra.mrb[12].mxu0 %vm115_vm0, %v112_v31  ;;  %v2880_v31 = vmov 2475754826  }
  0x31   :  { %2677 = vmatprep.mubr.msk.f32.mxu0 %vm115_vm0, %v113_v32 }
  0x32   :  { %2646 = vmatmul.mubr.msk.f32.gmra.mrb[10].mxu1 %vm115_vm0, %v54_v57 }
  0x33   :  { %2648 = vmatprep.mubr.msk.f32.mxu1 %vm115_vm0, %v55_v60 }
  0x34   :  { %2678 = vmatmul.mubr.msk.f32.gmra.mrb[14].mxu0 %vm115_vm0, %v114_v35  ;;  %v2881_v35 = vmov 2131351028  }
  0x36   :  { %2649 = vmatmul.mubr.msk.f32.gmra.mrb[12].mxu1 %vm115_vm0, %v56_v61 }
  0x37   :  { %2651 = vmatprep.mubr.msk.f32.mxu1 %vm115_vm0, %v57_v4 }
  0x3a   :  { %2652 = vmatmul.mubr.msk.f32.gmra.mrb[14].mxu1 %vm115_vm0, %v58_v8 }
  0xe1   :  { %v2606_v19 = vpop.f32.mrb[0].mxu1 }
  0xe2   :  { %v230_v33 = vpop.f32.mrb[1].mxu1 }
  0xe5   :  { %v2609_v34 = vpop.f32.mrb[2].mxu1 }
  0xe6   :  { %v240_v36 = vpop.f32.mrb[3].mxu1 }
  0xe9   :  { %v2612_v37 = vpop.f32.mrb[4].mxu1 }
  0xea   :  { %v250_v38 = vpop.f32.mrb[5].mxu1 }
  0xeb   :  { %v2658_v39 = vpop.f32.mrb[0].mxu0 }
  0xec   :  { %v2682_v41 = vadd.f32 %v2658_v39, %v2606_v19  ;;  %v616_v42 = vpop.f32.mrb[1].mxu0 }
  0xed   :  { %v2683_v44 = vadd.f32 %v616_v42, %v230_v33  ;;  %v3096_v45 = vpop.f32.mrb[6].mxu1  ;;  %v2882_v33 = vmov 2102212464  }
  0xee   :  { %v719_v46 = vmul.f32 %v2682_v41, %v3089_v40  ;;  %v3099_v47 = vpop.f32.mrb[7].mxu1 }
  0xef   :  { %v718_v48 = vmul.f32 %v2683_v44, %v3089_v40  ;;  %v2661_v49 = vpop.f32.mrb[2].mxu0 }
  0xf0   :  { %v3103_v50 = vadd.f32 %v3094_v43, %v719_v46  ;;  %v2684_v51 = vadd.f32 %v2661_v49, %v2609_v34  ;;  %v626_v52 = vpop.f32.mrb[3].mxu0  ;;  %v2884_v46 = vmov 1326507024  }
  0xf1   :  { %v3106_v53 = vadd.f32 %v3094_v43, %v718_v48  ;;  %v2685_v54 = vadd.f32 %v626_v52, %v240_v36  ;;  %v2883_v36 = vmov 920167782  }
  0xf2   :  { %v860_v55 = vand.u32 2147483647, %v3103_v50  ;;  %v863_v56 = vand.u32 2139095040, %v3103_v50  ;;  %v721_v62 = vmul.f32 %v2684_v51, %v3089_v40  ;;  %vm862_vm15 = vcmp.lt.s32.totalorder %v3103_v50, 0 }
  0xf3   :  { %v757_v57 = vand.u32 2147483647, %v3106_v53  ;;  %v760_v58 = vand.u32 2139095040, %v3106_v53  ;;  %v2664_v59 = vpop.f32.mrb[4].mxu0  ;;  %v3131_v21 = vmul.f32 %v2685_v54, %v3089_v40 }
  0xf4   :  { %v864_v60 = vshrl.u32 %v863_v56, 23  ;;  %v867_v61 = vand.u32 8388607, %v860_v55  ;;  %v636_v63 = vpop.f32.mrb[5].mxu0  ;;  %v3118_v3 = vadd.f32 %v3094_v43, %v721_v62  ;;  %v3120_v4 = vadd.f32 %v2664_v59, %v2612_v37 }
  0xf5   :  { %v761_v0 = vshrl.u32 %v760_v58, 23  ;;  %v764_v1 = vand.u32 8388607, %v757_v57  ;;  %v3122_v6 = vadd.f32 %v636_v63, %v250_v38 }
  0xf6   :  { %v2491_v2 = vadd.s32 4294967169, %v864_v60  ;;  %v868_v8 = vor.u32 8388608, %v867_v61  ;;  %v1066_v13 = vand.u32 2147483647, %v3118_v3  ;;  %v1069_v14 = vand.u32 2139095040, %v3118_v3 }
  0xf7   :  { %v2487_v5 = vadd.s32 4294967169, %v761_v0  ;;  %v3124_v7 = vpop.f32.mrb[6].mxu0  ;;  %v765_v11 = vor.u32 8388608, %v764_v1 }
  0xf8   :  { %v870_v9 = vadd.s32 1, %v2491_v2  ;;  %v3126_v10 = vpop.f32.mrb[7].mxu0  ;;  %v1070_v16 = vshrl.u32 %v1069_v14, 23  ;;  %v3133_v22 = vshll.u32 %v868_v8, 8  ;;  %v3141_v25 = vand.u32 8388607, %v1066_v13 }
  0xf9   :  { %v767_v12 = vadd.s32 1, %v2487_v5  ;;  %v3137_v24 = vshll.u32 %v765_v11, 8 }
  0xfa   :  { %vm871_vm1 = vcmp.gt.s32.totalorder %v870_v9, 0  ;;  %v3144_v30 = vadd.s32 4294967169, %v1070_v16 }
  0xfb   :  { %v872_v15 = vsel %vm871_vm1, %v870_v9, 0  ;;  %vm768_vm2 = vcmp.gt.s32.totalorder %v767_v12, 0  ;;  %vm759_vm1 = vcmp.lt.s32.totalorder %v3106_v53, 0 }
  0xfc   :  { %v873_v17 = vshrl.u32 %v872_v15, 5  ;;  %v874_v18 = vand.u32 31, %v872_v15  ;;  %v769_v20 = vsel %vm768_vm2, %v767_v12, 0 }
  0xfd   :  { %v3135_v23 = vshrl.u32 %v769_v20, 5  ;;  %v771_v29 = vand.u32 31, %v769_v20 }
  0xfe   :  { %v875_v26 = vsub.s32 32, %v874_v18  ;;  %v877_v28 = vshll.u32 %v2879_v27, %v874_v18  ;;  %v880_v32 = vshll.u32 %v2880_v31, %v874_v18  ;;  %v883_v19 = vshll.u32 %v2881_v35, %v874_v18 }
  0xff   :  { %v886_v34 = vshll.u32 %v2882_v33, %v874_v18  ;;  %v889_v37 = vshll.u32 %v2883_v36, %v874_v18  ;;  %vm892_vm3 = vcmp.lt.s32.totalorder %v873_v17, 1  ;;  %vm893_vm4 = vcmp.lt.s32.totalorder %v873_v17, 2 }
 0x100   :  { %v878_v38 = vshrl.u32 %v2880_v31, %v875_v26  ;;  %v881_v39 = vshrl.u32 %v2881_v35, %v875_v26  ;;  %v884_v41 = vshrl.u32 %v2882_v33, %v875_v26  ;;  %v876_v42 = vshrl.u32 %v2879_v27, %v875_v26 }
 0x101   :  { %v887_v44 = vshrl.u32 %v2883_v36, %v875_v26  ;;  %v890_v48 = vshrl.u32 %v2884_v46, %v875_v26  ;;  %v772_v54 = vsub.s32 32, %v771_v29  ;;  %vm894_vm5 = vcmp.lt.s32.totalorder %v873_v17, 3 }
 0x102   :  { %v879_v49 = vor.u32 %v878_v38, %v877_v28  ;;  %v882_v51 = vor.u32 %v881_v39, %v880_v32  ;;  %v885_v52 = vor.u32 %v884_v41, %v883_v19  ;;  %vm895_vm6 = vcmp.lt.s32.totalorder %v873_v17, 4 }
 0x103   :  { %v888_v56 = vor.u32 %v887_v44, %v886_v34  ;;  %v891_v58 = vor.u32 %v890_v48, %v889_v37  ;;  %v774_v2 = vshll.u32 %v2879_v27, %v771_v29  ;;  %v775_v9 = vshrl.u32 %v2880_v31, %v772_v54 }
 0x104   :  { %v896_v59 = vsel %vm892_vm3, %v876_v42, %v879_v49  ;;  %v897_v60 = vsel %vm895_vm6, %v885_v52, 2102212464  ;;  %v900_v61 = vsel %vm892_vm3, %v879_v49, %v882_v51  ;;  %v904_v62 = vsel %vm892_vm3, %v882_v51, %v885_v52 }
 0x105   :  { %v898_v63 = vsel %vm894_vm5, %v882_v51, %v897_v60  ;;  %v901_v0 = vsel %vm895_vm6, %v888_v56, 920167782  ;;  %v905_v1 = vsel %vm895_vm6, %v891_v58, 1326507024  ;;  %v777_v11 = vshll.u32 %v2880_v31, %v771_v29 }
 0x106   :  { %v902_v5 = vsel %vm894_vm5, %v885_v52, %v901_v0  ;;  %v906_v8 = vsel %vm894_vm5, %v888_v56, %v905_v1  ;;  %v899_v12 = vsel %vm893_vm4, %v896_v59, %v898_v63  ;;  %v778_v16 = vshrl.u32 %v2881_v35, %v772_v54 }
 0x107   :  { %v903_v14 = vsel %vm893_vm4, %v900_v61, %v902_v5  ;;  %v907_v15 = vsel %vm893_vm4, %v904_v62, %v906_v8  ;;  %v776_v32 = vor.u32 %v775_v9, %v774_v2  ;;  %v780_v34 = vshll.u32 %v2881_v35, %v771_v29 }
 0x108   :  { %v3167_v18 = vmul.u32.u64.low %v3133_v22, %v907_v15  ;;  %v3168_v20 = vmul.u32.u64.high %v3133_v22, %v907_v15, %v3167_v18  ;;  %v3171_v26 = vmul.u32.u64.low %v3133_v22, %v903_v14  ;;  %v3172_v28 = vmul.u32.u64.high %v3133_v22, %v903_v14, %v3171_v26 }
 0x109   :  { %v779_v19 = vor.u32 %v778_v16, %v777_v11  ;;  %v781_v37 = vshrl.u32 %v2882_v33, %v772_v54  ;;  %v773_v38 = vshrl.u32 %v2879_v27, %v772_v54  ;;  %v783_v17 = vshll.u32 %v2882_v33, %v771_v29 }
 0x10a   :  { %v784_v39 = vshrl.u32 %v2883_v36, %v772_v54  ;;  %v787_v41 = vshrl.u32 %v2884_v46, %v772_v54  ;;  %v915_v42 = vmul.u32 %v3133_v22, %v899_v12  ;;  %v786_v48 = vshll.u32 %v2883_v36, %v771_v29 }
 0x10b   :  { %v782_v44 = vor.u32 %v781_v37, %v780_v34  ;;  %vm789_vm7 = vcmp.lt.s32.totalorder %v3135_v23, 1  ;;  %vm917_vm8 = vc.u32 %v3168_v20, %v3171_v26  ;;  %v918_v49 = vadd.s32 1, %v3172_v28  ;;  %v3213_v37 = vpop.f32.mrb[8].mxu0 }
 0x10c   :  { %v785_v51 = vor.u32 %v784_v39, %v783_v17  ;;  %vm790_vm9 = vcmp.lt.s32.totalorder %v3135_v23, 2  ;;  %v788_v52 = vor.u32 %v787_v41, %v786_v48  ;;  %vm791_vm10 = vcmp.lt.s32.totalorder %v3135_v23, 3  ;;  %v3218_v39 = vpop.f32.mrb[8].mxu1 }
 0x10d   :  { %vm792_vm11 = vcmp.lt.s32.totalorder %v3135_v23, 4  ;;  %v797_v54 = vsel %vm789_vm7, %v776_v32, %v779_v19  ;;  %v919_v22 = vsel %vm917_vm8, %v918_v49, %v3172_v28  ;;  %v801_v29 = vsel %vm789_vm7, %v779_v19, %v782_v44 }
 0x10e   :  { %v794_v56 = vsel %vm792_vm11, %v782_v44, 2102212464  ;;  %v798_v58 = vsel %vm792_vm11, %v785_v51, 920167782  ;;  %v920_v59 = vadd.s32 %v919_v22, %v915_v42  ;;  %v793_v60 = vsel %vm789_vm7, %v773_v38, %v776_v32 }
 0x10f   :  { %v799_v61 = vsel %vm791_vm10, %v782_v44, %v798_v58  ;;  %v802_v62 = vsel %vm792_vm11, %v788_v52, 1326507024  ;;  %v795_v63 = vsel %vm791_vm10, %v779_v19, %v794_v56  ;;  %v1076_v2 = vadd.s32 1, %v3144_v30 }
 0x110   :  { %v800_v0 = vsel %vm790_vm9, %v797_v54, %v799_v61  ;;  %v803_v1 = vsel %vm791_vm10, %v785_v51, %v802_v62  ;;  %v921_v5 = vadd.s32 536870912, %v920_v59  ;;  %v3204_v15 = vadd.f32 %v3094_v43, %v3131_v21 }
 0x111   :  { %v804_v8 = vsel %vm790_vm9, %v801_v29, %v803_v1  ;;  %v3195_v9 = vmul.u32.u64.low %v3137_v24, %v800_v0  ;;  %v3196_v11 = vmul.u32.u64.high %v3137_v24, %v800_v0, %v3195_v9  ;;  %vm1077_vm12 = vcmp.gt.s32.totalorder %v1076_v2, 0 }
 0x112   :  { %v3199_v12 = vmul.u32.u64.low %v3137_v24, %v804_v8  ;;  %v3200_v14 = vmul.u32.u64.high %v3137_v24, %v804_v8, %v3199_v12  ;;  %v3206_v16 = vshrl.u32 %v921_v5, 30  ;;  %v796_v30 = vsel %vm790_vm9, %v793_v60, %v795_v63 }
 0x113   :  { %v1078_v18 = vsel %vm1077_vm12, %v1076_v2, 0  ;;  %v815_v19 = vadd.s32 1, %v3196_v11  ;;  %v1074_v34 = vor.u32 8388608, %v3141_v25  ;;  %v812_v38 = vmul.u32 %v3137_v24, %v796_v30 }
 0x114   :  { %v1080_v28 = vand.u32 31, %v1078_v18  ;;  %v923_v32 = vshll.u32 %v3206_v16, 30  ;;  %vm814_vm13 = vc.u32 %v3200_v14, %v3195_v9  ;;  %v963_v17 = vand.u32 2147483647, %v3204_v15 }
 0x115   :  { %v816_v41 = vsel %vm814_vm13, %v815_v19, %v3196_v11  ;;  %v966_v44 = vand.u32 2139095040, %v3204_v15  ;;  %v916_v25 = vadd.s32 %v3171_v26, %v3168_v20  ;;  %v3226_v49 = vshll.u32 %v1074_v34, 8 }
 0x116   :  { %v1081_v21 = vsub.s32 32, %v1080_v28  ;;  %v3220_v23 = vsub.s32 %v920_v59, %v923_v32  ;;  %v817_v42 = vadd.s32 %v816_v41, %v812_v38  ;;  %v3228_v51 = vshrl.u32 %v1078_v18, 5 }
 0x117   :  { %v3233_v54 = vand.u32 8388607, %v963_v17  ;;  %v946_v56 = vsub.s32 4, %v3206_v16  ;;  %v1089_v29 = vshll.u32 %v2881_v35, %v1080_v28  ;;  %v967_v60 = vshrl.u32 %v966_v44, 23 }
 0x118   :  { %v926_v48 = vsub.s32 0, %v3220_v23  ;;  %v818_v24 = vadd.s32 536870912, %v817_v42  ;;  %v1090_v52 = vshrl.u32 %v2882_v33, %v1081_v21  ;;  %v1084_v58 = vshrl.u32 %v2880_v31, %v1081_v21 }
 0x119   :  { %v1087_v20 = vshrl.u32 %v2881_v35, %v1081_v21  ;;  %v1093_v59 = vshrl.u32 %v2883_v36, %v1081_v21  ;;  %v1083_v62 = vshll.u32 %v2879_v27, %v1080_v28  ;;  %v1086_v63 = vshll.u32 %v2880_v31, %v1080_v28 }
 0x11a   :  { %v2492_v22 = vmin.u32 %v926_v48, %v3220_v23  ;;  %v819_v26 = vshrl.u32 %v818_v24, 30  ;;  %v1092_v0 = vshll.u32 %v2882_v33, %v1080_v28  ;;  %v3245_v1 = vadd.s32 %v3195_v9, %v3200_v14 }
 0x11b   :  { %v1091_v5 = vor.u32 %v1090_v52, %v1089_v29  ;;  %v1096_v8 = vshrl.u32 %v2884_v46, %v1081_v21  ;;  %v1085_v12 = vor.u32 %v1084_v58, %v1083_v62  ;;  %v1088_v30 = vor.u32 %v1087_v20, %v1086_v63 }
 0x11c   :  { %v928_v61 = vclz %v2492_v22  ;;  %v820_v2 = vshll.u32 %v819_v26, 30  ;;  %v1094_v18 = vor.u32 %v1093_v59, %v1092_v0  ;;  %v1082_v19 = vshrl.u32 %v2879_v27, %v1081_v21 }
 0x11d   :  { %v1095_v34 = vshll.u32 %v2883_v36, %v1080_v28  ;;  %vm1098_vm14 = vcmp.lt.s32.totalorder %v3228_v51, 1  ;;  %v843_v9 = vsub.s32 4, %v819_v26  ;;  %vm1099_vm2 = vcmp.lt.s32.totalorder %v3228_v51, 2 }
 0x11e   :  { %v2493_v11 = vadd.s32 4294967294, %v928_v61  ;;  %v3248_v32 = vsub.s32 %v817_v42, %v820_v2  ;;  %vm1101_vm3 = vcmp.lt.s32.totalorder %v3228_v51, 4  ;;  %v1106_v44 = vsel %vm1098_vm14, %v1085_v12, %v1088_v30 }
 0x11f   :  { %v1097_v41 = vor.u32 %v1096_v8, %v1095_v34  ;;  %v1103_v21 = vsel %vm1101_vm3, %v1091_v5, 2102212464  ;;  %v1107_v48 = vsel %vm1101_vm3, %v1094_v18, 920167782  ;;  %vm1100_vm4 = vcmp.lt.s32.totalorder %v3228_v51, 3 }
 0x120   :  { %vm2494_vm0 = vcmp.lt.s32.totalorder %v2493_v11, 0  ;;  %v823_v38 = vsub.s32 0, %v3248_v32  ;;  %v1102_v22 = vsel %vm1098_vm14, %v1082_v19, %v1085_v12  ;;  %v1108_v29 = vsel %vm1100_vm4, %v1091_v5, %v1107_v48  ;;  %v3310_v48 = vpop.f32.mrb[9].mxu1 }
 0x121   :  { %v931_v14 = vsel %vm2494_vm0, 0, %v2493_v11  ;;  %v1110_v59 = vsel %vm1098_vm14, %v1088_v30, %v1091_v5  ;;  %vm3273_vm5 = vcmp.le.f32.partialorder %v860_v55, 0.7853982  ;;  %v1104_v62 = vsel %vm1100_vm4, %v1088_v30, %v1103_v21  ;;  %v3304_v21 = vpop.f32.mrb[9].mxu0 }
 0x122   :  { %v932_v28 = vsub.s32 32, %v931_v14  ;;  %v936_v42 = vsub.s32 4294967266, %v931_v14  ;;  %v933_v24 = vshll.u32 %v3220_v23, %v931_v14  ;;  %v2488_v52 = vmin.u32 %v823_v38, %v3248_v32 }
 0x123   :  { %v1109_v63 = vsel %vm1099_vm2, %v1106_v44, %v1108_v29  ;;  %v1111_v0 = vsel %vm1101_vm3, %v1097_v41, 1326507024  ;;  %vm3283_vm6 = vcmp.le.f32.partialorder %v757_v57, 0.7853982  ;;  %v2495_v8 = vadd.s32 4294967169, %v967_v60 }
 0x124   :  { %v934_v58 = vshrl.u32 %v916_v25, %v932_v28  ;;  %v937_v20 = vadd.s32 127, %v936_v42  ;;  %v825_v23 = vclz %v2488_v52  ;;  %v1112_v55 = vsel %vm1100_vm4, %v1094_v18, %v1111_v0 }
 0x125   :  { %v1113_v12 = vsel %vm1099_vm2, %v1110_v59, %v1112_v55  ;;  %v3290_v30 = vmul.u32.u64.low %v3226_v49, %v1109_v63  ;;  %v3291_v19 = vmul.u32.u64.high %v3226_v49, %v1109_v63, %v3290_v30  ;;  %v1105_v14 = vsel %vm1099_vm2, %v1102_v22, %v1104_v62 }
 0x126   :  { %v935_v25 = vor.u32 %v934_v58, %v933_v24  ;;  %v938_v2 = vshll.u32 %v937_v20, 23  ;;  %v2489_v11 = vadd.s32 4294967294, %v825_v23  ;;  %v947_v60 = vsel %vm862_vm15, %v946_v56, %v3206_v16 }
 0x127   :  { %v3296_v38 = vmul.u32.u64.low %v3226_v49, %v1113_v12  ;;  %v3297_v57 = vmul.u32.u64.high %v3226_v49, %v1113_v12, %v3296_v38  ;;  %v844_v18 = vsel %vm759_vm1, %v843_v9, %v819_v26  ;;  %v973_v41 = vadd.s32 1, %v2495_v8 }
 0x128   :  { %v939_v34 = vor.u32 4788187, %v938_v2  ;;  %vm2490_vm7 = vcmp.lt.s32.totalorder %v2489_v11, 0  ;;  %v942_v42 = vcvt.s32.f32 %v935_v25  ;;  %v3308_v51 = vadd.f32 %v3124_v7, %v3096_v45 }
 0x129   :  { %v828_v44 = vsel %vm2490_vm7, 0, %v2489_v11  ;;  %v1121_v16 = vmul.u32 %v3226_v49, %v1105_v14  ;;  %v1124_v56 = vadd.s32 1, %v3291_v19  ;;  %vm1123_vm8 = vc.u32 %v3297_v57, %v3290_v30 }
 0x12a   :  { %v940_v28 = vand.u32 2147483647, %v939_v34  ;;  %v829_v24 = vsub.s32 32, %v828_v44  ;;  %v833_v52 = vsub.s32 4294967266, %v828_v44  ;;  %v830_v26 = vshll.u32 %v3248_v32, %v828_v44 }
 0x12b   :  { %vm974_vm9 = vcmp.gt.s32.totalorder %v973_v41, 0  ;;  %v1125_v45 = vsel %vm1123_vm8, %v1124_v56, %v3291_v19  ;;  %v949_v29 = vsel %vm3273_vm5, 0, %v947_v60  ;;  %v846_v32 = vsel %vm3283_vm6, 0, %v844_v18 }
 0x12c   :  { %v943_v22 = vmul.f32 %v942_v42, %v940_v28  ;;  %v831_v9 = vshrl.u32 %v3245_v1, %v829_v24  ;;  %v834_v58 = vadd.s32 127, %v833_v52  ;;  %v975_v7 = vsel %vm974_vm9, %v973_v41, 0 }
 0x12d   :  { %v1126_v59 = vadd.s32 %v1125_v45, %v1121_v16  ;;  %v977_v49 = vand.u32 31, %v975_v7  ;;  %v3327_v2 = vand.u32 3, %v949_v29  ;;  %v3329_v8 = vand.u32 3, %v846_v32 }
 0x12e   :  { %v944_v20 = vxor.u32 2147483648, %v943_v22  ;;  %v832_v23 = vor.u32 %v831_v9, %v830_v26  ;;  %v835_v62 = vshll.u32 %v834_v58, 23  ;;  %v971_v12 = vor.u32 8388608, %v3233_v54 }
 0x12f   :  { %v1127_v0 = vadd.s32 536870912, %v1126_v59  ;;  %v978_v1 = vsub.s32 32, %v977_v49  ;;  %v723_v14 = vmul.f32 %v3120_v4, %v3089_v40  ;;  %v3337_v38 = vadd.s32 %v3290_v30, %v3297_v57 }
 0x130   :  { %v945_v63 = vsel %vm862_vm15, %v944_v20, %v943_v22  ;;  %v836_v55 = vor.u32 4788187, %v835_v62  ;;  %v839_v34 = vcvt.s32.f32 %v832_v23  ;;  %v3343_v18 = vmul.f32 %v3122_v6, %v3089_v40 }
 0x131   :  { %v948_v25 = vsel %vm3273_vm5, %v3103_v50, %v945_v63  ;;  %v3331_v11 = vshrl.u32 %v1127_v0, 30  ;;  %v981_v60 = vshrl.u32 %v2880_v31, %v978_v1  ;;  %v984_v54 = vshrl.u32 %v2881_v35, %v978_v1 }
 0x132   :  { %2787 = vcosq.f32 %v948_v25  ;;  %v837_v19 = vand.u32 2147483647, %v836_v55  ;;  %v987_v28 = vshrl.u32 %v2882_v33, %v978_v1  ;;  %v990_v42 = vshrl.u32 %v2883_v36, %v978_v1 }
 0x133   :  { %2789 = vsinq.f32 %v948_v25  ;;  %v1129_v61 = vshll.u32 %v3331_v11, 30  ;;  %vm958_vm10 = vcmp.eq.s32.totalorder %v3327_v2, 2  ;;  %v3351_v30 = vshrl.u32 %v975_v7, 5 }
 0x134   :  { %v840_v41 = vmul.f32 %v839_v34, %v837_v19  ;;  %v980_v57 = vshll.u32 %v2879_v27, %v977_v49  ;;  %v983_v44 = vshll.u32 %v2880_v31, %v977_v49  ;;  %vm955_vm11 = vcmp.eq.s32.totalorder %v3327_v2, 0 }
 0x135   :  { %v3349_v4 = vsub.s32 %v1126_v59, %v1129_v61  ;;  %v986_v24 = vshll.u32 %v2881_v35, %v977_v49  ;;  %v989_v52 = vshll.u32 %v2882_v33, %v977_v49  ;;  %v993_v16 = vshrl.u32 %v2884_v46, %v978_v1 }
 0x136   :  { %v841_v6 = vxor.u32 2147483648, %v840_v41  ;;  %vm954_vm12 = vcmp.lt.s32.totalorder %v3327_v2, 2  ;;  %v982_v22 = vor.u32 %v981_v60, %v980_v57  ;;  %v992_v26 = vshll.u32 %v2883_v36, %v977_v49 }
 0x137   :  { %v1132_v56 = vsub.s32 0, %v3349_v4  ;;  %v3362_v9 = vshll.u32 %v971_v12, 8  ;;  %vm952_vm13 = vweird.f32 %v3103_v50  ;;  %v985_v45 = vor.u32 %v984_v54, %v983_v44 }
 0x138   :  { %v842_v58 = vsel %vm759_vm1, %v841_v6, %v840_v41  ;;  %v988_v7 = vor.u32 %v987_v28, %v986_v24  ;;  %v991_v20 = vor.u32 %v990_v42, %v989_v52  ;;  %v994_v23 = vor.u32 %v993_v16, %v992_v26  ;;  %v3406_v16 = vpop.f32.mrb[10].mxu0 }
 0x139   :  { %v845_v29 = vsel %vm3283_vm6, %v3106_v53, %v842_v58  ;;  %v2500_v59 = vmin.u32 %v1132_v56, %v3349_v4  ;;  %v3372_v62 = vadd.f32 %v3094_v43, %v723_v14  ;;  %v979_v49 = vshrl.u32 %v2879_v27, %v978_v1  ;;  %v3413_v58 = vpop.f32.mrb[10].mxu1 }
 0x13a   :  { %2791 = vcosq.f32 %v845_v29  ;;  %vm995_vm14 = vcmp.lt.s32.totalorder %v3351_v30, 1  ;;  %vm996_vm15 = vcmp.lt.s32.totalorder %v3351_v30, 2  ;;  %vm997_vm0 = vcmp.lt.s32.totalorder %v3351_v30, 3 }
 0x13b   :  { %2793 = vsinq.f32 %v845_v29  ;;  %v1134_v63 = vclz %v2500_v59  ;;  %vm998_vm1 = vcmp.lt.s32.totalorder %v3351_v30, 4  ;;  %v1003_v25 = vsel %vm995_vm14, %v982_v22, %v985_v45 }
 0x13c   :  { %v2788_v32 = vpop.eup %2787  ;;  %v1004_v55 = vsel %vm998_vm1, %v991_v20, 920167782  ;;  %v1007_v1 = vsel %vm995_vm14, %v985_v45, %v988_v7  ;;  %vm1068_vm2 = vcmp.lt.s32.totalorder %v3118_v3, 0  ;;  %v1008_v14 = vsel %vm998_vm1, %v994_v23, 1326507024 }
 0x13d   :  { %v2790_v5 = vpop.eup %2789  ;;  %v959_v0 = vxor.u32 2147483648, %v2788_v32  ;;  %v2501_v19 = vadd.s32 4294967294, %v1134_v63  ;;  %v1005_v34 = vsel %vm997_vm0, %v988_v7, %v1004_v55  ;;  %v999_v60 = vsel %vm995_vm14, %v979_v49, %v982_v22 }
 0x13e   :  { %v956_v12 = vxor.u32 2147483648, %v2790_v5  ;;  %v1000_v41 = vsel %vm998_vm1, %v988_v7, 2102212464  ;;  %v1009_v54 = vsel %vm997_vm0, %v991_v20, %v1008_v14  ;;  %vm852_vm3 = vcmp.eq.s32.totalorder %v3329_v8, 0 }
 0x13f   :  { %v960_v61 = vsel %vm958_vm10, %v959_v0, %v2790_v5  ;;  %vm2502_vm4 = vcmp.lt.s32.totalorder %v2501_v19, 0  ;;  %v1006_v42 = vsel %vm996_vm15, %v1003_v25, %v1005_v34  ;;  %v1010_v57 = vsel %vm996_vm15, %v1007_v1, %v1009_v54 }
 0x140   :  { %v957_v28 = vsel %vm955_vm11, %v2788_v32, %v956_v12  ;;  %vm851_vm5 = vcmp.lt.s32.totalorder %v3329_v8, 2  ;;  %v1137_v6 = vsel %vm2502_vm4, 0, %v2501_v19  ;;  %vm849_vm6 = vweird.f32 %v3106_v53 }
 0x141   :  { %v961_v44 = vsel %vm954_vm12, %v957_v28, %v960_v61  ;;  %v3403_v24 = vmul.u32.u64.low %v3362_v9, %v1010_v57  ;;  %v3404_v52 = vmul.u32.u64.high %v3362_v9, %v1010_v57, %v3403_v24  ;;  %v1138_v22 = vsub.s32 32, %v1137_v6 }
 0x142   :  { %v962_v56 = vsel %vm952_vm13, nan, %v961_v44  ;;  %v1142_v26 = vsub.s32 4294967266, %v1137_v6  ;;  %v1001_v2 = vsel %vm997_vm0, %v985_v45, %v1000_v41  ;;  %vm855_vm7 = vcmp.eq.s32.totalorder %v3329_v8, 2 }
 0x143   :  { %2406 = vst [vmem:[#allocation2 + $0x8] sm:$0xff] %v962_v56  ;;  %v1152_v7 = vsub.s32 4, %v3331_v11  ;;  %v3418_v20 = vmul.u32.u64.low %v3362_v9, %v1006_v42  ;;  %v3419_v29 = vmul.u32.u64.high %v3362_v9, %v1006_v42, %v3418_v20  ;;  %v1139_v50 = vshll.u32 %v3349_v4, %v1137_v6 }
 0x144   :  { %v1140_v59 = vshrl.u32 %v3337_v38, %v1138_v22  ;;  %v1143_v23 = vadd.s32 127, %v1142_v26  ;;  %v1275_v49 = vand.u32 2139095040, %v3372_v62  ;;  %v2792_v32 = vpop.eup %2791  ;;  %v1002_v45 = vsel %vm996_vm15, %v999_v60, %v1001_v2 }
 0x145   :  { %vm1020_vm8 = vc.u32 %v3404_v52, %v3418_v20  ;;  %v1272_v63 = vand.u32 2147483647, %v3372_v62  ;;  %v3430_v5 = vadd.f32 %v3094_v43, %v3343_v18  ;;  %v2794_v0 = vpop.eup %2793  ;;  %v856_v25 = vxor.u32 2147483648, %v2792_v32 }
 0x146   :  { %v1141_v4 = vor.u32 %v1140_v59, %v1139_v50  ;;  %v1144_v55 = vshll.u32 %v1143_v23, 23  ;;  %v1276_v38 = vshrl.u32 %v1275_v49, 23  ;;  %v853_v1 = vxor.u32 2147483648, %v2794_v0 }
 0x147   :  { %v1153_v12 = vsel %vm1068_vm2, %v1152_v7, %v3331_v11  ;;  %v1021_v30 = vadd.s32 1, %v3419_v29  ;;  %v1169_v19 = vand.u32 2147483647, %v3430_v5  ;;  %v857_v34 = vsel %vm855_vm7, %v856_v25, %v2794_v0 }
 0x148   :  { %v1145_v14 = vor.u32 4788187, %v1144_v55  ;;  %v1018_v18 = vmul.u32 %v3362_v9, %v1002_v45  ;;  %v2507_v61 = vadd.s32 4294967169, %v1276_v38  ;;  %v854_v60 = vsel %vm852_vm3, %v2792_v32, %v853_v1 }
 0x149   :  { %v1148_v41 = vcvt.s32.f32 %v1141_v4  ;;  %v1022_v54 = vsel %vm1020_vm8, %v1021_v30, %v3419_v29  ;;  %v1279_v11 = vand.u32 8388607, %v1272_v63  ;;  %v858_v28 = vsel %vm851_vm5, %v854_v60, %v857_v34 }
 0x14a   :  { %v1146_v42 = vand.u32 2147483647, %v1145_v14  ;;  %v1023_v57 = vadd.s32 %v1022_v54, %v1018_v18  ;;  %v1282_v44 = vadd.s32 1, %v2507_v61  ;;  %v859_v9 = vsel %vm849_vm6, nan, %v858_v28 }
 0x14b   :  { %vm3453_vm9 = vcmp.le.f32.partialorder %v1066_v13, 0.7853982  ;;  %v1172_v24 = vand.u32 2139095040, %v3430_v5  ;;  %v1176_v56 = vand.u32 8388607, %v1169_v19  ;;  %2405 = vst [vmem:[#allocation2] sm:$0xff] %v859_v9  ;;  %v3466_v49 = vadd.f32 %v3126_v10, %v3099_v47 }
 0x14c   :  { %v1149_v8 = vmul.f32 %v1148_v41, %v1146_v42  ;;  %v1155_v22 = vsel %vm3453_vm9, 0, %v1153_v12  ;;  %v1024_v26 = vadd.s32 536870912, %v1023_v57  ;;  %vm1283_vm10 = vcmp.gt.s32.totalorder %v1282_v44, 0 }
 0x14d   :  { %v1280_v53 = vor.u32 8388608, %v1279_v11  ;;  %v1284_v2 = vsel %vm1283_vm10, %v1282_v44, 0  ;;  %v1173_v7 = vshrl.u32 %v1172_v24, 23  ;;  %v1177_v59 = vor.u32 8388608, %v1176_v56 }
 0x14e   :  { %v1150_v29 = vxor.u32 2147483648, %v1149_v8  ;;  %v1025_v13 = vshrl.u32 %v1024_v26, 30  ;;  %v1286_v50 = vand.u32 31, %v1284_v2  ;;  %v3462_v23 = vand.u32 3, %v1155_v22 }
 0x14f   :  { %v725_v25 = vmul.f32 %v3308_v51, %v3089_v40  ;;  %v3476_v55 = vadd.s32 %v3418_v20, %v3404_v52  ;;  %v3478_v38 = vshrl.u32 %v1284_v2, 5  ;;  %v3480_v1 = vshll.u32 %v1280_v53, 8 }
 0x150   :  { %v1151_v32 = vsel %vm1068_vm2, %v1150_v29, %v1149_v8  ;;  %v1026_v45 = vshll.u32 %v1025_v13, 30  ;;  %v1287_v0 = vsub.s32 32, %v1286_v50  ;;  %v2503_v10 = vadd.s32 4294967169, %v1173_v7 }
 0x151   :  { %v1154_v4 = vsel %vm3453_vm9, %v3118_v3, %v1151_v32  ;;  %v3484_v12 = vshll.u32 %v1177_v59, 8  ;;  %vm965_vm11 = vcmp.lt.s32.totalorder %v3204_v15, 0  ;;  %v1289_v40 = vshll.u32 %v2879_v27, %v1286_v50 }
 0x152   :  { %2795 = vcosq.f32 %v1154_v4  ;;  %v3482_v47 = vsub.s32 %v1023_v57, %v1026_v45  ;;  %v1290_v51 = vshrl.u32 %v2880_v31, %v1287_v0  ;;  %v1293_v52 = vshrl.u32 %v2881_v35, %v1287_v0 }
 0x153   :  { %2797 = vsinq.f32 %v1154_v4  ;;  %v1292_v30 = vshll.u32 %v2880_v31, %v1286_v50  ;;  %v1296_v34 = vshrl.u32 %v2882_v33, %v1287_v0  ;;  %v3494_v14 = vadd.f32 %v3094_v43, %v725_v25 }
 0x154   :  { %v1029_v20 = vsub.s32 0, %v3482_v47  ;;  %v1291_v18 = vor.u32 %v1290_v51, %v1289_v40  ;;  %v1295_v61 = vshll.u32 %v2881_v35, %v1286_v50  ;;  %v1298_v60 = vshll.u32 %v2882_v33, %v1286_v50 }
 0x155   :  { %v1299_v41 = vshrl.u32 %v2883_v36, %v1287_v0  ;;  %vm1164_vm12 = vcmp.eq.s32.totalorder %v3462_v23, 2  ;;  %v1049_v11 = vsub.s32 4, %v1025_v13  ;;  %v1288_v28 = vshrl.u32 %v2879_v27, %v1287_v0 }
 0x156   :  { %v2496_v54 = vmin.u32 %v1029_v20, %v3482_v47  ;;  %v1294_v42 = vor.u32 %v1293_v52, %v1292_v30  ;;  %vm1161_vm13 = vcmp.eq.s32.totalorder %v3462_v23, 0  ;;  %v1297_v57 = vor.u32 %v1296_v34, %v1295_v61 }
 0x157   :  { %v1300_v43 = vor.u32 %v1299_v41, %v1298_v60  ;;  %v1301_v44 = vshll.u32 %v2883_v36, %v1286_v50  ;;  %v1302_v9 = vshrl.u32 %v2884_v46, %v1287_v0  ;;  %vm1160_vm14 = vcmp.lt.s32.totalorder %v3462_v23, 2 }
 0x158   :  { %v1031_v6 = vclz %v2496_v54  ;;  %vm1304_vm15 = vcmp.lt.s32.totalorder %v3478_v38, 1  ;;  %vm1305_vm0 = vcmp.lt.s32.totalorder %v3478_v38, 2  ;;  %vm1307_vm1 = vcmp.lt.s32.totalorder %v3478_v38, 4 }
 0x159   :  { %vm1158_vm2 = vweird.f32 %v3118_v3  ;;  %vm3512_vm3 = vcmp.le.f32.partialorder %v963_v17, 0.7853982  ;;  %v1303_v56 = vor.u32 %v1302_v9, %v1301_v44  ;;  %vm1306_vm4 = vcmp.lt.s32.totalorder %v3478_v38, 3 }
 0x15a   :  { %v1308_v8 = vsel %vm1304_vm15, %v1288_v28, %v1291_v18  ;;  %v1309_v22 = vsel %vm1307_vm1, %v1297_v57, 2102212464  ;;  %v2497_v26 = vadd.s32 4294967294, %v1031_v6  ;;  %v1313_v2 = vsel %vm1307_vm1, %v1300_v43, 920167782 }
 0x15b   :  { %v1310_v53 = vsel %vm1306_vm4, %v1294_v42, %v1309_v22  ;;  %v1316_v7 = vsel %vm1304_vm15, %v1294_v42, %v1297_v57  ;;  %v1312_v29 = vsel %vm1304_vm15, %v1291_v18, %v1294_v42  ;;  %v1314_v50 = vsel %vm1306_vm4, %v1297_v57, %v1313_v2  ;;  %v3554_v22 = vpop.f32.mrb[11].mxu1 }
 0x15c   :  { %v1317_v59 = vsel %vm1307_vm1, %v1303_v56, 1326507024  ;;  %v1179_v32 = vadd.s32 1, %v2503_v10  ;;  %v2796_v45 = vpop.eup %2795  ;;  %vm2498_vm5 = vcmp.lt.s32.totalorder %v2497_v26, 0  ;;  %v3519_v17 = vsel %vm965_vm11, %v1049_v11, %v1025_v13 }
 0x15d   :  { %v1311_v0 = vsel %vm1305_vm0, %v1308_v8, %v1310_v53  ;;  %v1318_v25 = vsel %vm1306_vm4, %v1300_v43, %v1317_v59  ;;  %v2798_v4 = vpop.eup %2797  ;;  %v1165_v40 = vxor.u32 2147483648, %v2796_v45  ;;  %v1034_v51 = vsel %vm2498_vm5, 0, %v2497_v26 }
 0x15e   :  { %v1319_v52 = vsel %vm1305_vm0, %v1316_v7, %v1318_v25  ;;  %vm1180_vm6 = vcmp.gt.s32.totalorder %v1179_v32, 0  ;;  %v1162_v20 = vxor.u32 2147483648, %v2798_v4  ;;  %v1035_v30 = vsub.s32 32, %v1034_v51 }
 0x15f   :  { %v1039_v10 = vsub.s32 4294967266, %v1034_v51  ;;  %v1315_v34 = vsel %vm1305_vm0, %v1312_v29, %v1314_v50  ;;  %v1166_v13 = vsel %vm1164_vm12, %v1165_v40, %v2798_v4  ;;  %v1181_v60 = vsel %vm1180_vm6, %v1179_v32, 0 }
 0x160   :  { %v3530_v18 = vmul.u32.u64.low %v3480_v1, %v1319_v52  ;;  %v3531_v61 = vmul.u32.u64.high %v3480_v1, %v1319_v52, %v3530_v18  ;;  %v1163_v41 = vsel %vm1161_vm13, %v2796_v45, %v1162_v20  ;;  %v1036_v54 = vshll.u32 %v3482_v47, %v1034_v51 }
 0x161   :  { %v1037_v11 = vshrl.u32 %v3476_v55, %v1035_v30  ;;  %v1040_v28 = vadd.s32 127, %v1039_v10  ;;  %v1167_v38 = vsel %vm1160_vm14, %v1163_v41, %v1166_v13  ;;  %v1183_v43 = vand.u32 31, %v1181_v60  ;;  %v3549_v55 = vpop.f32.mrb[11].mxu0 }
 0x162   :  { %v3540_v42 = vmul.u32.u64.low %v3480_v1, %v1315_v34  ;;  %v3541_v57 = vmul.u32.u64.high %v3480_v1, %v1315_v34, %v3540_v42  ;;  %v1168_v44 = vsel %vm1158_vm2, nan, %v1167_v38  ;;  %v1052_v47 = vsel %vm3512_vm3, 0, %v3519_v17 }
 0x163   :  { %v1038_v9 = vor.u32 %v1037_v11, %v1036_v54  ;;  %v1041_v6 = vshll.u32 %v1040_v28, 23  ;;  %2408 = vst [vmem:[#allocation2 + $0x18] sm:$0xff] %v1168_v44  ;;  %v1327_v23 = vmul.u32 %v3480_v1, %v1311_v0  ;;  %v1182_v56 = vshrl.u32 %v1181_v60, 5 }
 0x164   :  { %vm1329_vm7 = vc.u32 %v3531_v61, %v3540_v42  ;;  %v1184_v8 = vsub.s32 32, %v1183_v43  ;;  %v1186_v53 = vshll.u32 %v2879_v27, %v1183_v43  ;;  %v1189_v2 = vshll.u32 %v2880_v31, %v1183_v43 }
 0x165   :  { %v1042_v3 = vor.u32 4788187, %v1041_v6  ;;  %v1045_v26 = vcvt.s32.f32 %v1038_v9  ;;  %v1330_v7 = vadd.s32 1, %v3541_v57  ;;  %v1192_v1 = vshll.u32 %v2881_v35, %v1183_v43 }
 0x166   :  { %v1187_v29 = vshrl.u32 %v2880_v31, %v1184_v8  ;;  %v1190_v50 = vshrl.u32 %v2881_v35, %v1184_v8  ;;  %v1193_v32 = vshrl.u32 %v2882_v33, %v1184_v8  ;;  %v1195_v45 = vshll.u32 %v2882_v33, %v1183_v43 }
 0x167   :  { %v1043_v59 = vand.u32 2147483647, %v1042_v3  ;;  %v1196_v17 = vshrl.u32 %v2883_v36, %v1184_v8  ;;  %v1331_v0 = vsel %vm1329_vm7, %v1330_v7, %v3541_v57  ;;  %vm1201_vm8 = vcmp.lt.s32.totalorder %v1182_v56, 1 }
 0x168   :  { %v1188_v25 = vor.u32 %v1187_v29, %v1186_v53  ;;  %v1191_v4 = vor.u32 %v1190_v50, %v1189_v2  ;;  %v1332_v51 = vadd.s32 %v1331_v0, %v1327_v23  ;;  %v1194_v52 = vor.u32 %v1193_v32, %v1192_v1 }
 0x169   :  { %v1046_v40 = vmul.f32 %v1045_v26, %v1043_v59  ;;  %v1197_v20 = vor.u32 %v1196_v17, %v1195_v45  ;;  %v1185_v30 = vshrl.u32 %v2879_v27, %v1184_v8  ;;  %v1198_v10 = vshll.u32 %v2883_v36, %v1183_v43 }
 0x16a   :  { %v1199_v34 = vshrl.u32 %v2884_v46, %v1184_v8  ;;  %vm1202_vm9 = vcmp.lt.s32.totalorder %v1182_v56, 2  ;;  %v1333_v18 = vadd.s32 536870912, %v1332_v51  ;;  %vm1203_vm10 = vcmp.lt.s32.totalorder %v1182_v56, 3 }
 0x16b   :  { %v1047_v13 = vxor.u32 2147483648, %v1046_v40  ;;  %vm1204_vm12 = vcmp.lt.s32.totalorder %v1182_v56, 4  ;;  %v1209_v54 = vsel %vm1201_vm8, %v1188_v25, %v1191_v4  ;;  %v1205_v57 = vsel %vm1201_vm8, %v1185_v30, %v1188_v25  ;;  %v3603_v25 = vld [vmem:[%s4543_s2] ss:$0 sm:$0xff] }
 0x16c   :  { %v1200_v60 = vor.u32 %v1199_v34, %v1198_v10  ;;  %v1206_v41 = vsel %vm1204_vm12, %v1194_v52, 2102212464  ;;  %v1210_v11 = vsel %vm1204_vm12, %v1197_v20, 920167782  ;;  %v1334_v38 = vshrl.u32 %v1333_v18, 30 }
 0x16d   :  { %v1048_v28 = vsel %vm965_vm11, %v1047_v13, %v1046_v40  ;;  %v1211_v43 = vsel %vm1203_vm10, %v1194_v52, %v1210_v11  ;;  %v1213_v6 = vsel %vm1201_vm8, %v1191_v4, %v1194_v52  ;;  %v1207_v3 = vsel %vm1203_vm10, %v1191_v4, %v1206_v41  ;;  %v3641_v41 = vpop.f32.mrb[12].mxu1 }
 0x16e   :  { %v1051_v44 = vsel %vm3512_vm3, %v3204_v15, %v1048_v28  ;;  %v1212_v9 = vsel %vm1202_vm9, %v1209_v54, %v1211_v43  ;;  %v1214_v23 = vsel %vm1204_vm12, %v1200_v60, 1326507024  ;;  %v1335_v8 = vshll.u32 %v1334_v38, 30 }
 0x16f   :  { %2799 = vcosq.f32 %v1051_v44  ;;  %v1215_v26 = vsel %vm1203_vm10, %v1197_v20, %v1214_v23  ;;  %v3586_v2 = vmul.u32.u64.low %v3484_v12, %v1212_v9  ;;  %v3587_v7 = vmul.u32.u64.high %v3484_v12, %v1212_v9, %v3586_v2  ;;  %v3624_v20 = vld [vmem:[%s4544_s3] ss:$0 sm:$0xff] }
 0x170   :  { %2801 = vsinq.f32 %v1051_v44  ;;  %v1216_v53 = vsel %vm1202_vm9, %v1213_v6, %v1215_v26  ;;  %v3590_v24 = vsub.s32 %v1332_v51, %v1335_v8  ;;  %v1056_v1 = vand.u32 3, %v1052_v47 }
 0x171   :  { %v3593_v29 = vmul.u32.u64.low %v3484_v12, %v1216_v53  ;;  %v3594_v50 = vmul.u32.u64.high %v3484_v12, %v1216_v53, %v3593_v29  ;;  %v1208_v32 = vsel %vm1202_vm9, %v1205_v57, %v1207_v3  ;;  %v1481_v45 = vand.u32 2139095040, %v3494_v14 }
 0x172   :  { %v1338_v59 = vsub.s32 0, %v3590_v24  ;;  %v1358_v17 = vsub.s32 4, %v1334_v38  ;;  %v1227_v0 = vadd.s32 1, %v3587_v7  ;;  %v724_v4 = vmul.f32 %v3603_v25, %v3466_v49 }
 0x173   :  { %vm3609_vm11 = vcmp.le.f32.partialorder %v1272_v63, 0.7853982  ;;  %vm1274_vm13 = vcmp.lt.s32.totalorder %v3372_v62, 0  ;;  %v1478_v40 = vand.u32 2147483647, %v3494_v14  ;;  %vm1055_vm14 = vweird.f32 %v3204_v15 }
 0x174   :  { %v2508_v56 = vmin.u32 %v1338_v59, %v3590_v24  ;;  %vm1057_vm15 = vcmp.lt.s32.totalorder %v1056_v1, 2  ;;  %v1224_v51 = vmul.u32 %v3484_v12, %v1208_v32  ;;  %vm1226_vm0 = vc.u32 %v3594_v50, %v3586_v2  ;;  %v3633_v12 = vpop.f32.mrb[12].mxu0 }
 0x175   :  { %v1482_v49 = vshrl.u32 %v1481_v45, 23  ;;  %v1228_v63 = vsel %vm1226_vm0, %v1227_v0, %v3587_v7  ;;  %v3627_v30 = vadd.f32 %v3624_v20, %v724_v4  ;;  %v3631_v10 = vadd.f32 %v3213_v37, %v3218_v39 }
 0x176   :  { %v1340_v52 = vclz %v2508_v56  ;;  %v1359_v34 = vsel %vm1274_vm13, %v1358_v17, %v1334_v38  ;;  %v1229_v13 = vadd.s32 %v1228_v63, %v1224_v51  ;;  %v3639_v60 = vadd.f32 %v3304_v21, %v3310_v48 }
 0x177   :  { %v2515_v18 = vadd.s32 4294967169, %v1482_v49  ;;  %vm1058_vm1 = vcmp.eq.s32.totalorder %v1056_v1, 0  ;;  %vm1061_vm2 = vcmp.eq.s32.totalorder %v1056_v1, 2  ;;  %v1485_v37 = vand.u32 8388607, %v1478_v40 }
 0x178   :  { %v2509_v11 = vadd.s32 4294967294, %v1340_v52  ;;  %v1328_v38 = vadd.s32 %v3540_v42, %v3531_v61  ;;  %v1230_v57 = vadd.s32 536870912, %v1229_v13  ;;  %v1361_v21 = vsel %vm3609_vm11, 0, %v1359_v34 }
 0x179   :  { %v2800_v54 = vpop.eup %2799  ;;  %v1488_v43 = vadd.s32 1, %v2515_v18  ;;  %v1378_v48 = vand.u32 2139095040, %v3627_v30  ;;  %v1486_v53 = vor.u32 8388608, %v1485_v37  ;;  %vm1171_vm5 = vcmp.lt.s32.totalorder %v3430_v5, 0 }
 0x17a   :  { %v2802_v39 = vpop.eup %2801  ;;  %v1062_v28 = vxor.u32 2147483648, %v2800_v54  ;;  %vm2510_vm3 = vcmp.lt.s32.totalorder %v2509_v11, 0  ;;  %v1231_v23 = vshrl.u32 %v1230_v57, 30  ;;  %v3658_v1 = vand.u32 3, %v1361_v21 }
 0x17b   :  { %v1059_v44 = vxor.u32 2147483648, %v2802_v39  ;;  %v1343_v6 = vsel %vm2510_vm3, 0, %v2509_v11  ;;  %vm1489_vm4 = vcmp.gt.s32.totalorder %v1488_v43, 0  ;;  %v1379_v56 = vshrl.u32 %v1378_v48, 23 }
 0x17c   :  { %v1063_v9 = vsel %vm1061_vm2, %v1062_v28, %v2802_v39  ;;  %v1344_v3 = vsub.s32 32, %v1343_v6  ;;  %v1348_v26 = vsub.s32 4294967266, %v1343_v6  ;;  %v1345_v42 = vshll.u32 %v3590_v24, %v1343_v6 }
 0x17d   :  { %v1060_v8 = vsel %vm1058_vm1, %v2800_v54, %v1059_v44  ;;  %v1232_v7 = vshll.u32 %v1231_v23, 30  ;;  %v1490_v29 = vsel %vm1489_vm4, %v1488_v43, 0  ;;  %v1255_v17 = vsub.s32 4, %v1231_v23 }
 0x17e   :  { %v1064_v61 = vsel %vm1057_vm15, %v1060_v8, %v1063_v9  ;;  %v1346_v32 = vshrl.u32 %v1328_v38, %v1344_v3  ;;  %v1349_v45 = vadd.s32 127, %v1348_v26  ;;  %v1492_v4 = vand.u32 31, %v1490_v29 }
 0x17f   :  { %v1065_v59 = vsel %vm1055_vm14, nan, %v1064_v61  ;;  %v3655_v0 = vsub.s32 %v1229_v13, %v1232_v7  ;;  %v1225_v24 = vadd.s32 %v3586_v2, %v3594_v50  ;;  %v3665_v34 = vsel %vm1171_vm5, %v1255_v17, %v1231_v23  ;;  %v3691_v17 = vpop.f32.mrb[13].mxu0 }
 0x180   :  { %2407 = vst [vmem:[#allocation2 + $0x10] sm:$0xff] %v1065_v59  ;;  %v1347_v51 = vor.u32 %v1346_v32, %v1345_v42  ;;  %v1350_v49 = vshll.u32 %v1349_v45, 23  ;;  %v1493_v52 = vsub.s32 32, %v1492_v4  ;;  %v3667_v13 = vshrl.u32 %v1490_v29, 5 }
 0x181   :  { %v1235_v15 = vsub.s32 0, %v3655_v0  ;;  %v3669_v18 = vshll.u32 %v1486_v53, 8  ;;  %v1495_v37 = vshll.u32 %v2879_v27, %v1492_v4  ;;  %v2511_v39 = vadd.s32 4294967169, %v1379_v56 }
 0x182   :  { %v1351_v63 = vor.u32 4788187, %v1350_v49  ;;  %v1354_v54 = vcvt.s32.f32 %v1347_v51  ;;  %v1496_v2 = vshrl.u32 %v2880_v31, %v1493_v52  ;;  %v1498_v50 = vshll.u32 %v2880_v31, %v1492_v4 }
 0x183   :  { %v2504_v11 = vmin.u32 %v1235_v15, %v3655_v0  ;;  %v1499_v38 = vshrl.u32 %v2881_v35, %v1493_v52  ;;  %v1501_v43 = vshll.u32 %v2881_v35, %v1492_v4  ;;  %v1502_v44 = vshrl.u32 %v2882_v33, %v1493_v52  ;;  %v3698_v15 = vpop.f32.mrb[13].mxu1 }
 0x184   :  { %v1352_v28 = vand.u32 2147483647, %v1351_v63  ;;  %v1505_v21 = vshrl.u32 %v2883_v36, %v1493_v52  ;;  %v1497_v9 = vor.u32 %v1496_v2, %v1495_v37  ;;  %v1504_v6 = vshll.u32 %v2882_v33, %v1492_v4 }
 0x185   :  { %v1237_v57 = vclz %v2504_v11  ;;  %vm1510_vm6 = vcmp.lt.s32.totalorder %v3667_v13, 1  ;;  %v1500_v8 = vor.u32 %v1499_v38, %v1498_v50  ;;  %v1503_v3 = vor.u32 %v1502_v44, %v1501_v43 }
 0x186   :  { %v1355_v48 = vmul.f32 %v1354_v54, %v1352_v28  ;;  %v1508_v26 = vshrl.u32 %v2884_v46, %v1493_v52  ;;  %v1494_v61 = vshrl.u32 %v2879_v27, %v1493_v52  ;;  %v1506_v42 = vor.u32 %v1505_v21, %v1504_v6 }
 0x187   :  { %v2505_v23 = vadd.s32 4294967294, %v1237_v57  ;;  %v1507_v7 = vshll.u32 %v2883_v36, %v1492_v4  ;;  %vm1511_vm8 = vcmp.lt.s32.totalorder %v3667_v13, 2  ;;  %vm1512_vm9 = vcmp.lt.s32.totalorder %v3667_v13, 3 }
 0x188   :  { %v1356_v53 = vxor.u32 2147483648, %v1355_v48  ;;  %vm1513_vm10 = vcmp.lt.s32.totalorder %v3667_v13, 4  ;;  %v1518_v49 = vsel %vm1510_vm6, %v1497_v9, %v1500_v8  ;;  %v1522_v54 = vsel %vm1510_vm6, %v1500_v8, %v1503_v3 }
 0x189   :  { %vm2506_vm7 = vcmp.lt.s32.totalorder %v2505_v23, 0  ;;  %v1509_v32 = vor.u32 %v1508_v26, %v1507_v7  ;;  %v1515_v45 = vsel %vm1513_vm10, %v1503_v3, 2102212464  ;;  %v1519_v63 = vsel %vm1513_vm10, %v1506_v42, 920167782 }
 0x18a   :  { %v1357_v29 = vsel %vm1274_vm13, %v1356_v53, %v1355_v48  ;;  %v1240_v59 = vsel %vm2506_vm7, 0, %v2505_v23  ;;  %v1520_v37 = vsel %vm1512_vm9, %v1503_v3, %v1519_v63  ;;  %v1514_v28 = vsel %vm1510_vm6, %v1494_v61, %v1497_v9 }
 0x18b   :  { %v1360_v4 = vsel %vm3609_vm11, %v3372_v62, %v1357_v29  ;;  %v1241_v56 = vsub.s32 32, %v1240_v59  ;;  %v1245_v51 = vsub.s32 4294967266, %v1240_v59  ;;  %v1242_v52 = vshll.u32 %v3655_v0, %v1240_v59 }
 0x18c   :  { %2803 = vcosq.f32 %v1360_v4  ;;  %v1516_v2 = vsel %vm1512_vm9, %v1500_v8, %v1515_v45  ;;  %v1521_v0 = vsel %vm1511_vm8, %v1518_v49, %v1520_v37  ;;  %v1523_v50 = vsel %vm1513_vm10, %v1509_v32, 1326507024 }
 0x18d   :  { %2805 = vsinq.f32 %v1360_v4  ;;  %v1243_v11 = vshrl.u32 %v1225_v24, %v1241_v56  ;;  %v1246_v47 = vadd.s32 127, %v1245_v51  ;;  %v1524_v24 = vsel %vm1512_vm9, %v1506_v42, %v1523_v50 }
 0x18e   :  { %v1385_v43 = vadd.s32 1, %v2511_v39  ;;  %vm3719_vm12 = vcmp.le.f32.partialorder %v1169_v19, 0.7853982  ;;  %v1525_v21 = vsel %vm1511_vm8, %v1522_v54, %v1524_v24  ;;  %v1375_v39 = vand.u32 2147483647, %v3627_v30 }
 0x18f   :  { %v1244_v38 = vor.u32 %v1243_v11, %v1242_v52  ;;  %v1247_v57 = vshll.u32 %v1246_v47, 23  ;;  %v3726_v48 = vmul.u32.u64.low %v3669_v18, %v1521_v0  ;;  %v3727_v9 = vmul.u32.u64.high %v3669_v18, %v1521_v0, %v3726_v48 }
 0x190   :  { %v3731_v23 = vmul.u32.u64.low %v3669_v18, %v1525_v21  ;;  %v3732_v8 = vmul.u32.u64.high %v3669_v18, %v1525_v21, %v3731_v23  ;;  %vm1366_vm11 = vcmp.lt.s32.totalorder %v3658_v1, 2  ;;  %v1258_v3 = vsel %vm3719_vm12, 0, %v3665_v34 }
 0x191   :  { %v1248_v6 = vor.u32 4788187, %v1247_v57  ;;  %v1251_v19 = vcvt.s32.f32 %v1244_v38  ;;  %v1517_v26 = vsel %vm1511_vm8, %v1514_v28, %v1516_v2  ;;  %vm1386_vm13 = vcmp.gt.s32.totalorder %v1385_v43, 0 }
 0x192   :  { %vm1364_vm14 = vweird.f32 %v3372_v62  ;;  %v1387_v61 = vsel %vm1386_vm13, %v1385_v43, 0  ;;  %v3744_v42 = vadd.f32 %v3406_v16, %v3413_v58  ;;  %v3748_v7 = vadd.f32 %v3549_v55, %v3554_v22 }
 0x193   :  { %v1249_v53 = vand.u32 2147483647, %v1248_v6  ;;  %vm1367_vm15 = vcmp.eq.s32.totalorder %v3658_v1, 0  ;;  %vm1370_vm0 = vcmp.eq.s32.totalorder %v3658_v1, 2  ;;  %v1536_v34 = vadd.s32 1, %v3727_v9 }
 0x194   :  { %v1389_v13 = vand.u32 31, %v1387_v61  ;;  %v3753_v59 = vand.u32 3, %v1258_v3  ;;  %v1533_v32 = vmul.u32 %v3669_v18, %v1517_v26  ;;  %vm1535_vm1 = vc.u32 %v3732_v8, %v3726_v48 }
 0x195   :  { %v1252_v29 = vmul.f32 %v1251_v19, %v1249_v53  ;;  %v1537_v58 = vsel %vm1535_vm1, %v1536_v34, %v3727_v9  ;;  %v1382_v55 = vand.u32 8388607, %v1375_v39  ;;  %v3761_v22 = vshrl.u32 %v1387_v61, 5 }
 0x196   :  { %v2804_v16 = vpop.eup %2803  ;;  %v1390_v45 = vsub.s32 32, %v1389_v13  ;;  %v1538_v49 = vadd.s32 %v1537_v58, %v1533_v32  ;;  %v1392_v52 = vshll.u32 %v2879_v27, %v1389_v13  ;;  %v1395_v54 = vshll.u32 %v2880_v31, %v1389_v13 }
 0x197   :  { %v2806_v4 = vpop.eup %2805  ;;  %v1371_v56 = vxor.u32 2147483648, %v2804_v16  ;;  %v1253_v51 = vxor.u32 2147483648, %v1252_v29  ;;  %v1398_v57 = vshll.u32 %v2881_v35, %v1389_v13  ;;  %v1401_v6 = vshll.u32 %v2882_v33, %v1389_v13 }
 0x198   :  { %v1368_v63 = vxor.u32 2147483648, %v2806_v4  ;;  %v1393_v18 = vshrl.u32 %v2880_v31, %v1390_v45  ;;  %v1396_v11 = vshrl.u32 %v2881_v35, %v1390_v45  ;;  %v1539_v28 = vadd.s32 536870912, %v1538_v49 }
 0x199   :  { %v1372_v47 = vsel %vm1370_vm0, %v1371_v56, %v2806_v4  ;;  %v1254_v37 = vsel %vm1171_vm5, %v1253_v51, %v1252_v29  ;;  %v1399_v2 = vshrl.u32 %v2882_v33, %v1390_v45  ;;  %v1402_v23 = vshrl.u32 %v2883_v36, %v1390_v45 }
 0x19a   :  { %v1369_v0 = vsel %vm1367_vm15, %v2804_v16, %v1368_v63  ;;  %v1257_v50 = vsel %vm3719_vm12, %v3430_v5, %v1254_v37  ;;  %v1394_v38 = vor.u32 %v1393_v18, %v1392_v52  ;;  %v3780_v43 = vshrl.u32 %v1539_v28, 30 }
 0x19b   :  { %v1373_v24 = vsel %vm1366_vm11, %v1369_v0, %v1372_v47  ;;  %2807 = vcosq.f32 %v1257_v50  ;;  %v1397_v21 = vor.u32 %v1396_v11, %v1395_v54  ;;  %v1400_v19 = vor.u32 %v1399_v2, %v1398_v57 }
 0x19c   :  { %v1374_v9 = vsel %vm1364_vm14, nan, %v1373_v24  ;;  %2809 = vsinq.f32 %v1257_v50  ;;  %v1541_v44 = vshll.u32 %v3780_v43, 30  ;;  %v1404_v3 = vshll.u32 %v2883_v36, %v1389_v13 }
 0x19d   :  { %2410 = vst [vmem:[#allocation2 + $0x28] sm:$0xff] %v1374_v9  ;;  %v1405_v1 = vshrl.u32 %v2884_v46, %v1390_v45  ;;  %v1403_v26 = vor.u32 %v1402_v23, %v1401_v6  ;;  %v1383_v61 = vor.u32 8388608, %v1382_v55  ;;  %v727_v62 = vmul.f32 %v3603_v25, %v3631_v10 }
 0x19e   :  { %v3789_v53 = vsub.s32 %v1538_v49, %v1541_v44  ;;  %vm1264_vm2 = vcmp.eq.s32.totalorder %v3753_v59, 0  ;;  %vm1407_vm3 = vcmp.lt.s32.totalorder %v3761_v22, 1  ;;  %vm1409_vm4 = vcmp.lt.s32.totalorder %v3761_v22, 3 }
 0x19f   :  { %v1406_v34 = vor.u32 %v1405_v1, %v1404_v3  ;;  %vm1410_vm5 = vcmp.lt.s32.totalorder %v3761_v22, 4  ;;  %vm1263_vm6 = vcmp.lt.s32.totalorder %v3753_v59, 2  ;;  %v1415_v32 = vsel %vm1407_vm3, %v1394_v38, %v1397_v21  ;;  %v3838_v3 = vpop.f32.mrb[14].mxu0 }
 0x1a0   :  { %v1544_v13 = vsub.s32 0, %v3789_v53  ;;  %v1412_v29 = vsel %vm1410_vm5, %v1400_v19, 2102212464  ;;  %v1416_v16 = vsel %vm1410_vm5, %v1403_v26, 920167782  ;;  %vm1261_vm7 = vweird.f32 %v3430_v5 }
 0x1a1   :  { %v1391_v10 = vshrl.u32 %v2879_v27, %v1390_v45  ;;  %v1417_v58 = vsel %vm1409_vm4, %v1400_v19, %v1416_v16  ;;  %v1419_v55 = vsel %vm1407_vm3, %v1397_v21, %v1400_v19  ;;  %v1420_v4 = vsel %vm1410_vm5, %v1406_v34, 1326507024  ;;  %v3843_v34 = vpop.f32.mrb[14].mxu1 }
 0x1a2   :  { %vm1480_vm8 = vcmp.lt.s32.totalorder %v3494_v14, 0  ;;  %v2516_v56 = vmin.u32 %v1544_v13, %v3789_v53  ;;  %vm1408_vm9 = vcmp.lt.s32.totalorder %v3761_v22, 2  ;;  %v1423_v51 = vshll.u32 %v1383_v61, 8 }
 0x1a3   :  { %v3811_v49 = vadd.f32 %v3624_v20, %v727_v62  ;;  %v1411_v45 = vsel %vm1407_vm3, %v1391_v10, %v1394_v38  ;;  %v1413_v52 = vsel %vm1409_vm4, %v1397_v21, %v1412_v29  ;;  %v1418_v63 = vsel %vm1408_vm9, %v1415_v32, %v1417_v58 }
 0x1a4   :  { %v1421_v18 = vsel %vm1409_vm4, %v1403_v26, %v1420_v4  ;;  %v1546_v11 = vclz %v2516_v56  ;;  %v3823_v37 = vmul.u32.u64.low %v1423_v51, %v1418_v63  ;;  %v3824_v28 = vmul.u32.u64.high %v1423_v51, %v1418_v63, %v3823_v37 }
 0x1a5   :  { %v2808_v54 = vpop.eup %2807  ;;  %v1422_v47 = vsel %vm1408_vm9, %v1419_v55, %v1421_v18  ;;  %vm1267_vm10 = vcmp.eq.s32.totalorder %v3753_v59, 2  ;;  %v1687_v21 = vand.u32 2139095040, %v3811_v49  ;;  %v726_v9 = vmul.f32 %v3603_v25, %v3639_v60 }
 0x1a6   :  { %v2810_v2 = vpop.eup %2809  ;;  %v1268_v0 = vxor.u32 2147483648, %v2808_v54  ;;  %v3827_v50 = vmul.u32.u64.low %v1423_v51, %v1422_v47  ;;  %v3828_v38 = vmul.u32.u64.high %v1423_v51, %v1422_v47, %v3827_v50  ;;  %v2517_v24 = vadd.s32 4294967294, %v1546_v11 }
 0x1a7   :  { %v1265_v57 = vxor.u32 2147483648, %v2810_v2  ;;  %v1534_v23 = vadd.s32 %v3726_v48, %v3732_v8  ;;  %v1564_v44 = vsub.s32 4, %v3780_v43  ;;  %v1414_v19 = vsel %vm1408_vm9, %v1411_v45, %v1413_v52 }
 0x1a8   :  { %v1269_v6 = vsel %vm1267_vm10, %v1268_v0, %v2810_v2  ;;  %vm2518_vm12 = vcmp.lt.s32.totalorder %v2517_v24, 0  ;;  %v1433_v26 = vadd.s32 1, %v3824_v28  ;;  %v1688_v61 = vshrl.u32 %v1687_v21, 23 }
 0x1a9   :  { %v1266_v1 = vsel %vm1264_vm2, %v2808_v54, %v1265_v57  ;;  %v1549_v48 = vsel %vm2518_vm12, 0, %v2517_v24  ;;  %vm1432_vm11 = vc.u32 %v3828_v38, %v3823_v37  ;;  %v1684_v8 = vand.u32 2147483647, %v3811_v49 }
 0x1aa   :  { %v1270_v60 = vsel %vm1263_vm6, %v1266_v1, %v1269_v6  ;;  %v1550_v62 = vsub.s32 32, %v1549_v48  ;;  %v1554_v13 = vsub.s32 4294967266, %v1549_v48  ;;  %v1430_v29 = vmul.u32 %v1423_v51, %v1414_v19 }
 0x1ab   :  { %v1271_v22 = vsel %vm1261_vm7, nan, %v1270_v60  ;;  %v1565_v32 = vsel %vm1480_vm8, %v1564_v44, %v3780_v43  ;;  %v1434_v16 = vsel %vm1432_vm11, %v1433_v26, %v3824_v28  ;;  %v2523_v59 = vadd.s32 4294967169, %v1688_v61 }
 0x1ac   :  { %2409 = vst [vmem:[#allocation2 + $0x20] sm:$0xff] %v1271_v22  ;;  %v3856_v10 = vadd.f32 %v3624_v20, %v726_v9  ;;  %v1551_v58 = vshll.u32 %v3789_v53, %v1549_v48  ;;  %v1552_v55 = vshrl.u32 %v1534_v23, %v1550_v62  ;;  %v1555_v4 = vadd.s32 127, %v1554_v13 }
 0x1ad   :  { %v1435_v5 = vadd.s32 %v1434_v16, %v1430_v29  ;;  %v1691_v56 = vand.u32 8388607, %v1684_v8  ;;  %v1694_v51 = vadd.s32 1, %v2523_v59  ;;  %vm3863_vm13 = vcmp.le.f32.partialorder %v1478_v40, 0.7853982 }
 0x1ae   :  { %v1553_v43 = vor.u32 %v1552_v55, %v1551_v58  ;;  %v1556_v52 = vshll.u32 %v1555_v4, 23  ;;  %v1567_v18 = vsel %vm3863_vm13, 0, %v1565_v32  ;;  %v1584_v47 = vand.u32 2139095040, %v3856_v10 }
 0x1af   :  { %v1436_v63 = vadd.s32 536870912, %v1435_v5  ;;  %vm1695_vm14 = vcmp.gt.s32.totalorder %v1694_v51, 0  ;;  %v1692_v28 = vor.u32 8388608, %v1691_v56  ;;  %v3873_v57 = vand.u32 3, %v1567_v18 }
 0x1b0   :  { %v1557_v53 = vor.u32 4788187, %v1556_v52  ;;  %v1696_v11 = vsel %vm1695_vm14, %v1694_v51, 0  ;;  %v1560_v40 = vcvt.s32.f32 %v1553_v43  ;;  %v1581_v21 = vand.u32 2147483647, %v3856_v10 }
 0x1b1   :  { %v3869_v54 = vshrl.u32 %v1436_v63, 30  ;;  %v1698_v2 = vand.u32 31, %v1696_v11  ;;  %v1431_v6 = vadd.s32 %v3823_v37, %v3828_v38  ;;  %v1585_v44 = vshrl.u32 %v1584_v47, 23 }
 0x1b2   :  { %v1558_v0 = vand.u32 2147483647, %v1557_v53  ;;  %v3879_v19 = vshrl.u32 %v1696_v11, 5  ;;  %v3883_v61 = vshll.u32 %v1692_v28, 8  ;;  %vm1377_vm0 = vcmp.lt.s32.totalorder %v3627_v30, 0  ;;  %v3906_v11 = vpop.f32.mrb[15].mxu0 }
 0x1b3   :  { %v1438_v50 = vshll.u32 %v3869_v54, 30  ;;  %v1699_v24 = vsub.s32 32, %v1698_v2  ;;  %v1701_v22 = vshll.u32 %v2879_v27, %v1698_v2  ;;  %v1704_v37 = vshll.u32 %v2880_v31, %v1698_v2 }
 0x1b4   :  { %v1561_v9 = vmul.f32 %v1560_v40, %v1558_v0  ;;  %v1707_v38 = vshll.u32 %v2881_v35, %v1698_v2  ;;  %v1710_v13 = vshll.u32 %v2882_v33, %v1698_v2  ;;  %v2519_v58 = vadd.s32 4294967169, %v1585_v44  ;;  %v3912_v40 = vpop.f32.mrb[15].mxu1 }
 0x1b5   :  { %v3877_v23 = vsub.s32 %v1435_v5, %v1438_v50  ;;  %v1702_v1 = vshrl.u32 %v2880_v31, %v1699_v24  ;;  %v1705_v26 = vshrl.u32 %v2881_v35, %v1699_v24  ;;  %v1708_v62 = vshrl.u32 %v2882_v33, %v1699_v24 }
 0x1b6   :  { %v1562_v60 = vxor.u32 2147483648, %v1561_v9  ;;  %v1711_v29 = vshrl.u32 %v2883_v36, %v1699_v24  ;;  %v1713_v43 = vshll.u32 %v2883_v36, %v1698_v2  ;;  %v1714_v52 = vshrl.u32 %v2884_v46, %v1699_v24 }
 0x1b7   :  { %v1441_v48 = vsub.s32 0, %v3877_v23  ;;  %v1703_v59 = vor.u32 %v1702_v1, %v1701_v22  ;;  %v1706_v4 = vor.u32 %v1705_v26, %v1704_v37  ;;  %v1709_v5 = vor.u32 %v1708_v62, %v1707_v38 }
 0x1b8   :  { %v1563_v32 = vsel %vm1480_vm8, %v1562_v60, %v1561_v9  ;;  %v1712_v56 = vor.u32 %v1711_v29, %v1710_v13  ;;  %v1461_v63 = vsub.s32 4, %v3869_v54  ;;  %v1700_v18 = vshrl.u32 %v2879_v27, %v1699_v24 }
 0x1b9   :  { %v2512_v16 = vmin.u32 %v1441_v48, %v3877_v23  ;;  %v1566_v55 = vsel %vm3863_vm13, %v3494_v14, %v1563_v32  ;;  %vm1716_vm15 = vcmp.lt.s32.totalorder %v3879_v19, 1  ;;  %v1715_v53 = vor.u32 %v1714_v52, %v1713_v43 }
 0x1ba   :  { %2811 = vcosq.f32 %v1566_v55  ;;  %vm1718_vm1 = vcmp.lt.s32.totalorder %v3879_v19, 3  ;;  %vm1719_vm2 = vcmp.lt.s32.totalorder %v3879_v19, 4  ;;  %v1724_v28 = vsel %vm1716_vm15, %v1703_v59, %v1706_v4 }
 0x1bb   :  { %v1443_v51 = vclz %v2512_v16  ;;  %2813 = vsinq.f32 %v1566_v55  ;;  %v1721_v47 = vsel %vm1719_vm2, %v1709_v5, 2102212464  ;;  %v1725_v2 = vsel %vm1719_vm2, %v1712_v56, 920167782 }
 0x1bc   :  { %v1728_v0 = vsel %vm1716_vm15, %v1706_v4, %v1709_v5  ;;  %vm1717_vm4 = vcmp.lt.s32.totalorder %v3879_v19, 2  ;;  %v1726_v50 = vsel %vm1718_vm1, %v1709_v5, %v1725_v2  ;;  %v1729_v24 = vsel %vm1719_vm2, %v1715_v53, 1326507024 }
 0x1bd   :  { %v2513_v45 = vadd.s32 4294967294, %v1443_v51  ;;  %v1720_v44 = vsel %vm1716_vm15, %v1700_v18, %v1703_v59  ;;  %v1727_v1 = vsel %vm1717_vm4, %v1724_v28, %v1726_v50  ;;  %v1730_v26 = vsel %vm1718_vm1, %v1712_v56, %v1729_v24 }
 0x1be   :  { %vm1572_vm5 = vcmp.lt.s32.totalorder %v3873_v57, 2  ;;  %vm3926_vm6 = vcmp.le.f32.partialorder %v1375_v39, 0.7853982  ;;  %v1722_v62 = vsel %vm1718_vm1, %v1706_v4, %v1721_v47  ;;  %v1731_v37 = vsel %vm1717_vm4, %v1728_v0, %v1730_v26 }
 0x1bf   :  { %vm2514_vm3 = vcmp.lt.s32.totalorder %v2513_v45, 0  ;;  %vm1570_vm7 = vweird.f32 %v3494_v14  ;;  %v3936_v38 = vmul.u32.u64.low %v3883_v61, %v1731_v37  ;;  %v3937_v13 = vmul.u32.u64.high %v3883_v61, %v1731_v37, %v3936_v38 }
 0x1c0   :  { %v1446_v9 = vsel %vm2514_vm3, 0, %v2513_v45  ;;  %v3940_v29 = vmul.u32.u64.low %v3883_v61, %v1727_v1  ;;  %v3941_v39 = vmul.u32.u64.high %v3883_v61, %v1727_v1, %v3940_v29  ;;  %v1591_v55 = vadd.s32 1, %v2519_v58 }
 0x1c1   :  { %v1447_v48 = vsub.s32 32, %v1446_v9  ;;  %v1451_v22 = vsub.s32 4294967266, %v1446_v9  ;;  %v1448_v32 = vshll.u32 %v3877_v23, %v1446_v9  ;;  %vm1573_vm8 = vcmp.eq.s32.totalorder %v3873_v57, 0 }
 0x1c2   :  { %vm1576_vm9 = vcmp.eq.s32.totalorder %v3873_v57, 2  ;;  %v1723_v4 = vsel %vm1717_vm4, %v1720_v44, %v1722_v62  ;;  %v1588_v5 = vand.u32 8388607, %v1581_v21  ;;  %vm1592_vm10 = vcmp.gt.s32.totalorder %v1591_v55, 0 }
 0x1c3   :  { %v1449_v16 = vshrl.u32 %v1431_v6, %v1447_v48  ;;  %v1452_v59 = vadd.s32 127, %v1451_v22  ;;  %v729_v23 = vmul.f32 %v3603_v25, %v3744_v42  ;;  %v1462_v58 = vsel %vm1377_vm0, %v1461_v63, %v3869_v54 }
 0x1c4   :  { %v2812_v56 = vpop.eup %2811  ;;  %vm1741_vm12 = vc.u32 %v3937_v13, %v3940_v29  ;;  %v1742_v19 = vadd.s32 1, %v3941_v39  ;;  %v1739_v53 = vmul.u32 %v3883_v61, %v1723_v4  ;;  %v1593_v47 = vsel %vm1592_vm10, %v1591_v55, 0 }
 0x1c5   :  { %v1450_v51 = vor.u32 %v1449_v16, %v1448_v32  ;;  %v1453_v43 = vshll.u32 %v1452_v59, 23  ;;  %v2814_v6 = vpop.eup %2813  ;;  %v1577_v52 = vxor.u32 2147483648, %v2812_v56  ;;  %v1589_v2 = vor.u32 8388608, %v1588_v5 }
 0x1c6   :  { %v1574_v18 = vxor.u32 2147483648, %v2814_v6  ;;  %v1743_v42 = vsel %vm1741_vm12, %v1742_v19, %v3941_v39  ;;  %v1595_v0 = vand.u32 31, %v1593_v47  ;;  %v1464_v61 = vsel %vm3926_vm6, 0, %v1462_v58 }
 0x1c7   :  { %v1454_v45 = vor.u32 4788187, %v1453_v43  ;;  %v1578_v28 = vsel %vm1576_vm9, %v1577_v52, %v2814_v6  ;;  %v1457_v50 = vcvt.s32.f32 %v1450_v51  ;;  %v1744_v24 = vadd.s32 %v1743_v42, %v1739_v53 }
 0x1c8   :  { %v1575_v54 = vsel %vm1573_vm8, %v2812_v56, %v1574_v18  ;;  %v1596_v44 = vsub.s32 32, %v1595_v0  ;;  %v3970_v1 = vadd.f32 %v3624_v20, %v729_v23  ;;  %v1598_v62 = vshll.u32 %v2879_v27, %v1595_v0 }
 0x1c9   :  { %v1455_v63 = vand.u32 2147483647, %v1454_v45  ;;  %v1579_v9 = vsel %vm1572_vm5, %v1575_v54, %v1578_v28  ;;  %v1745_v22 = vadd.s32 536870912, %v1744_v24  ;;  %v1601_v57 = vshll.u32 %v2880_v31, %v1595_v0 }
 0x1ca   :  { %v1580_v26 = vsel %vm1570_vm7, nan, %v1579_v9  ;;  %v1599_v37 = vshrl.u32 %v2880_v31, %v1596_v44  ;;  %v1602_v38 = vshrl.u32 %v2881_v35, %v1596_v44  ;;  %v1605_v39 = vshrl.u32 %v2882_v33, %v1596_v44 }
 0x1cb   :  { %v1458_v48 = vmul.f32 %v1457_v50, %v1455_v63  ;;  %2412 = vst [vmem:[#allocation2 + $0x38] sm:$0xff] %v1580_v26  ;;  %v3979_v16 = vshrl.u32 %v1745_v22, 30  ;;  %v1604_v59 = vshll.u32 %v2881_v35, %v1595_v0  ;;  %v1608_v14 = vshrl.u32 %v2883_v36, %v1596_v44 }
 0x1cc   :  { %v1594_v55 = vshrl.u32 %v1593_v47, 5  ;;  %v1600_v4 = vor.u32 %v1599_v37, %v1598_v62  ;;  %v1607_v5 = vshll.u32 %v2882_v33, %v1595_v0  ;;  %v1893_v56 = vand.u32 2139095040, %v3970_v1 }
 0x1cd   :  { %v1459_v32 = vxor.u32 2147483648, %v1458_v48  ;;  %v1747_v43 = vshll.u32 %v3979_v16, 30  ;;  %v1603_v23 = vor.u32 %v1602_v38, %v1601_v57  ;;  %v1606_v6 = vor.u32 %v1605_v39, %v1604_v59 }
 0x1ce   :  { %v1609_v58 = vor.u32 %v1608_v14, %v1607_v5  ;;  %v1610_v19 = vshll.u32 %v2883_v36, %v1595_v0  ;;  %v1611_v18 = vshrl.u32 %v2884_v46, %v1596_v44  ;;  %v3993_v45 = vand.u32 3, %v1464_v61 }
 0x1cf   :  { %v1460_v51 = vsel %vm1377_vm0, %v1459_v32, %v1458_v48  ;;  %v3995_v53 = vsub.s32 %v1744_v24, %v1747_v43  ;;  %v1894_v28 = vshrl.u32 %v1893_v56, 23  ;;  %vm1613_vm11 = vcmp.lt.s32.totalorder %v1594_v55, 1 }
 0x1d0   :  { %v1463_v52 = vsel %vm3926_vm6, %v3627_v30, %v1460_v51  ;;  %v1612_v47 = vor.u32 %v1611_v18, %v1610_v19  ;;  %vm1616_vm13 = vcmp.lt.s32.totalorder %v1594_v55, 4  ;;  %v1629_v54 = vshll.u32 %v1589_v2, 8 }
 0x1d1   :  { %2815 = vcosq.f32 %v1463_v52  ;;  %v1750_v42 = vsub.s32 0, %v3995_v53  ;;  %v1597_v60 = vshrl.u32 %v2879_v27, %v1596_v44  ;;  %v1618_v63 = vsel %vm1616_vm13, %v1606_v6, 2102212464 }
 0x1d2   :  { %2817 = vsinq.f32 %v1463_v52  ;;  %v1621_v50 = vsel %vm1613_vm11, %v1600_v4, %v1603_v23  ;;  %v1622_v0 = vsel %vm1616_vm13, %v1609_v58, 920167782  ;;  %vm1473_vm14 = vcmp.eq.s32.totalorder %v3993_v45, 2 }
 0x1d3   :  { %v2524_v9 = vmin.u32 %v1750_v42, %v3995_v53  ;;  %vm1614_vm15 = vcmp.lt.s32.totalorder %v1594_v55, 2  ;;  %vm1615_vm0 = vcmp.lt.s32.totalorder %v1594_v55, 3  ;;  %v1625_v24 = vsel %vm1613_vm11, %v1603_v23, %v1606_v6 }
 0x1d4   :  { %vm1470_vm1 = vcmp.eq.s32.totalorder %v3993_v45, 0  ;;  %v1617_v61 = vsel %vm1613_vm11, %v1597_v60, %v1600_v4  ;;  %v1623_v26 = vsel %vm1615_vm0, %v1606_v6, %v1622_v0  ;;  %v1626_v48 = vsel %vm1616_vm13, %v1612_v47, 1326507024 }
 0x1d5   :  { %v2531_v22 = vadd.s32 4294967169, %v1894_v28  ;;  %vm1469_vm2 = vcmp.lt.s32.totalorder %v3993_v45, 2  ;;  %v1752_v2 = vclz %v2524_v9  ;;  %v1619_v44 = vsel %vm1615_vm0, %v1603_v23, %v1618_v63 }
 0x1d6   :  { %v1624_v62 = vsel %vm1614_vm15, %v1621_v50, %v1623_v26  ;;  %v1627_v37 = vsel %vm1615_vm0, %v1609_v58, %v1626_v48  ;;  %v1890_v32 = vand.u32 2147483647, %v3970_v1  ;;  %v1740_v56 = vadd.s32 %v3940_v29, %v3937_v13 }
 0x1d7   :  { %v1628_v57 = vsel %vm1614_vm15, %v1625_v24, %v1627_v37  ;;  %v4005_v38 = vmul.u32.u64.low %v1629_v54, %v1624_v62  ;;  %v4006_v39 = vmul.u32.u64.high %v1629_v54, %v1624_v62, %v4005_v38  ;;  %v2525_v59 = vadd.s32 4294967294, %v1752_v2 }
 0x1d8   :  { %v4010_v14 = vmul.u32.u64.low %v1629_v54, %v1628_v57  ;;  %v4011_v4 = vmul.u32.u64.high %v1629_v54, %v1628_v57, %v4010_v14  ;;  %v1900_v5 = vadd.s32 1, %v2531_v22  ;;  %v1620_v51 = vsel %vm1614_vm15, %v1617_v61, %v1619_v44 }
 0x1d9   :  { %v4018_v43 = vadd.f32 %v3633_v12, %v3641_v41  ;;  %v4022_v23 = vadd.f32 %v3691_v17, %v3698_v15  ;;  %vm2526_vm3 = vcmp.lt.s32.totalorder %v2525_v59, 0  ;;  %v4026_v52 = vadd.f32 %v3838_v3, %v3843_v34 }
 0x1da   :  { %vm1901_vm4 = vcmp.gt.s32.totalorder %v1900_v5, 0  ;;  %v4030_v13 = vadd.f32 %v3906_v11, %v3912_v40  ;;  %v1755_v58 = vsel %vm2526_vm3, 0, %v2525_v59  ;;  %v1770_v12 = vsub.s32 4, %v3979_v16 }
 0x1db   :  { %v2816_v6 = vpop.eup %2815  ;;  %v1639_v41 = vadd.s32 1, %v4006_v39  ;;  %v1756_v15 = vsub.s32 32, %v1755_v58  ;;  %v1760_v19 = vsub.s32 4294967266, %v1755_v58  ;;  %v1902_v18 = vsel %vm1901_vm4, %v1900_v5, 0 }
 0x1dc   :  { %v2818_v29 = vpop.eup %2817  ;;  %v1474_v55 = vxor.u32 2147483648, %v2816_v6  ;;  %v1757_v3 = vshll.u32 %v3995_v53, %v1755_v58  ;;  %v1636_v34 = vmul.u32 %v1629_v54, %v1620_v51  ;;  %vm1638_vm5 = vc.u32 %v4011_v4, %v4005_v38 }
 0x1dd   :  { %v1471_v17 = vxor.u32 2147483648, %v2818_v29  ;;  %v1758_v40 = vshrl.u32 %v1740_v56, %v1756_v15  ;;  %v1761_v28 = vadd.s32 127, %v1760_v19  ;;  %v1640_v42 = vsel %vm1638_vm5, %v1639_v41, %v4006_v39 }
 0x1de   :  { %v1475_v47 = vsel %vm1473_vm14, %v1474_v55, %v2818_v29  ;;  %vm1467_vm6 = vweird.f32 %v3627_v30  ;;  %v1641_v63 = vadd.s32 %v1640_v42, %v1636_v34  ;;  %v1904_v50 = vand.u32 31, %v1902_v18 }
 0x1df   :  { %v1472_v11 = vsel %vm1470_vm1, %v2816_v6, %v1471_v17  ;;  %vm1686_vm7 = vcmp.lt.s32.totalorder %v3811_v49, 0  ;;  %v1759_v53 = vor.u32 %v1758_v40, %v1757_v3  ;;  %v1762_v54 = vshll.u32 %v1761_v28, 23 }
 0x1e0   :  { %v1476_v60 = vsel %vm1469_vm2, %v1472_v11, %v1475_v47  ;;  %v1771_v9 = vsel %vm1686_vm7, %v1770_v12, %v3979_v16  ;;  %v1642_v24 = vadd.s32 536870912, %v1641_v63  ;;  %v1905_v61 = vsub.s32 32, %v1904_v50 }
 0x1e1   :  { %v1477_v0 = vsel %vm1467_vm6, nan, %v1476_v60  ;;  %v728_v30 = vmul.f32 %v3603_v25, %v3748_v7  ;;  %v1763_v26 = vor.u32 4788187, %v1762_v54  ;;  %v1897_v45 = vand.u32 8388607, %v1890_v32 }
 0x1e2   :  { %2411 = vst [vmem:[#allocation2 + $0x30] sm:$0xff] %v1477_v0  ;;  %v1907_v48 = vshll.u32 %v2879_v27, %v1904_v50  ;;  %v1910_v22 = vshll.u32 %v2880_v31, %v1904_v50  ;;  %v1766_v2 = vcvt.s32.f32 %v1759_v53  ;;  %v4055_v44 = vshrl.u32 %v1642_v24, 30 }
 0x1e3   :  { %v1908_v62 = vshrl.u32 %v2880_v31, %v1905_v61  ;;  %v1911_v16 = vshrl.u32 %v2881_v35, %v1905_v61  ;;  %v1764_v37 = vand.u32 2147483647, %v1763_v26  ;;  %v1914_v57 = vshrl.u32 %v2882_v33, %v1905_v61 }
 0x1e4   :  { %v1916_v25 = vshll.u32 %v2882_v33, %v1904_v50  ;;  %v1917_v7 = vshrl.u32 %v2883_v36, %v1905_v61  ;;  %v1644_v39 = vshll.u32 %v4055_v44, 30  ;;  %v1903_v59 = vshrl.u32 %v1902_v18, 5 }
 0x1e5   :  { %v1909_v14 = vor.u32 %v1908_v62, %v1907_v48  ;;  %v1913_v5 = vshll.u32 %v2881_v35, %v1904_v50  ;;  %v1767_v56 = vmul.f32 %v1766_v2, %v1764_v37  ;;  %v1912_v51 = vor.u32 %v1911_v16, %v1910_v22 }
 0x1e6   :  { %v1918_v6 = vor.u32 %v1917_v7, %v1916_v25  ;;  %v1920_v29 = vshrl.u32 %v2884_v46, %v1905_v61  ;;  %vm4067_vm8 = vcmp.le.f32.partialorder %v1684_v8, 0.7853982  ;;  %v4071_v58 = vsub.s32 %v1641_v63, %v1644_v39 }
 0x1e7   :  { %v1915_v12 = vor.u32 %v1914_v57, %v1913_v5  ;;  %v1919_v41 = vshll.u32 %v2883_v36, %v1904_v50  ;;  %v1768_v17 = vxor.u32 2147483648, %v1767_v56  ;;  %v1773_v15 = vsel %vm4067_vm8, 0, %v1771_v9 }
 0x1e8   :  { %v1898_v19 = vor.u32 8388608, %v1897_v45  ;;  %v4077_v18 = vadd.f32 %v3624_v20, %v728_v30  ;;  %v1647_v47 = vsub.s32 0, %v4071_v58  ;;  %vm1922_vm9 = vcmp.lt.s32.totalorder %v1903_v59, 1 }
 0x1e9   :  { %v1921_v3 = vor.u32 %v1920_v29, %v1919_v41  ;;  %vm1925_vm10 = vcmp.lt.s32.totalorder %v1903_v59, 4  ;;  %v1769_v8 = vsel %vm1686_vm7, %v1768_v17, %v1767_v56  ;;  %vm1923_vm12 = vcmp.lt.s32.totalorder %v1903_v59, 2 }
 0x1ea   :  { %v1930_v34 = vsel %vm1922_vm9, %v1909_v14, %v1912_v51  ;;  %v1931_v11 = vsel %vm1925_vm10, %v1918_v6, 920167782  ;;  %v1772_v40 = vsel %vm4067_vm8, %v3811_v49, %v1769_v8  ;;  %v2520_v20 = vmin.u32 %v1647_v47, %v4071_v58 }
 0x1eb   :  { %vm1924_vm11 = vcmp.lt.s32.totalorder %v1903_v59, 3  ;;  %v1927_v28 = vsel %vm1925_vm10, %v1915_v12, 2102212464  ;;  %2819 = vcosq.f32 %v1772_v40  ;;  %v1906_v42 = vshrl.u32 %v2879_v27, %v1905_v61 }
 0x1ec   :  { %v1932_v60 = vsel %vm1924_vm11, %v1915_v12, %v1931_v11  ;;  %v1934_v63 = vsel %vm1922_vm9, %v1912_v51, %v1915_v12  ;;  %2821 = vsinq.f32 %v1772_v40  ;;  %v1649_v50 = vclz %v2520_v20 }
 0x1ed   :  { %v1933_v0 = vsel %vm1923_vm12, %v1930_v34, %v1932_v60  ;;  %v1935_v53 = vsel %vm1925_vm10, %v1921_v3, 1326507024  ;;  %v1926_v54 = vsel %vm1922_vm9, %v1906_v42, %v1909_v14  ;;  %v1928_v9 = vsel %vm1924_vm11, %v1912_v51, %v1927_v28 }
 0x1ee   :  { %v1936_v24 = vsel %vm1924_vm11, %v1918_v6, %v1935_v53  ;;  %v1938_v30 = vshll.u32 %v1898_v19, 8  ;;  %v1777_v26 = vand.u32 3, %v1773_v15  ;;  %v2521_v45 = vadd.s32 4294967294, %v1649_v50  ;;  %v4129_v19 = vld [vmem:[%s4543_s2] ss:$0 sm:$0xff] }
 0x1ef   :  { %v1937_v48 = vsel %vm1923_vm12, %v1934_v63, %v1936_v24  ;;  %v1790_v61 = vand.u32 2139095040, %v4077_v18  ;;  %vm4105_vm13 = vcmp.le.f32.partialorder %v1581_v21, 0.7853982  ;;  %v1929_v57 = vsel %vm1923_vm12, %v1926_v54, %v1928_v9 }
 0x1f0   :  { %v4096_v22 = vmul.u32.u64.low %v1938_v30, %v1937_v48  ;;  %v4097_v2 = vmul.u32.u64.high %v1938_v30, %v1937_v48, %v4096_v22  ;;  %v4099_v62 = vmul.u32.u64.low %v1938_v30, %v1933_v0  ;;  %v4100_v16 = vmul.u32.u64.high %v1938_v30, %v1933_v0, %v4099_v62 }
 0x1f1   :  { %vm2522_vm14 = vcmp.lt.s32.totalorder %v2521_v45, 0  ;;  %v1791_v25 = vshrl.u32 %v1790_v61, 23  ;;  %vm1583_vm15 = vcmp.lt.s32.totalorder %v3856_v10, 0  ;;  %v1667_v39 = vsub.s32 4, %v4055_v44 }
 0x1f2   :  { %v1652_v7 = vsel %vm2522_vm14, 0, %v2521_v45  ;;  %v1787_v14 = vand.u32 2147483647, %v4077_v18  ;;  %vm1776_vm0 = vweird.f32 %v3811_v49  ;;  %v1637_v5 = vadd.s32 %v4005_v38, %v4011_v4 }
 0x1f3   :  { %v1653_v21 = vsub.s32 32, %v1652_v7  ;;  %v1657_v56 = vsub.s32 4294967266, %v1652_v7  ;;  %v2527_v51 = vadd.s32 4294967169, %v1791_v25  ;;  %vm1778_vm1 = vcmp.lt.s32.totalorder %v1777_v26, 2 }
 0x1f4   :  { %v1945_v6 = vmul.u32 %v1938_v30, %v1929_v57  ;;  %vm1947_vm2 = vc.u32 %v4097_v2, %v4099_v62  ;;  %v1948_v59 = vadd.s32 1, %v4100_v16  ;;  %v1654_v29 = vshll.u32 %v4071_v58, %v1652_v7 }
 0x1f5   :  { %v1655_v55 = vshrl.u32 %v1637_v5, %v1653_v21  ;;  %v1658_v12 = vadd.s32 127, %v1657_v56  ;;  %v1797_v41 = vadd.s32 1, %v2527_v51  ;;  %v2820_v17 = vpop.eup %2819  ;;  %v1668_v38 = vsel %vm1583_vm15, %v1667_v39, %v4055_v44 }
 0x1f6   :  { %v1949_v4 = vsel %vm1947_vm2, %v1948_v59, %v4100_v16  ;;  %v1794_v15 = vand.u32 8388607, %v1787_v14  ;;  %v731_v58 = vmul.f32 %v4129_v19, %v4018_v43  ;;  %v2822_v47 = vpop.eup %2821  ;;  %v1783_v3 = vxor.u32 2147483648, %v2820_v17  ;;  %v4138_v43 = vld [vmem:[%s4544_s3] ss:$0 sm:$0xff]  ;;  %s2885_s3 = smov [#allocation2]  }
 0x1f7   :  { %v1656_v8 = vor.u32 %v1655_v55, %v1654_v29  ;;  %v1659_v34 = vshll.u32 %v1658_v12, 23  ;;  %v1950_v11 = vadd.s32 %v1949_v4, %v1945_v6  ;;  %vm1779_vm3 = vcmp.eq.s32.totalorder %v1777_v26, 0  ;;  %s2426_s5 = sshll.u32 %s2885_s3, 4  ;;  %s2427_s5 = int_to_ptr.vmem [resolvable:$true] %s2426_s5 }
 0x1f8   :  { %v1780_v44 = vxor.u32 2147483648, %v2822_v47  ;;  %vm1782_vm4 = vcmp.eq.s32.totalorder %v1777_v26, 2  ;;  %vm1798_vm5 = vcmp.gt.s32.totalorder %v1797_v41, 0  ;;  %v1670_v28 = vsel %vm4105_vm13, 0, %v1668_v38  ;;  %s2855_s6 = scalar_lea.vmem %s2427_s5, 2048  ;;  %p2860_p1 = scmp.lt.s32.totalorder %s2427_s5, %s2427_s5 }
 0x1f9   :  { %v1784_v40 = vsel %vm1782_vm4, %v1783_v3, %v2822_v47  ;;  %v1660_v20 = vor.u32 4788187, %v1659_v34  ;;  %v1951_v42 = vadd.s32 536870912, %v1950_v11  ;;  %v1795_v63 = vor.u32 8388608, %v1794_v15  ;;  %p2856_p0 = scmp.ne.s32.totalorder %s2427_s5, %s2855_s6  ;;  %p2861_p2 = scmp.lt.s32.totalorder %s2855_s6, %s2855_s6 }
 0x1fa   :  { %v1781_v60 = vsel %vm1779_vm3, %v2820_v17, %v1780_v44  ;;  %v1799_v50 = vsel %vm1798_vm5, %v1797_v41, 0  ;;  %v4141_v0 = vadd.f32 %v4138_v43, %v731_v58  ;;  %v1663_v9 = vcvt.s32.f32 %v1656_v8 }
 0x1fb   :  { %v1785_v53 = vsel %vm1778_vm1, %v1781_v60, %v1784_v40  ;;  %v1661_v54 = vand.u32 2147483647, %v1660_v20  ;;  %v4144_v24 = vshrl.u32 %v1951_v42, 30  ;;  %v1801_v45 = vand.u32 31, %v1799_v50  ;;  %p2862_p3 = por %p2861_p2, %p2860_p1 }
 0x1fc   :  { %v1786_v30 = vsel %vm1776_vm0, nan, %v1785_v53  ;;  %v4149_v22 = vand.u32 3, %v1670_v28  ;;  %v4151_v57 = vshll.u32 %v1795_v63, 8  ;;  %v2099_v26 = vand.u32 2139095040, %v4141_v0 }
 0x1fd   :  { %2414 = vst [vmem:[#allocation2 + $0x48] sm:$0xff] %v1786_v30  ;;  %v1664_v48 = vmul.f32 %v1663_v9, %v1661_v54  ;;  %v1953_v61 = vshll.u32 %v4144_v24, 30  ;;  %v1802_v16 = vsub.s32 32, %v1801_v45  ;;  %v1800_v39 = vshrl.u32 %v1799_v50, 5  ;;  %p2863_p4 = pnand %p2862_p3, %p2856_p0 }
 0x1fe   :  { %v1804_v5 = vshll.u32 %v2879_v27, %v1801_v45  ;;  %v1807_v21 = vshll.u32 %v2880_v31, %v1801_v45  ;;  %v1810_v51 = vshll.u32 %v2881_v35, %v1801_v45  ;;  %v1813_v55 = vshll.u32 %v2882_v33, %v1801_v45 }
 0x1ff   :  { %v1665_v25 = vxor.u32 2147483648, %v1664_v48  ;;  %v4154_v7 = vsub.s32 %v1950_v11, %v1953_v61  ;;  %v1805_v49 = vshrl.u32 %v2880_v31, %v1802_v16  ;;  %v1808_v56 = vshrl.u32 %v2881_v35, %v1802_v16 }
 0x200   :  { %v1811_v29 = vshrl.u32 %v2882_v33, %v1802_v16  ;;  %v1814_v38 = vshrl.u32 %v2883_v36, %v1802_v16  ;;  %v2096_v15 = vand.u32 2147483647, %v4141_v0  ;;  %v2100_v58 = vshrl.u32 %v2099_v26, 23 }
 0x201   :  { %v1666_v6 = vsel %vm1583_vm15, %v1665_v25, %v1664_v48  ;;  %v1956_v59 = vsub.s32 0, %v4154_v7  ;;  %v1806_v41 = vor.u32 %v1805_v49, %v1804_v5  ;;  %v1809_v17 = vor.u32 %v1808_v56, %v1807_v21 }
 0x202   :  { %v1669_v12 = vsel %vm4105_vm13, %v3856_v10, %v1666_v6  ;;  %v1812_v47 = vor.u32 %v1811_v29, %v1810_v51  ;;  %v1815_v3 = vor.u32 %v1814_v38, %v1813_v55  ;;  %vm1819_vm6 = vcmp.lt.s32.totalorder %v1800_v39, 1 }
 0x203   :  { %2823 = vcosq.f32 %v1669_v12  ;;  %v2532_v4 = vmin.u32 %v1956_v59, %v4154_v7  ;;  %v1803_v34 = vshrl.u32 %v2879_v27, %v1802_v16  ;;  %v1816_v37 = vshll.u32 %v2883_v36, %v1801_v45 }
 0x204   :  { %2825 = vsinq.f32 %v1669_v12  ;;  %v1817_v11 = vshrl.u32 %v2884_v46, %v1802_v16  ;;  %vm1820_vm7 = vcmp.lt.s32.totalorder %v1800_v39, 2  ;;  %vm1821_vm8 = vcmp.lt.s32.totalorder %v1800_v39, 3 }
 0x205   :  { %v1958_v8 = vclz %v2532_v4  ;;  %vm1822_vm9 = vcmp.lt.s32.totalorder %v1800_v39, 4  ;;  %v1827_v44 = vsel %vm1819_vm6, %v1806_v41, %v1809_v17  ;;  %vm1676_vm10 = vcmp.eq.s32.totalorder %v4149_v22, 0 }
 0x206   :  { %v1818_v20 = vor.u32 %v1817_v11, %v1816_v37  ;;  %v1824_v28 = vsel %vm1822_vm9, %v1812_v47, 2102212464  ;;  %v1828_v42 = vsel %vm1822_vm9, %v1815_v3, 920167782  ;;  %vm1892_vm12 = vcmp.lt.s32.totalorder %v3970_v1, 0 }
 0x207   :  { %v2533_v40 = vadd.s32 4294967294, %v1958_v8  ;;  %v1823_v60 = vsel %vm1819_vm6, %v1803_v34, %v1806_v41  ;;  %v1825_v63 = vsel %vm1821_vm8, %v1809_v17, %v1824_v28  ;;  %v1829_v50 = vsel %vm1821_vm8, %v1812_v47, %v1828_v42 }
 0x208   :  { %v1831_v53 = vsel %vm1819_vm6, %v1809_v17, %v1812_v47  ;;  %vm1675_vm11 = vcmp.lt.s32.totalorder %v4149_v22, 2  ;;  %v1830_v54 = vsel %vm1820_vm7, %v1827_v44, %v1829_v50  ;;  %v1832_v9 = vsel %vm1822_vm9, %v1818_v20, 1326507024 }
 0x209   :  { %vm2534_vm13 = vcmp.lt.s32.totalorder %v2533_v40, 0  ;;  %v2539_v30 = vadd.s32 4294967169, %v2100_v58  ;;  %vm1673_vm14 = vweird.f32 %v3856_v10  ;;  %v1833_v48 = vsel %vm1821_vm8, %v1815_v3, %v1832_v9 }
 0x20a   :  { %v1961_v45 = vsel %vm2534_vm13, 0, %v2533_v40  ;;  %v4187_v61 = vmul.u32.u64.low %v4151_v57, %v1830_v54  ;;  %v4188_v16 = vmul.u32.u64.high %v4151_v57, %v1830_v54, %v4187_v61  ;;  %v1946_v26 = vadd.s32 %v4099_v62, %v4097_v2 }
 0x20b   :  { %v1962_v25 = vsub.s32 32, %v1961_v45  ;;  %v1966_v5 = vsub.s32 4294967266, %v1961_v45  ;;  %v1834_v49 = vsel %vm1820_vm7, %v1831_v53, %v1833_v48  ;;  %v1976_v21 = vsub.s32 4, %v4144_v24 }
 0x20c   :  { %v1826_v56 = vsel %vm1820_vm7, %v1823_v60, %v1825_v63  ;;  %v4197_v51 = vmul.u32.u64.low %v4151_v57, %v1834_v49  ;;  %v4198_v6 = vmul.u32.u64.high %v4151_v57, %v1834_v49, %v4197_v51  ;;  %v1963_v29 = vshll.u32 %v4154_v7, %v1961_v45 }
 0x20d   :  { %v2824_v59 = vpop.eup %2823  ;;  %v1964_v55 = vshrl.u32 %v1946_v26, %v1962_v25  ;;  %v1967_v12 = vadd.s32 127, %v1966_v5  ;;  %v2106_v41 = vadd.s32 1, %v2539_v30  ;;  %vm1679_vm15 = vcmp.eq.s32.totalorder %v4149_v22, 2 }
 0x20e   :  { %v2826_v17 = vpop.eup %2825  ;;  %v1680_v2 = vxor.u32 2147483648, %v2824_v59  ;;  %v1845_v62 = vadd.s32 1, %v4188_v16  ;;  %v2103_v39 = vand.u32 8388607, %v2096_v15  ;;  %v1842_v3 = vmul.u32 %v4151_v57, %v1826_v56 }
 0x20f   :  { %v1677_v38 = vxor.u32 2147483648, %v2826_v17  ;;  %v1965_v4 = vor.u32 %v1964_v55, %v1963_v29  ;;  %v1968_v58 = vshll.u32 %v1967_v12, 23  ;;  %vm2107_vm0 = vcmp.gt.s32.totalorder %v2106_v41, 0 }
 0x210   :  { %v1681_v47 = vsel %vm1679_vm15, %v1680_v2, %v2826_v17  ;;  %vm1844_vm1 = vc.u32 %v4198_v6, %v4187_v61  ;;  %v2108_v7 = vsel %vm2107_vm0, %v2106_v41, 0  ;;  %v1977_v37 = vsel %vm1892_vm12, %v1976_v21, %v4144_v24 }
 0x211   :  { %v1678_v8 = vsel %vm1676_vm10, %v2824_v59, %v1677_v38  ;;  %v1969_v34 = vor.u32 4788187, %v1968_v58  ;;  %v1846_v11 = vsel %vm1844_vm1, %v1845_v62, %v4188_v16  ;;  %vm4218_vm2 = vcmp.le.f32.partialorder %v1890_v32, 0.7853982 }
 0x212   :  { %v1682_v44 = vsel %vm1675_vm11, %v1678_v8, %v1681_v47  ;;  %v1847_v40 = vadd.s32 %v1846_v11, %v1842_v3  ;;  %v2110_v20 = vand.u32 31, %v2108_v7  ;;  %v1972_v60 = vcvt.s32.f32 %v1965_v4 }
 0x213   :  { %v1683_v28 = vsel %vm1673_vm14, nan, %v1682_v44  ;;  %v1970_v42 = vand.u32 2147483647, %v1969_v34  ;;  %v730_v24 = vmul.f32 %v4129_v19, %v4022_v23  ;;  %v1979_v22 = vsel %vm4218_vm2, 0, %v1977_v37 }
 0x214   :  { %2413 = vst [vmem:[#allocation2 + $0x40] sm:$0xff] %v1683_v28  ;;  %v1848_v63 = vadd.s32 536870912, %v1847_v40  ;;  %v2104_v50 = vor.u32 8388608, %v2103_v39  ;;  %v2111_v32 = vsub.s32 32, %v2110_v20  ;;  %v2113_v54 = vshll.u32 %v2879_v27, %v2110_v20 }
 0x215   :  { %v1973_v53 = vmul.f32 %v1972_v60, %v1970_v42  ;;  %v2116_v9 = vshll.u32 %v2880_v31, %v2110_v20  ;;  %v2119_v10 = vshll.u32 %v2881_v35, %v2110_v20  ;;  %v2122_v48 = vshll.u32 %v2882_v33, %v2110_v20 }
 0x216   :  { %v4231_v30 = vshrl.u32 %v1848_v63, 30  ;;  %v2114_v45 = vshrl.u32 %v2880_v31, %v2111_v32  ;;  %v2117_v23 = vshrl.u32 %v2881_v35, %v2111_v32  ;;  %v2120_v26 = vshrl.u32 %v2882_v33, %v2111_v32 }
 0x217   :  { %v1974_v16 = vxor.u32 2147483648, %v1973_v53  ;;  %v2123_v25 = vshrl.u32 %v2883_v36, %v2111_v32  ;;  %v2126_v5 = vshrl.u32 %v2884_v46, %v2111_v32  ;;  %v2109_v21 = vshrl.u32 %v2108_v7, 5 }
 0x218   :  { %v1850_v49 = vshll.u32 %v4231_v30, 30  ;;  %v2115_v56 = vor.u32 %v2114_v45, %v2113_v54  ;;  %v2125_v51 = vshll.u32 %v2883_v36, %v2110_v20  ;;  %v2118_v29 = vor.u32 %v2117_v23, %v2116_v9 }
 0x219   :  { %v1975_v59 = vsel %vm1892_vm12, %v1974_v16, %v1973_v53  ;;  %v2121_v55 = vor.u32 %v2120_v26, %v2119_v10  ;;  %v2124_v12 = vor.u32 %v2123_v25, %v2122_v48  ;;  %v4249_v2 = vadd.f32 %v4138_v43, %v730_v24 }
 0x21a   :  { %v1978_v41 = vsel %vm4218_vm2, %v3970_v1, %v1975_v59  ;;  %v4246_v17 = vsub.s32 %v1847_v40, %v1850_v49  ;;  %v4251_v62 = vand.u32 3, %v1979_v22  ;;  %v2112_v39 = vshrl.u32 %v2879_v27, %v2111_v32 }
 0x21b   :  { %2827 = vcosq.f32 %v1978_v41  ;;  %v2127_v38 = vor.u32 %v2126_v5, %v2125_v51  ;;  %vm2128_vm3 = vcmp.lt.s32.totalorder %v2109_v21, 1  ;;  %vm2131_vm4 = vcmp.lt.s32.totalorder %v2109_v21, 4 }
 0x21c   :  { %2829 = vsinq.f32 %v1978_v41  ;;  %v1853_v4 = vsub.s32 0, %v4246_v17  ;;  %v2133_v58 = vsel %vm2131_vm4, %v2121_v55, 2102212464  ;;  %v2136_v47 = vsel %vm2128_vm3, %v2115_v56, %v2118_v29 }
 0x21d   :  { %v2137_v3 = vsel %vm2131_vm4, %v2124_v12, 920167782  ;;  %v2144_v7 = vshll.u32 %v2104_v50, 8  ;;  %vm2129_vm5 = vcmp.lt.s32.totalorder %v2109_v21, 2  ;;  %vm2130_vm6 = vcmp.lt.s32.totalorder %v2109_v21, 3 }
 0x21e   :  { %v2528_v8 = vmin.u32 %v1853_v4, %v4246_v17  ;;  %v2132_v34 = vsel %vm2128_vm3, %v2112_v39, %v2115_v56  ;;  %v2134_v37 = vsel %vm2130_vm6, %v2118_v29, %v2133_v58  ;;  %v2138_v11 = vsel %vm2130_vm6, %v2121_v55, %v2137_v3 }
 0x21f   :  { %v2140_v44 = vsel %vm2128_vm3, %v2118_v29, %v2121_v55  ;;  %v2141_v57 = vsel %vm2131_vm4, %v2127_v38, 1326507024  ;;  %v2139_v20 = vsel %vm2129_vm5, %v2136_v47, %v2138_v11  ;;  %v1993_v42 = vand.u32 2147483647, %v4249_v2 }
 0x220   :  { %v1855_v40 = vclz %v2528_v8  ;;  %v2142_v28 = vsel %vm2130_vm6, %v2124_v12, %v2141_v57  ;;  %v2135_v60 = vsel %vm2129_vm5, %v2132_v34, %v2134_v37  ;;  %vm1982_vm7 = vweird.f32 %v3970_v1 }
 0x221   :  { %v2143_v24 = vsel %vm2129_vm5, %v2140_v44, %v2142_v28  ;;  %v4257_v22 = vmul.u32.u64.low %v2144_v7, %v2139_v20  ;;  %v4258_v63 = vmul.u32.u64.high %v2144_v7, %v2139_v20, %v4257_v22  ;;  %v1996_v54 = vand.u32 2139095040, %v4249_v2 }
 0x222   :  { %v2529_v50 = vadd.s32 4294967294, %v1855_v40  ;;  %v4262_v32 = vmul.u32.u64.low %v2144_v7, %v2143_v24  ;;  %v4263_v53 = vmul.u32.u64.high %v2144_v7, %v2143_v24, %v4262_v32  ;;  %vm1984_vm8 = vcmp.lt.s32.totalorder %v4251_v62, 2 }
 0x223   :  { %vm1985_vm9 = vcmp.eq.s32.totalorder %v4251_v62, 0  ;;  %vm1789_vm10 = vcmp.lt.s32.totalorder %v4077_v18, 0  ;;  %v733_v9 = vmul.f32 %v4129_v19, %v4026_v52  ;;  %vm1988_vm12 = vcmp.eq.s32.totalorder %v4251_v62, 2 }
 0x224   :  { %v1843_v10 = vadd.s32 %v4187_v61, %v4198_v6  ;;  %vm2530_vm11 = vcmp.lt.s32.totalorder %v2529_v50, 0  ;;  %v1997_v45 = vshrl.u32 %v1996_v54, 23  ;;  %v1873_v16 = vsub.s32 4, %v4231_v30 }
 0x225   :  { %v2828_v23 = vpop.eup %2827  ;;  %v1858_v48 = vsel %vm2530_vm11, 0, %v2529_v50  ;;  %v2151_v26 = vmul.u32 %v2144_v7, %v2135_v60  ;;  %v2154_v25 = vadd.s32 1, %v4258_v63  ;;  %v2000_v52 = vand.u32 8388607, %v1993_v42 }
 0x226   :  { %v2830_v5 = vpop.eup %2829  ;;  %v1989_v49 = vxor.u32 2147483648, %v2828_v23  ;;  %v1859_v21 = vsub.s32 32, %v1858_v48  ;;  %v1863_v56 = vsub.s32 4294967266, %v1858_v48  ;;  %v1860_v59 = vshll.u32 %v4246_v17, %v1858_v48 }
 0x227   :  { %v1986_v51 = vxor.u32 2147483648, %v2830_v5  ;;  %vm2153_vm13 = vc.u32 %v4263_v53, %v4257_v22  ;;  %v2535_v61 = vadd.s32 4294967169, %v1997_v45  ;;  %v4287_v4 = vadd.f32 %v4138_v43, %v733_v9 }
 0x228   :  { %v1990_v6 = vsel %vm1988_vm12, %v1989_v49, %v2830_v5  ;;  %v1861_v29 = vshrl.u32 %v1843_v10, %v1859_v21  ;;  %v1864_v55 = vadd.s32 127, %v1863_v56  ;;  %v2155_v12 = vsel %vm2153_vm13, %v2154_v25, %v4258_v63 }
 0x229   :  { %v1987_v41 = vsel %vm1985_vm9, %v2828_v23, %v1986_v51  ;;  %v2156_v39 = vadd.s32 %v2155_v12, %v2151_v26  ;;  %v2003_v38 = vadd.s32 1, %v2535_v61  ;;  %v1874_v3 = vsel %vm1789_vm10, %v1873_v16, %v4231_v30 }
 0x22a   :  { %v1991_v17 = vsel %vm1984_vm8, %v1987_v41, %v1990_v6  ;;  %v1862_v58 = vor.u32 %v1861_v29, %v1860_v59  ;;  %v1865_v47 = vshll.u32 %v1864_v55, 23  ;;  %vm4298_vm15 = vcmp.le.f32.partialorder %v1787_v14, 0.7853982 }
 0x22b   :  { %v1992_v7 = vsel %vm1982_vm7, nan, %v1991_v17  ;;  %v2157_v8 = vadd.s32 536870912, %v2156_v39  ;;  %vm2004_vm14 = vcmp.gt.s32.totalorder %v2003_v38, 0  ;;  %v2001_v37 = vor.u32 8388608, %v2000_v52 }
 0x22c   :  { %2416 = vst [vmem:[#allocation2 + $0x58] sm:$0xff] %v1992_v7  ;;  %v1866_v62 = vor.u32 4788187, %v1865_v47  ;;  %v2005_v11 = vsel %vm2004_vm14, %v2003_v38, 0  ;;  %v1876_v44 = vsel %vm4298_vm15, 0, %v1874_v3  ;;  %v2305_v1 = vand.u32 2139095040, %v4287_v4 }
 0x22d   :  { %v4304_v57 = vshrl.u32 %v2157_v8, 30  ;;  %v2007_v30 = vand.u32 31, %v2005_v11  ;;  %v1869_v20 = vcvt.s32.f32 %v1862_v58  ;;  %v4308_v24 = vand.u32 3, %v1876_v44 }
 0x22e   :  { %v1867_v40 = vand.u32 2147483647, %v1866_v62  ;;  %v4310_v63 = vshll.u32 %v2001_v37, 8  ;;  %v4314_v50 = vmul.f32 %v4129_v19, %v4030_v13  ;;  %v4318_v54 = vshrl.u32 %v2005_v11, 5 }
 0x22f   :  { %v2159_v28 = vshll.u32 %v4304_v57, 30  ;;  %v2008_v60 = vsub.s32 32, %v2007_v30  ;;  %v2306_v10 = vshrl.u32 %v2305_v1, 23  ;;  %v2010_v23 = vshll.u32 %v2879_v27, %v2007_v30 }
 0x230   :  { %v1870_v14 = vmul.f32 %v1869_v20, %v1867_v40  ;;  %v2013_v25 = vshll.u32 %v2880_v31, %v2007_v30  ;;  %v2016_v13 = vshll.u32 %v2881_v35, %v2007_v30  ;;  %v2182_v49 = vsub.s32 4, %v4304_v57 }
 0x231   :  { %v4316_v32 = vsub.s32 %v2156_v39, %v2159_v28  ;;  %v2011_v9 = vshrl.u32 %v2880_v31, %v2008_v60  ;;  %v2014_v48 = vshrl.u32 %v2881_v35, %v2008_v60  ;;  %v2017_v16 = vshrl.u32 %v2882_v33, %v2008_v60 }
 0x232   :  { %v1871_v45 = vxor.u32 2147483648, %v1870_v14  ;;  %v2020_v19 = vshrl.u32 %v2883_v36, %v2008_v60  ;;  %v2019_v56 = vshll.u32 %v2882_v33, %v2007_v30  ;;  %v2022_v29 = vshll.u32 %v2883_v36, %v2007_v30 }
 0x233   :  { %v2162_v26 = vsub.s32 0, %v4316_v32  ;;  %v2012_v21 = vor.u32 %v2011_v9, %v2010_v23  ;;  %v2015_v59 = vor.u32 %v2014_v48, %v2013_v25  ;;  %v2018_v61 = vor.u32 %v2017_v16, %v2016_v13 }
 0x234   :  { %v1872_v5 = vsel %vm1789_vm10, %v1871_v45, %v1870_v14  ;;  %v2021_v6 = vor.u32 %v2020_v19, %v2019_v56  ;;  %v2023_v55 = vshrl.u32 %v2884_v46, %v2008_v60  ;;  %vm2098_vm0 = vcmp.lt.s32.totalorder %v4141_v0, 0 }
 0x235   :  { %v1875_v52 = vsel %vm4298_vm15, %v4077_v18, %v1872_v5  ;;  %v2540_v51 = vmin.u32 %v2162_v26, %v4316_v32  ;;  %v2009_v41 = vshrl.u32 %v2879_v27, %v2008_v60  ;;  %vm2025_vm1 = vcmp.lt.s32.totalorder %v4318_v54, 1 }
 0x236   :  { %2831 = vcosq.f32 %v1875_v52  ;;  %v2024_v39 = vor.u32 %v2023_v55, %v2022_v29  ;;  %vm2026_vm2 = vcmp.lt.s32.totalorder %v4318_v54, 2  ;;  %vm2027_vm3 = vcmp.lt.s32.totalorder %v4318_v54, 3 }
 0x237   :  { %2833 = vsinq.f32 %v1875_v52  ;;  %v2164_v12 = vclz %v2540_v51  ;;  %vm2028_vm4 = vcmp.lt.s32.totalorder %v4318_v54, 4  ;;  %v2033_v58 = vsel %vm2025_vm1, %v2012_v21, %v2015_v59 }
 0x238   :  { %v2030_v17 = vsel %vm2028_vm4, %v2018_v61, 2102212464  ;;  %v2034_v47 = vsel %vm2028_vm4, %v2021_v6, 920167782  ;;  %vm4346_vm5 = vcmp.le.f32.partialorder %v2096_v15, 0.7853982  ;;  %v2029_v7 = vsel %vm2025_vm1, %v2009_v41, %v2012_v21 }
 0x239   :  { %v2541_v38 = vadd.s32 4294967294, %v2164_v12  ;;  %v2035_v8 = vsel %vm2027_vm3, %v2018_v61, %v2034_v47  ;;  %v2037_v34 = vsel %vm2025_vm1, %v2015_v59, %v2018_v61  ;;  %v2038_v62 = vsel %vm2028_vm4, %v2024_v39, 1326507024 }
 0x23a   :  { %vm1882_vm6 = vcmp.eq.s32.totalorder %v4308_v24, 0  ;;  %v2031_v37 = vsel %vm2027_vm3, %v2015_v59, %v2030_v17  ;;  %v2036_v11 = vsel %vm2026_vm2, %v2033_v58, %v2035_v8  ;;  %v2039_v44 = vsel %vm2027_vm3, %v2021_v6, %v2038_v62 }
 0x23b   :  { %vm2542_vm7 = vcmp.lt.s32.totalorder %v2541_v38, 0  ;;  %vm1881_vm8 = vcmp.lt.s32.totalorder %v4308_v24, 2  ;;  %v2040_v15 = vsel %vm2026_vm2, %v2037_v34, %v2039_v44  ;;  %vm1879_vm9 = vweird.f32 %v4077_v18 }
 0x23c   :  { %v2167_v30 = vsel %vm2542_vm7, 0, %v2541_v38  ;;  %v4357_v1 = vmul.u32.u64.low %v4310_v63, %v2036_v11  ;;  %v4358_v40 = vmul.u32.u64.high %v4310_v63, %v2036_v11, %v4357_v1  ;;  %v2152_v20 = vadd.s32 %v4257_v22, %v4263_v53 }
 0x23d   :  { %v2168_v28 = vsub.s32 32, %v2167_v30  ;;  %v2172_v60 = vsub.s32 4294967266, %v2167_v30  ;;  %v2302_v14 = vand.u32 2147483647, %v4287_v4  ;;  %vm1885_vm10 = vcmp.eq.s32.totalorder %v4308_v24, 2 }
 0x23e   :  { %v4367_v9 = vmul.u32.u64.low %v4310_v63, %v2040_v15  ;;  %v4368_v45 = vmul.u32.u64.high %v4310_v63, %v2040_v15, %v4367_v9  ;;  %v2547_v23 = vadd.s32 4294967169, %v2306_v10  ;;  %v2169_v48 = vshll.u32 %v4316_v32, %v2167_v30 }
 0x23f   :  { %v2170_v16 = vshrl.u32 %v2152_v20, %v2168_v28  ;;  %v2173_v26 = vadd.s32 127, %v2172_v60  ;;  %v2032_v25 = vsel %vm2026_vm2, %v2029_v7, %v2031_v37  ;;  %v2183_v22 = vsel %vm2098_vm0, %v2182_v49, %v4304_v57 }
 0x240   :  { %v2832_v13 = vpop.eup %2831  ;;  %v2051_v53 = vadd.s32 1, %v4358_v40  ;;  %v2312_v19 = vadd.s32 1, %v2547_v23  ;;  %v4379_v5 = vadd.f32 %v4138_v43, %v4314_v50  ;;  %v2309_v54 = vand.u32 8388607, %v2302_v14 }
 0x241   :  { %v2834_v10 = vpop.eup %2833  ;;  %v1886_v21 = vxor.u32 2147483648, %v2832_v13  ;;  %v2171_v32 = vor.u32 %v2170_v16, %v2169_v48  ;;  %v2174_v56 = vshll.u32 %v2173_v26, 23  ;;  %v2048_v51 = vmul.u32 %v4310_v63, %v2032_v25 }
 0x242   :  { %v1883_v52 = vxor.u32 2147483648, %v2834_v10  ;;  %vm2050_vm12 = vc.u32 %v4368_v45, %v4357_v1  ;;  %vm2313_vm11 = vcmp.gt.s32.totalorder %v2312_v19, 0  ;;  %v2185_v43 = vsel %vm4346_vm5, 0, %v2183_v22 }
 0x243   :  { %v1887_v57 = vsel %vm1885_vm10, %v1886_v21, %v2834_v10  ;;  %v2175_v49 = vor.u32 4788187, %v2174_v56  ;;  %v2052_v50 = vsel %vm2050_vm12, %v2051_v53, %v4358_v40  ;;  %v2314_v6 = vsel %vm2313_vm11, %v2312_v19, 0 }
 0x244   :  { %v1884_v59 = vsel %vm1882_vm6, %v2832_v13, %v1883_v52  ;;  %v2053_v61 = vadd.s32 %v2052_v50, %v2048_v51  ;;  %v2202_v63 = vand.u32 2139095040, %v4379_v5  ;;  %v2178_v12 = vcvt.s32.f32 %v2171_v32 }
 0x245   :  { %v1888_v29 = vsel %vm1881_vm8, %v1884_v59, %v1887_v57  ;;  %v2176_v55 = vand.u32 2147483647, %v2175_v49  ;;  %v2316_v41 = vand.u32 31, %v2314_v6  ;;  %v4398_v58 = vand.u32 3, %v2185_v43 }
 0x246   :  { %v1889_v39 = vsel %vm1879_vm9, nan, %v1888_v29  ;;  %v2054_v38 = vadd.s32 536870912, %v2053_v61  ;;  %v2310_v8 = vor.u32 8388608, %v2309_v54  ;;  %v2315_v34 = vshrl.u32 %v2314_v6, 5 }
 0x247   :  { %2415 = vst [vmem:[#allocation2 + $0x50] sm:$0xff] %v1889_v39  ;;  %v2179_v17 = vmul.f32 %v2178_v12, %v2176_v55  ;;  %v2317_v47 = vsub.s32 32, %v2316_v41  ;;  %v2203_v62 = vshrl.u32 %v2202_v63, 23  ;;  %v2319_v24 = vshll.u32 %v2879_v27, %v2316_v41 }
 0x248   :  { %v4400_v7 = vshrl.u32 %v2054_v38, 30  ;;  %v2322_v30 = vshll.u32 %v2880_v31, %v2316_v41  ;;  %v2325_v28 = vshll.u32 %v2881_v35, %v2316_v41  ;;  %v2328_v60 = vshll.u32 %v2882_v33, %v2316_v41 }
 0x249   :  { %v2180_v37 = vxor.u32 2147483648, %v2179_v17  ;;  %v2320_v11 = vshrl.u32 %v2880_v31, %v2317_v47  ;;  %v2323_v44 = vshrl.u32 %v2881_v35, %v2317_v47  ;;  %v2326_v15 = vshrl.u32 %v2882_v33, %v2317_v47 }
 0x24a   :  { %v2056_v18 = vshll.u32 %v4400_v7, 30  ;;  %v2329_v40 = vshrl.u32 %v2883_v36, %v2317_v47  ;;  %v2332_v9 = vshrl.u32 %v2884_v46, %v2317_v47  ;;  %v2331_v26 = vshll.u32 %v2883_v36, %v2316_v41 }
 0x24b   :  { %v2181_v20 = vsel %vm2098_vm0, %v2180_v37, %v2179_v17  ;;  %v2321_v16 = vor.u32 %v2320_v11, %v2319_v24  ;;  %v2324_v25 = vor.u32 %v2323_v44, %v2322_v30  ;;  %v2327_v13 = vor.u32 %v2326_v15, %v2325_v28 }
 0x24c   :  { %v2184_v23 = vsel %vm4346_vm5, %v4141_v0, %v2181_v20  ;;  %v4417_v48 = vsub.s32 %v2053_v61, %v2056_v18  ;;  %v2330_v22 = vor.u32 %v2329_v40, %v2328_v60  ;;  %v2318_v19 = vshrl.u32 %v2879_v27, %v2317_v47 }
 0x24d   :  { %2835 = vcosq.f32 %v2184_v23  ;;  %v2333_v10 = vor.u32 %v2332_v9, %v2331_v26  ;;  %vm2334_vm13 = vcmp.lt.s32.totalorder %v2315_v34, 1  ;;  %vm2335_vm14 = vcmp.lt.s32.totalorder %v2315_v34, 2 }
 0x24e   :  { %2837 = vsinq.f32 %v2184_v23  ;;  %v2059_v53 = vsub.s32 0, %v4417_v48  ;;  %v2350_v21 = vshll.u32 %v2310_v8, 8  ;;  %v2543_v3 = vadd.s32 4294967169, %v2203_v62 }
 0x24f   :  { %vm2336_vm15 = vcmp.lt.s32.totalorder %v2315_v34, 3  ;;  %vm2337_vm0 = vcmp.lt.s32.totalorder %v2315_v34, 4  ;;  %v2338_v56 = vsel %vm2334_vm13, %v2318_v19, %v2321_v16  ;;  %v2342_v52 = vsel %vm2334_vm13, %v2321_v16, %v2324_v25 }
 0x250   :  { %v2536_v32 = vmin.u32 %v2059_v53, %v4417_v48  ;;  %v2339_v54 = vsel %vm2337_vm0, %v2327_v13, 2102212464  ;;  %v2343_v51 = vsel %vm2337_vm0, %v2330_v22, 920167782  ;;  %v2346_v57 = vsel %vm2334_vm13, %v2324_v25, %v2327_v13 }
 0x251   :  { %v2340_v43 = vsel %vm2336_vm15, %v2324_v25, %v2339_v54  ;;  %v2344_v50 = vsel %vm2336_vm15, %v2327_v13, %v2343_v51  ;;  %v2347_v59 = vsel %vm2337_vm0, %v2333_v10, 1326507024  ;;  %vm2188_vm1 = vweird.f32 %v4141_v0 }
 0x252   :  { %v2061_v49 = vclz %v2536_v32  ;;  %v2345_v61 = vsel %vm2335_vm14, %v2342_v52, %v2344_v50  ;;  %v2348_v6 = vsel %vm2336_vm15, %v2330_v22, %v2347_v59  ;;  %v2341_v41 = vsel %vm2335_vm14, %v2338_v56, %v2340_v43 }
 0x253   :  { %v2349_v29 = vsel %vm2335_vm14, %v2346_v57, %v2348_v6  ;;  %v4426_v55 = vmul.u32.u64.low %v2350_v21, %v2345_v61  ;;  %v4427_v12 = vmul.u32.u64.high %v2350_v21, %v2345_v61, %v4426_v55  ;;  %v2209_v17 = vadd.s32 1, %v2543_v3 }
 0x254   :  { %v2537_v63 = vadd.s32 4294967294, %v2061_v49  ;;  %v4431_v39 = vmul.u32.u64.low %v2350_v21, %v2349_v29  ;;  %v4432_v38 = vmul.u32.u64.high %v2350_v21, %v2349_v29, %v4431_v39  ;;  %vm2190_vm2 = vcmp.lt.s32.totalorder %v4398_v58, 2 }
 0x255   :  { %vm2191_vm3 = vcmp.eq.s32.totalorder %v4398_v58, 0  ;;  %vm2194_vm4 = vcmp.eq.s32.totalorder %v4398_v58, 2  ;;  %v2049_v8 = vadd.s32 %v4357_v1, %v4368_v45  ;;  %v2199_v37 = vand.u32 2147483647, %v4379_v5 }
 0x256   :  { %vm2538_vm5 = vcmp.lt.s32.totalorder %v2537_v63, 0  ;;  %vm2210_vm6 = vcmp.gt.s32.totalorder %v2209_v17, 0  ;;  %v2357_v18 = vmul.u32 %v2350_v21, %v2341_v41  ;;  %vm2359_vm7 = vc.u32 %v4432_v38, %v4426_v55 }
 0x257   :  { %v2836_v47 = vpop.eup %2835  ;;  %v2064_v62 = vsel %vm2538_vm5, 0, %v2537_v63  ;;  %v2360_v40 = vadd.s32 1, %v4427_v12  ;;  %v2211_v28 = vsel %vm2210_vm6, %v2209_v17, 0  ;;  %v2206_v23 = vand.u32 8388607, %v2199_v37 }
 0x258   :  { %v2838_v34 = vpop.eup %2837  ;;  %v2195_v24 = vxor.u32 2147483648, %v2836_v47  ;;  %v2065_v11 = vsub.s32 32, %v2064_v62  ;;  %v2069_v44 = vsub.s32 4294967266, %v2064_v62  ;;  %v2066_v15 = vshll.u32 %v4417_v48, %v2064_v62 }
 0x259   :  { %v2192_v30 = vxor.u32 2147483648, %v2838_v34  ;;  %v2361_v9 = vsel %vm2359_vm7, %v2360_v40, %v4427_v12  ;;  %v2213_v48 = vand.u32 31, %v2211_v28  ;;  %v2079_v10 = vsub.s32 4, %v4400_v7 }
 0x25a   :  { %v2196_v1 = vsel %vm2194_vm4, %v2195_v24, %v2838_v34  ;;  %v2067_v45 = vshrl.u32 %v2049_v8, %v2065_v11  ;;  %v2070_v20 = vadd.s32 127, %v2069_v44  ;;  %v2362_v13 = vadd.s32 %v2361_v9, %v2357_v18 }
 0x25b   :  { %v2193_v60 = vsel %vm2191_vm3, %v2836_v47, %v2192_v30  ;;  %v2214_v53 = vsub.s32 32, %v2213_v48  ;;  %v2207_v32 = vor.u32 8388608, %v2206_v23  ;;  %v2212_v57 = vshrl.u32 %v2211_v28, 5 }
 0x25c   :  { %v2197_v16 = vsel %vm2190_vm2, %v2193_v60, %v2196_v1  ;;  %v2068_v26 = vor.u32 %v2067_v45, %v2066_v15  ;;  %v2071_v25 = vshll.u32 %v2070_v20, 23  ;;  %v2363_v21 = vadd.s32 536870912, %v2362_v13 }
 0x25d   :  { %v2198_v22 = vsel %vm2188_vm1, nan, %v2197_v16  ;;  %v2217_v56 = vshrl.u32 %v2880_v31, %v2214_v53  ;;  %v2220_v54 = vshrl.u32 %v2881_v35, %v2214_v53  ;;  %v2223_v51 = vshrl.u32 %v2882_v33, %v2214_v53 }
 0x25e   :  { %2418 = vst [vmem:[#allocation2 + $0x68] sm:$0xff] %v2198_v22  ;;  %v2072_v19 = vor.u32 4788187, %v2071_v25  ;;  %v2075_v3 = vcvt.s32.f32 %v2068_v26  ;;  %v4458_v52 = vshrl.u32 %v2363_v21, 30  ;;  %v2226_v0 = vshrl.u32 %v2883_v36, %v2214_v53 }
 0x25f   :  { %v2216_v49 = vshll.u32 %v2879_v27, %v2213_v48  ;;  %v2219_v43 = vshll.u32 %v2880_v31, %v2213_v48  ;;  %v2225_v50 = vshll.u32 %v2882_v33, %v2213_v48  ;;  %vm1995_vm8 = vcmp.lt.s32.totalorder %v4249_v2, 0 }
 0x260   :  { %v2073_v58 = vand.u32 2147483647, %v2072_v19  ;;  %v2365_v61 = vshll.u32 %v4458_v52, 30  ;;  %v2222_v6 = vshll.u32 %v2881_v35, %v2213_v48  ;;  %v2229_v41 = vshrl.u32 %v2884_v46, %v2214_v53 }
 0x261   :  { %v2218_v63 = vor.u32 %v2217_v56, %v2216_v49  ;;  %v2221_v29 = vor.u32 %v2220_v54, %v2219_v43  ;;  %v2227_v12 = vor.u32 %v2226_v0, %v2225_v50  ;;  %v2228_v8 = vshll.u32 %v2883_v36, %v2213_v48 }
 0x262   :  { %v2076_v59 = vmul.f32 %v2075_v3, %v2073_v58  ;;  %v2366_v17 = vsub.s32 %v2362_v13, %v2365_v61  ;;  %v2224_v47 = vor.u32 %v2223_v51, %v2222_v6  ;;  %vm4472_vm9 = vcmp.le.f32.partialorder %v1993_v42, 0.7853982 }
 0x263   :  { %v2080_v35 = vsel %vm1995_vm8, %v2079_v10, %v4400_v7  ;;  %vm2231_vm10 = vcmp.lt.s32.totalorder %v2212_v57, 1  ;;  %v2247_v33 = vshll.u32 %v2207_v32, 8  ;;  %v2230_v34 = vor.u32 %v2229_v41, %v2228_v8 }
 0x264   :  { %v2077_v39 = vxor.u32 2147483648, %v2076_v59  ;;  %v2368_v62 = vsub.s32 0, %v2366_v17  ;;  %vm2234_vm12 = vcmp.lt.s32.totalorder %v2212_v57, 4  ;;  %v2215_v42 = vshrl.u32 %v2879_v27, %v2214_v53 }
 0x265   :  { %v2239_v24 = vsel %vm2231_vm10, %v2218_v63, %v2221_v29  ;;  %v2240_v11 = vsel %vm2234_vm12, %v2227_v12, 920167782  ;;  %vm2233_vm11 = vcmp.lt.s32.totalorder %v2212_v57, 3  ;;  %v2236_v44 = vsel %vm2234_vm12, %v2224_v47, 2102212464 }
 0x266   :  { %v2078_v46 = vsel %vm1995_vm8, %v2077_v39, %v2076_v59  ;;  %v2548_v7 = vmin.u32 %v2368_v62, %v2366_v17  ;;  %vm2232_vm13 = vcmp.lt.s32.totalorder %v2212_v57, 2  ;;  %v2241_v18 = vsel %vm2233_vm11, %v2224_v47, %v2240_v11 }
 0x267   :  { %v2081_v36 = vsel %vm4472_vm9, %v4249_v2, %v2078_v46  ;;  %v2243_v30 = vsel %vm2231_vm10, %v2221_v29, %v2224_v47  ;;  %v2235_v40 = vsel %vm2231_vm10, %v2215_v42, %v2218_v63  ;;  %v2242_v1 = vsel %vm2232_vm13, %v2239_v24, %v2241_v18 }
 0x268   :  { %2839 = vcosq.f32 %v2081_v36  ;;  %v2370_v15 = vclz %v2548_v7  ;;  %v2244_v27 = vsel %vm2234_vm12, %v2230_v34, 1326507024  ;;  %v2237_v45 = vsel %vm2233_vm11, %v2221_v29, %v2236_v44 }
 0x269   :  { %2841 = vsinq.f32 %v2081_v36  ;;  %v2245_v20 = vsel %vm2233_vm11, %v2227_v12, %v2244_v27  ;;  %v4492_v28 = vmul.u32.u64.low %v2247_v33, %v2242_v1  ;;  %v4493_v60 = vmul.u32.u64.high %v2247_v33, %v2242_v1, %v4492_v28 }
 0x26a   :  { %v2549_v9 = vadd.s32 4294967294, %v2370_v15  ;;  %v2246_v23 = vsel %vm2232_vm13, %v2243_v30, %v2245_v20  ;;  %v2082_v48 = vsel %vm4472_vm9, 0, %v2080_v35  ;;  %v2238_v25 = vsel %vm2232_vm13, %v2235_v40, %v2237_v45 }
 0x26b   :  { %v4498_v16 = vmul.u32.u64.low %v2247_v33, %v2246_v23  ;;  %v4499_v26 = vmul.u32.u64.high %v2247_v33, %v2246_v23, %v4498_v16  ;;  %v2257_v22 = vadd.s32 1, %v4493_v60  ;;  %v2086_v53 = vand.u32 3, %v2082_v48 }
 0x26c   :  { %vm2550_vm14 = vcmp.lt.s32.totalorder %v2549_v9, 0  ;;  %v2358_v19 = vadd.s32 %v4426_v55, %v4432_v38  ;;  %v2254_v3 = vmul.u32 %v2247_v33, %v2238_v25  ;;  %vm2085_vm3 = vweird.f32 %v4249_v2 }
 0x26d   :  { %v2373_v13 = vsel %vm2550_vm14, 0, %v2549_v9  ;;  %vm2256_vm15 = vc.u32 %v4499_v26, %v4492_v28  ;;  %vm2091_vm0 = vcmp.eq.s32.totalorder %v2086_v53, 2  ;;  %vm2088_vm1 = vcmp.eq.s32.totalorder %v2086_v53, 0 }
 0x26e   :  { %v2374_v10 = vsub.s32 32, %v2373_v13  ;;  %v2378_v21 = vsub.s32 4294967266, %v2373_v13  ;;  %v2375_v56 = vshll.u32 %v2366_v17, %v2373_v13  ;;  %v2258_v51 = vsel %vm2256_vm15, %v2257_v22, %v4493_v60 }
 0x26f   :  { %v2259_v49 = vadd.s32 %v2258_v51, %v2254_v3  ;;  %vm2087_vm2 = vcmp.lt.s32.totalorder %v2086_v53, 2  ;;  %vm2304_vm4 = vcmp.lt.s32.totalorder %v4287_v4, 0  ;;  %vm4511_vm5 = vcmp.le.f32.partialorder %v2302_v14, 0.7853982 }
 0x270   :  { %v2376_v54 = vshrl.u32 %v2358_v19, %v2374_v10  ;;  %v2379_v58 = vadd.s32 127, %v2378_v21  ;;  %v2388_v46 = vsub.s32 4, %v4458_v52  ;;  %v2255_v7 = vadd.s32 %v4492_v28, %v4499_v26 }
 0x271   :  { %v2260_v38 = vadd.s32 536870912, %v2259_v49  ;;  %vm2394_vm10 = vweird.f32 %v4287_v4  ;;  %vm2201_vm12 = vcmp.lt.s32.totalorder %v4379_v5, 0  ;;  %vm2200_vm11 = vcmp.le.f32.partialorder %v2199_v37, 0.7853982 }
 0x272   :  { %v2840_v32 = vpop.eup %2839  ;;  %v2377_v50 = vor.u32 %v2376_v54, %v2375_v56  ;;  %v2380_v59 = vshll.u32 %v2379_v58, 23  ;;  %v2389_v42 = vsel %vm2304_vm4, %v2388_v46, %v4458_v52 }
 0x273   :  { %v2842_v0 = vpop.eup %2841  ;;  %v2092_v57 = vxor.u32 2147483648, %v2840_v32  ;;  %v2261_v29 = vshrl.u32 %v2260_v38, 30  ;;  %v2391_v14 = vsel %vm4511_vm5, 0, %v2389_v42 }
 0x274   :  { %v2089_v43 = vxor.u32 2147483648, %v2842_v0  ;;  %v2381_v6 = vor.u32 4788187, %v2380_v59  ;;  %v2384_v39 = vcvt.s32.f32 %v2377_v50  ;;  %v2395_v30 = vand.u32 3, %v2391_v14 }
 0x275   :  { %v2093_v55 = vsel %vm2091_vm0, %v2092_v57, %v2842_v0  ;;  %v2262_v17 = vshll.u32 %v2261_v29, 30  ;;  %v2285_v10 = vsub.s32 4, %v2261_v29  ;;  %vm2291_vm0 = vweird.f32 %v4379_v5 }
 0x276   :  { %v2090_v61 = vsel %vm2088_vm1, %v2840_v32, %v2089_v43  ;;  %v2382_v41 = vand.u32 2147483647, %v2381_v6  ;;  %vm2400_vm7 = vcmp.eq.s32.totalorder %v2395_v30, 2  ;;  %vm2397_vm8 = vcmp.eq.s32.totalorder %v2395_v30, 0 }
 0x277   :  { %v2094_v63 = vsel %vm2087_vm2, %v2090_v61, %v2093_v55  ;;  %v2263_v8 = vsub.s32 %v2259_v49, %v2262_v17  ;;  %vm2396_vm9 = vcmp.lt.s32.totalorder %v2395_v30, 2  ;;  %v2286_v3 = vsel %vm2201_vm12, %v2285_v10, %v2261_v29 }
 0x278   :  { %v2095_v12 = vsel %vm2085_vm3, nan, %v2094_v63  ;;  %v2385_v47 = vmul.f32 %v2384_v39, %v2382_v41 }
 0x279   :  { %2417 = vst [vmem:[#allocation2 + $0x60] sm:$0xff] %v2095_v12  ;;  %v2265_v35 = vsub.s32 0, %v2263_v8 }
 0x27a   :  { %v2386_v31 = vxor.u32 2147483648, %v2385_v47 }
 0x27b   :  { %v2544_v34 = vmin.u32 %v2265_v35, %v2263_v8 }
 0x27c   :  { %v2387_v2 = vsel %vm2304_vm4, %v2386_v31, %v2385_v47 }
 0x27d   :  { %v2390_v62 = vsel %vm4511_vm5, %v4287_v4, %v2387_v2  ;;  %v2267_v36 = vclz %v2544_v34  ;;  %v2288_v4 = vsel %vm2200_vm11, 0, %v2286_v3 }
 0x27e   :  { %2843 = vcosq.f32 %v2390_v62  ;;  %v2292_v32 = vand.u32 3, %v2288_v4 }
 0x27f   :  { %2845 = vsinq.f32 %v2390_v62  ;;  %v2545_v24 = vadd.s32 4294967294, %v2267_v36 }
 0x280   :  { %vm2297_vm13 = vcmp.eq.s32.totalorder %v2292_v32, 2  ;;  %vm2294_vm14 = vcmp.eq.s32.totalorder %v2292_v32, 0  ;;  %vm2293_vm15 = vcmp.lt.s32.totalorder %v2292_v32, 2 }
 0x281   :  { %vm2546_vm6 = vcmp.lt.s32.totalorder %v2545_v24, 0 }
 0x282   :  { %v2270_v11 = vsel %vm2546_vm6, 0, %v2545_v24 }
 0x283   :  { %v2271_v44 = vsub.s32 32, %v2270_v11  ;;  %v2275_v18 = vsub.s32 4294967266, %v2270_v11  ;;  %v2272_v15 = vshll.u32 %v2263_v8, %v2270_v11 }
 0x285   :  { %v2273_v40 = vshrl.u32 %v2255_v7, %v2271_v44  ;;  %v2276_v1 = vadd.s32 127, %v2275_v18 }
 0x287   :  { %v2274_v60 = vor.u32 %v2273_v40, %v2272_v15  ;;  %v2277_v9 = vshll.u32 %v2276_v1, 23 }
 0x288   :  { %v2844_v27 = vpop.eup %2843 }
 0x289   :  { %v2846_v45 = vpop.eup %2845  ;;  %v2401_v20 = vxor.u32 2147483648, %v2844_v27  ;;  %v2278_v48 = vor.u32 4788187, %v2277_v9  ;;  %v2281_v25 = vcvt.s32.f32 %v2274_v60 }
 0x28a   :  { %v2398_v52 = vxor.u32 2147483648, %v2846_v45 }
 0x28b   :  { %v2402_v23 = vsel %vm2400_vm7, %v2401_v20, %v2846_v45  ;;  %v2279_v26 = vand.u32 2147483647, %v2278_v48 }
 0x28c   :  { %v2399_v16 = vsel %vm2397_vm8, %v2844_v27, %v2398_v52 }
 0x28d   :  { %v2403_v28 = vsel %vm2396_vm9, %v2399_v16, %v2402_v23  ;;  %v2282_v22 = vmul.f32 %v2281_v25, %v2279_v26 }
 0x28e   :  { %v2404_v13 = vsel %vm2394_vm10, nan, %v2403_v28 }
 0x28f   :  { %2420 = vst [vmem:[#allocation2 + $0x78] sm:$0xff] %v2404_v13  ;;  %v2283_v53 = vxor.u32 2147483648, %v2282_v22 }
 0x291   :  { %v2284_v19 = vsel %vm2201_vm12, %v2283_v53, %v2282_v22 }
 0x292   :  { %v2287_v21 = vsel %vm2200_vm11, %v4379_v5, %v2284_v19 }
 0x293   :  { %2847 = vcosq.f32 %v2287_v21 }
 0x294   :  { %2849 = vsinq.f32 %v2287_v21 }
 0x29d   :  { %v2848_v56 = vpop.eup %2847 }
 0x29e   :  { %v2850_v54 = vpop.eup %2849  ;;  %v2298_v58 = vxor.u32 2147483648, %v2848_v56 }
 0x29f   :  { %v2295_v51 = vxor.u32 2147483648, %v2850_v54 }
 0x2a0   :  { %v2299_v0 = vsel %vm2297_vm13, %v2298_v58, %v2850_v54 }
 0x2a1   :  { %v2296_v37 = vsel %vm2294_vm14, %v2848_v56, %v2295_v51 }
 0x2a2   :  { %v2300_v57 = vsel %vm2293_vm15, %v2296_v37, %v2299_v0 }
 0x2a3   :  { %v2301_v49 = vsel %vm2291_vm0, nan, %v2300_v57 }
 0x2a4   :  { %2419 = vst [vmem:[#allocation2 + $0x70] sm:$0xff] %v2301_v49 }
 0x2a5   :  { %2866 = shalt.err (!%p2863_p4)
}
 0x2a6   :  { %s2867_s9 = scalar_lea.hbm %s4545_s4, 2048 }
 0x2a7   :  { %p2868_p5 = scmp.ne.s32.totalorder %s4545_s4, %s2867_s9  ;;  %p2871_p6 = scmp.lt.u32.totalorder %s2867_s9, %s4545_s4 }
 0x2a9   :  { %p2873_p7 = pnand %p2871_p6, %p2868_p5 }
 0x2ab   :  { %2876 = shalt.err (!%p2873_p7)
}
 0x2ac   :  { %s2886_s14 = smov 128   ;;  %s2887_s15 = smov 8  }
 0x2ad   :  { %2432 = dma.vmem_to_hbm [thread:$0]  %s2427_s5, 2048, %s4545_s4, [#allocation3], %s2886_s14, %s2886_s14, %s2887_s15  }
 0x2ae   :  { %2877 = dma.done.wait [#allocation3], 2048  }
 0x2af   :  { %2878 = vsyncadd [#allocation3], 4294965248 }
 0x2b0   :  { %2436 = vsyncpa [#allocation3], 1 }

</bundles_post_ra>
